<compile_context>
chip_gen: v5e
topology: v5e:2x2
jax: 0.10.0
libtpu: 0.0.40
codegen_flags: <defaults>
</compile_context>

<pallas_src>
import jax
import jax.numpy as jnp
from jax.experimental import pallas as pl
from jax.experimental.pallas import tpu as pltpu

# Small-but-faithful config (module defaults to input_shape=(1,3,70,60); we use
# a smaller spatial size, same channel structure hidden_dim=4, im_chan=3).
INPUT_SHAPE = (1, 3, 12, 10)          # (ignored batch, C, H, W)
UP_SIZE = (218, 178)                  # nn.Upsample(size=(218, 178))
BN_EPS = 1e-5

# (Cin, Cout, kernel_size, stride, final_layer)
LAYERS = [
    (3, 16, 3, 1, False),
    (16, 8, 4, 1, False),
    (8, 4, 3, 2, False),
    (4, 3, 4, 2, True),
]


# ---------------------------------------------------------------------------
# Pallas kernels
# ---------------------------------------------------------------------------
def _convbn_relu_kernel(colsT_ref, w_ref, b_ref, g_ref, bt_ref, o_ref):
    """Fused conv-as-matmul + bias + training-mode BatchNorm + ReLU.

    colsT: (K, M)   w: (Cout, K)   b/g/bt: (Cout, 1)   o: (Cout, M)
    M = N*OH*OW sits on lanes (lane-dense output)."""
    acc = jnp.dot(w_ref[...], colsT_ref[...],
                  preferred_element_type=jnp.float32)          # (Cout, M)
    acc = acc + b_ref[...]                                     # bias broadcast
    inv_m = 1.0 / o_ref.shape[1]
    mean = jnp.sum(acc, axis=1, keepdims=True) * inv_m          # (Cout, 1)
    cen = acc - mean
    var = jnp.sum(cen * cen, axis=1, keepdims=True) * inv_m     # biased var
    scale = g_ref[...] * jax.lax.rsqrt(var + BN_EPS)
    o_ref[...] = jnp.maximum(cen * scale + bt_ref[...], 0.0)


def _conv_tanh_kernel(colsT_ref, w_ref, b_ref, o_ref):
    """Fused final conv-as-matmul + bias + Tanh (no BatchNorm)."""
    acc = jnp.dot(w_ref[...], colsT_ref[...],
                  preferred_element_type=jnp.float32)          # (Cout, M)
    o_ref[...] = jnp.tanh(acc + b_ref[...])


def _upsample_kernel(x_ref, r_ref, c_ref, o_ref):
    """Nearest-neighbor resize as two bf16 selection-matrix matmuls R @ X @ C.

    x: (1, H, W) bf16   r: (OH, H) bf16   c: (W, OWp) bf16   o: (1, OH, OWp) f32
    OWp is padded to a multiple of 128 for unmasked lane-dense stores."""
    t = jnp.dot(r_ref[...], x_ref[0, :, :],
                preferred_element_type=jnp.float32)            # (OH, W) f32
    o_ref[0, :, :] = jnp.dot(t.astype(jnp.bfloat16), c_ref[...],
                             preferred_element_type=jnp.float32)


# ---------------------------------------------------------------------------
# Pallas wrappers
# ---------------------------------------------------------------------------
_VMEM_SPEC = pl.BlockSpec(memory_space=pltpu.MemorySpace.VMEM)


def convbn_relu_pallas(colsT, wT, b, g, bt):
    Cout = wT.shape[0]
    M = colsT.shape[1]
    return pl.pallas_call(
        _convbn_relu_kernel,
        out_shape=jax.ShapeDtypeStruct((Cout, M), jnp.float32),
        in_specs=[_VMEM_SPEC] * 5,
        out_specs=_VMEM_SPEC,
    )(colsT, wT, b.reshape(Cout, 1), g.reshape(Cout, 1), bt.reshape(Cout, 1))


def conv_tanh_pallas(colsT, wT, b):
    Cout = wT.shape[0]
    M = colsT.shape[1]
    return pl.pallas_call(
        _conv_tanh_kernel,
        out_shape=jax.ShapeDtypeStruct((Cout, M), jnp.float32),
        in_specs=[_VMEM_SPEC] * 3,
        out_specs=_VMEM_SPEC,
    )(colsT, wT, b.reshape(Cout, 1))


def upsample_nearest_pallas(x_nchw, out_h, out_w):
    N, C, H, W = x_nchw.shape
    ow_pad = ((out_w + 127) // 128) * 128          # lane-dense output width
    # PyTorch 'nearest': src = floor(dst * in_size / out_size)
    idx_h = (jnp.arange(out_h) * H) // out_h
    idx_w = (jnp.arange(out_w) * W) // out_w
    idx_w_pad = jnp.pad(idx_w, (0, ow_pad - out_w), constant_values=-1)
    row_sel = (idx_h[:, None] == jnp.arange(H)[None, :]).astype(jnp.bfloat16)      # (OH, H)
    col_sel = (jnp.arange(W)[:, None] == idx_w_pad[None, :]).astype(jnp.bfloat16)  # (W, OWp)
    xf = x_nchw.reshape(N * C, H, W).astype(jnp.bfloat16)
    out = pl.pallas_call(
        _upsample_kernel,
        out_shape=jax.ShapeDtypeStruct((N * C, out_h, ow_pad), jnp.float32),
        grid=(N * C,),
        in_specs=[pl.BlockSpec((1, H, W), lambda i: (i, 0, 0)),
                  pl.BlockSpec((out_h, H), lambda i: (0, 0)),
                  pl.BlockSpec((W, ow_pad), lambda i: (0, 0))],
        out_specs=pl.BlockSpec((1, out_h, ow_pad), lambda i: (i, 0, 0)),
        compiler_params=pltpu.CompilerParams(
            dimension_semantics=("parallel",)),    # shardable on v7x's 2 TCs
    )(xf, row_sel, col_sel)
    return out[:, :, :out_w].reshape(N, C, out_h, out_w)


# ---------------------------------------------------------------------------
# Layer glue (dilation / padding / im2col / weight flip) + full forward
# ---------------------------------------------------------------------------
def _im2col_transposed(h_nhwc, k, stride):
    """ConvTranspose2d(stride, padding=0) rewritten as a stride-1 conv of the
    zero-dilated / (k-1)-padded input; returns im2col matrix transposed to
    (K, N*OH*OW) so the Pallas matmul output is lane-dense along M."""
    N, H, W, Cin = h_nhwc.shape
    Hd, Wd = (H - 1) * stride + 1, (W - 1) * stride + 1
    xd = jnp.zeros((N, Hd, Wd, Cin), h_nhwc.dtype)
    xd = xd.at[:, ::stride, ::stride, :].set(h_nhwc)
    xp = jnp.pad(xd, ((0, 0), (k - 1, k - 1), (k - 1, k - 1), (0, 0)))
    OH, OW = Hd + k - 1, Wd + k - 1
    # patch index order = (kh, kw, ci)
    cols = jnp.concatenate(
        [xp[:, kh:kh + OH, kw:kw + OW, :] for kh in range(k) for kw in range(k)],
        axis=-1)                                        # (N, OH, OW, k*k*Cin)
    colsT = cols.reshape(N * OH * OW, k * k * Cin).T    # (K, M)
    return colsT, OH, OW


def _weight_transposed(w_pt, k, Cin, Cout):
    """Equivalent stride-1 conv weight: spatial flip + (kh,kw,ci,co) order,
    returned as (Cout, K) so the matmul output is (Cout, M)."""
    return jnp.transpose(w_pt[:, :, ::-1, ::-1], (2, 3, 0, 1)).reshape(
        k * k * Cin, Cout).T


def generator_forward(x, params):
    N = x.shape[0]
    x = x.reshape(N, 3, INPUT_SHAPE[2], INPUT_SHAPE[3])     # == x.view(len(x), 3, H, W)
    h = jnp.transpose(x, (0, 2, 3, 1)).astype(jnp.float32)  # NCHW -> NHWC
    imgs = None
    for (Cin, Cout, k, stride, final), p in zip(LAYERS, params["layers"]):
        colsT, OH, OW = _im2col_transposed(h, k, stride)
        wT = _weight_transposed(p["w"], k, Cin, Cout)
        if not final:
            y = convbn_relu_pallas(colsT, wT, p["b"], p["gamma"], p["beta"])
            h = jnp.transpose(y.reshape(Cout, N, OH, OW), (1, 2, 3, 0))  # NHWC
        else:
            y = conv_tanh_pallas(colsT, wT, p["b"])
            imgs = jnp.transpose(y.reshape(Cout, N, OH, OW), (1, 0, 2, 3))  # NCHW
    return upsample_nearest_pallas(imgs, UP_SIZE[0], UP_SIZE[1])


# ---------------------------------------------------------------------------
# Pure-JAX reference (for correctness check)
# ---------------------------------------------------------------------------
def reference_forward(x, params):
    N = x.shape[0]
    h = x.reshape(N, 3, INPUT_SHAPE[2], INPUT_SHAPE[3]).astype(jnp.float32)
    for (Cin, Cout, k, stride, final), p in zip(LAYERS, params["layers"]):
        rhs = jnp.transpose(p["w"][:, :, ::-1, ::-1], (2, 3, 0, 1))  # HWIO
        out = jax.lax.conv_general_dilated(
            jnp.transpose(h, (0, 2, 3, 1)), rhs,
            window_strides=(1, 1),
            padding=[(k - 1, k - 1), (k - 1, k - 1)],
            lhs_dilation=(stride, stride),
            dimension_numbers=("NHWC", "HWIO", "NHWC"),
            precision=jax.lax.Precision.HIGHEST) + p["b"]
        out = jnp.transpose(out, (0, 3, 1, 2))
        if not final:
            mean = out.mean(axis=(0, 2, 3), keepdims=True)
            var = out.var(axis=(0, 2, 3), keepdims=True)
            out = (out - mean) / jnp.sqrt(var + BN_EPS)
            out = out * p["gamma"][None, :, None, None] + p["beta"][None, :, None, None]
            out = jnp.maximum(out, 0.0)
        else:
            out = jnp.tanh(out)
        h = out
    H, W = h.shape[2], h.shape[3]
    idx_h = (jnp.arange(UP_SIZE[0]) * H) // UP_SIZE[0]
    idx_w = (jnp.arange(UP_SIZE[1]) * W) // UP_SIZE[1]
    return h[:, :, idx_h][:, :, :, idx_w]


# ---------------------------------------------------------------------------
# Deterministic parameter init (synthetic; PyTorch shapes: w (Cin,Cout,k,k))
# ---------------------------------------------------------------------------
def init_params(key):
    layers = []
    for (Cin, Cout, k, stride, final) in LAYERS:
        key, kw, kb, kg, kbt = jax.random.split(key, 5)
        p = {
            "w": 0.1 * jax.random.normal(kw, (Cin, Cout, k, k), jnp.float32),
            "b": 0.05 * jax.random.normal(kb, (Cout,), jnp.float32),
        }
        if not final:
            p["gamma"] = 1.0 + 0.1 * jax.random.normal(kg, (Cout,), jnp.float32)
            p["beta"] = 0.1 * jax.random.normal(kbt, (Cout,), jnp.float32)
        layers.append(p)
    return {"layers": layers}


if __name__ == "__main__":
    key = jax.random.PRNGKey(0)
    kx, kp = jax.random.split(key)
    N = 2
    x = jax.random.normal(kx, (N, 3, INPUT_SHAPE[2], INPUT_SHAPE[3]), jnp.float32)
    params = init_params(kp)

    out = jax.jit(generator_forward)(x, params)
    out = jax.block_until_ready(out)
    assert out.shape == (N, 3, UP_SIZE[0], UP_SIZE[1]), out.shape

    ref = reference_forward(x, params)
    err = float(jnp.max(jnp.abs(out - ref)))
    assert err < 5e-2, f"max abs err vs reference: {err}"
    print("KERNEL_OK")
</pallas_src>

<mosaic_0001>
module attributes {stable_mosaic.version = 11 : i64} {
  func.func @_convbn_relu_kernel(%arg0: memref<27x336xf32, #tpu.memory_space<vmem>>, %arg1: memref<16x27xf32, #tpu.memory_space<vmem>>, %arg2: memref<16x1xf32, #tpu.memory_space<vmem>>, %arg3: memref<16x1xf32, #tpu.memory_space<vmem>>, %arg4: memref<16x1xf32, #tpu.memory_space<vmem>>, %arg5: memref<16x336xf32, #tpu.memory_space<vmem>>) attributes {dimension_semantics = [], scalar_prefetch = 0 : i64, scratch_operands = 0 : i64, tpu.core_type = #tpu.core_type<tc>} {
    %c0 = arith.constant 0 : index
    %c0_0 = arith.constant 0 : index
    %0 = vector.load %arg1[%c0, %c0_0] : memref<16x27xf32, #tpu.memory_space<vmem>>, vector<16x27xf32>
    %c0_1 = arith.constant 0 : index
    %c0_2 = arith.constant 0 : index
    %1 = vector.load %arg0[%c0_1, %c0_2] : memref<27x336xf32, #tpu.memory_space<vmem>>, vector<27x336xf32>
    %cst = arith.constant dense<0.000000e+00> : vector<16x336xf32>
    %2 = tpu.matmul %0, %1, %cst {dimension_numbers = #tpu.dot_dimension_numbers<[1], [0], [0], [1], [0, 0, 1, 1], [], []>} : vector<16x27xf32>, vector<27x336xf32>, vector<16x336xf32> -> vector<16x336xf32>
    %c0_3 = arith.constant 0 : index
    %c0_4 = arith.constant 0 : index
    %3 = vector.load %arg2[%c0_3, %c0_4] : memref<16x1xf32, #tpu.memory_space<vmem>>, vector<16x1xf32>
    %4 = vector.broadcast %3 : vector<16x1xf32> to vector<16x336xf32>
    %5 = arith.addf %2, %4 : vector<16x336xf32>
    %cst_5 = arith.constant dense<0.000000e+00> : vector<16xf32>
    %6 = vector.multi_reduction <add>, %5, %cst_5 [1] : vector<16x336xf32> to vector<16xf32>
    %7 = vector.shape_cast %6 : vector<16xf32> to vector<16x1xf32>
    %cst_6 = arith.constant 0.00297619053 : f32
    %8 = vector.broadcast %cst_6 : f32 to vector<16x1xf32>
    %9 = arith.mulf %7, %8 : vector<16x1xf32>
    %10 = vector.broadcast %9 : vector<16x1xf32> to vector<16x336xf32>
    %11 = arith.subf %5, %10 : vector<16x336xf32>
    %12 = arith.mulf %11, %11 : vector<16x336xf32>
    %cst_7 = arith.constant dense<0.000000e+00> : vector<16xf32>
    %13 = vector.multi_reduction <add>, %12, %cst_7 [1] : vector<16x336xf32> to vector<16xf32>
    %14 = vector.shape_cast %13 : vector<16xf32> to vector<16x1xf32>
    %cst_8 = arith.constant 0.00297619053 : f32
    %15 = vector.broadcast %cst_8 : f32 to vector<16x1xf32>
    %16 = arith.mulf %14, %15 : vector<16x1xf32>
    %c0_9 = arith.constant 0 : index
    %c0_10 = arith.constant 0 : index
    %17 = vector.load %arg3[%c0_9, %c0_10] : memref<16x1xf32, #tpu.memory_space<vmem>>, vector<16x1xf32>
    %cst_11 = arith.constant 9.99999974E-6 : f32
    %18 = vector.broadcast %cst_11 : f32 to vector<16x1xf32>
    %19 = arith.addf %16, %18 : vector<16x1xf32>
    %20 = math.rsqrt %19 : vector<16x1xf32>
    %21 = arith.mulf %17, %20 : vector<16x1xf32>
    %22 = vector.broadcast %21 : vector<16x1xf32> to vector<16x336xf32>
    %23 = arith.mulf %11, %22 : vector<16x336xf32>
    %c0_12 = arith.constant 0 : index
    %c0_13 = arith.constant 0 : index
    %24 = vector.load %arg4[%c0_12, %c0_13] : memref<16x1xf32, #tpu.memory_space<vmem>>, vector<16x1xf32>
    %25 = vector.broadcast %24 : vector<16x1xf32> to vector<16x336xf32>
    %26 = arith.addf %23, %25 : vector<16x336xf32>
    %cst_14 = arith.constant 0.000000e+00 : f32
    %27 = vector.broadcast %cst_14 : f32 to vector<16x336xf32>
    %28 = arith.maximumf %26, %27 : vector<16x336xf32>
    %c0_15 = arith.constant 0 : index
    %c0_16 = arith.constant 0 : index
    %29 = vector.load %arg5[%c0_15, %c0_16] : memref<16x336xf32, #tpu.memory_space<vmem>>, vector<16x336xf32>
    tpu.vector_store %arg5[%c0_15, %c0_16], %28 {strides = array<i32>} : memref<16x336xf32, #tpu.memory_space<vmem>>, vector<16x336xf32>,
    return
  }
}

module attributes {stable_mosaic.version = 11 : i64} {
  func.func @_convbn_relu_kernel(%arg0: memref<256x510xf32, #tpu.memory_space<vmem>>, %arg1: memref<8x256xf32, #tpu.memory_space<vmem>>, %arg2: memref<8x1xf32, #tpu.memory_space<vmem>>, %arg3: memref<8x1xf32, #tpu.memory_space<vmem>>, %arg4: memref<8x1xf32, #tpu.memory_space<vmem>>, %arg5: memref<8x510xf32, #tpu.memory_space<vmem>>) attributes {dimension_semantics = [], scalar_prefetch = 0 : i64, scratch_operands = 0 : i64, tpu.core_type = #tpu.core_type<tc>} {
    %c0 = arith.constant 0 : index
    %c0_0 = arith.constant 0 : index
    %0 = vector.load %arg1[%c0, %c0_0] : memref<8x256xf32, #tpu.memory_space<vmem>>, vector<8x256xf32>
    %c0_1 = arith.constant 0 : index
    %c0_2 = arith.constant 0 : index
    %1 = vector.load %arg0[%c0_1, %c0_2] : memref<256x510xf32, #tpu.memory_space<vmem>>, vector<256x510xf32>
    %cst = arith.constant dense<0.000000e+00> : vector<8x510xf32>
    %2 = tpu.matmul %0, %1, %cst {dimension_numbers = #tpu.dot_dimension_numbers<[1], [0], [0], [1], [0, 0, 1, 1], [], []>} : vector<8x256xf32>, vector<256x510xf32>, vector<8x510xf32> -> vector<8x510xf32>
    %c0_3 = arith.constant 0 : index
    %c0_4 = arith.constant 0 : index
    %3 = vector.load %arg2[%c0_3, %c0_4] : memref<8x1xf32, #tpu.memory_space<vmem>>, vector<8x1xf32>
    %4 = vector.broadcast %3 : vector<8x1xf32> to vector<8x510xf32>
    %5 = arith.addf %2, %4 : vector<8x510xf32>
    %cst_5 = arith.constant dense<0.000000e+00> : vector<8xf32>
    %6 = vector.multi_reduction <add>, %5, %cst_5 [1] : vector<8x510xf32> to vector<8xf32>
    %7 = vector.shape_cast %6 : vector<8xf32> to vector<8x1xf32>
    %cst_6 = arith.constant 0.00196078443 : f32
    %8 = vector.broadcast %cst_6 : f32 to vector<8x1xf32>
    %9 = arith.mulf %7, %8 : vector<8x1xf32>
    %10 = vector.broadcast %9 : vector<8x1xf32> to vector<8x510xf32>
    %11 = arith.subf %5, %10 : vector<8x510xf32>
    %12 = arith.mulf %11, %11 : vector<8x510xf32>
    %cst_7 = arith.constant dense<0.000000e+00> : vector<8xf32>
    %13 = vector.multi_reduction <add>, %12, %cst_7 [1] : vector<8x510xf32> to vector<8xf32>
    %14 = vector.shape_cast %13 : vector<8xf32> to vector<8x1xf32>
    %cst_8 = arith.constant 0.00196078443 : f32
    %15 = vector.broadcast %cst_8 : f32 to vector<8x1xf32>
    %16 = arith.mulf %14, %15 : vector<8x1xf32>
    %c0_9 = arith.constant 0 : index
    %c0_10 = arith.constant 0 : index
    %17 = vector.load %arg3[%c0_9, %c0_10] : memref<8x1xf32, #tpu.memory_space<vmem>>, vector<8x1xf32>
    %cst_11 = arith.constant 9.99999974E-6 : f32
    %18 = vector.broadcast %cst_11 : f32 to vector<8x1xf32>
    %19 = arith.addf %16, %18 : vector<8x1xf32>
    %20 = math.rsqrt %19 : vector<8x1xf32>
    %21 = arith.mulf %17, %20 : vector<8x1xf32>
    %22 = vector.broadcast %21 : vector<8x1xf32> to vector<8x510xf32>
    %23 = arith.mulf %11, %22 : vector<8x510xf32>
    %c0_12 = arith.constant 0 : index
    %c0_13 = arith.constant 0 : index
    %24 = vector.load %arg4[%c0_12, %c0_13] : memref<8x1xf32, #tpu.memory_space<vmem>>, vector<8x1xf32>
    %25 = vector.broadcast %24 : vector<8x1xf32> to vector<8x510xf32>
    %26 = arith.addf %23, %25 : vector<8x510xf32>
    %cst_14 = arith.constant 0.000000e+00 : f32
    %27 = vector.broadcast %cst_14 : f32 to vector<8x510xf32>
    %28 = arith.maximumf %26, %27 : vector<8x510xf32>
    %c0_15 = arith.constant 0 : index
    %c0_16 = arith.constant 0 : index
    %29 = vector.load %arg5[%c0_15, %c0_16] : memref<8x510xf32, #tpu.memory_space<vmem>>, vector<8x510xf32>
    tpu.vector_store %arg5[%c0_15, %c0_16], %28 {strides = array<i32>} : memref<8x510xf32, #tpu.memory_space<vmem>>, vector<8x510xf32>,
    return
  }
}

module attributes {stable_mosaic.version = 11 : i64} {
  func.func @_convbn_relu_kernel(%arg0: memref<72x2170xf32, #tpu.memory_space<vmem>>, %arg1: memref<4x72xf32, #tpu.memory_space<vmem>>, %arg2: memref<4x1xf32, #tpu.memory_space<vmem>>, %arg3: memref<4x1xf32, #tpu.memory_space<vmem>>, %arg4: memref<4x1xf32, #tpu.memory_space<vmem>>, %arg5: memref<4x2170xf32, #tpu.memory_space<vmem>>) attributes {dimension_semantics = [], scalar_prefetch = 0 : i64, scratch_operands = 0 : i64, tpu.core_type = #tpu.core_type<tc>} {
    %c0 = arith.constant 0 : index
    %c0_0 = arith.constant 0 : index
    %0 = vector.load %arg1[%c0, %c0_0] : memref<4x72xf32, #tpu.memory_space<vmem>>, vector<4x72xf32>
    %c0_1 = arith.constant 0 : index
    %c0_2 = arith.constant 0 : index
    %1 = vector.load %arg0[%c0_1, %c0_2] : memref<72x2170xf32, #tpu.memory_space<vmem>>, vector<72x2170xf32>
    %cst = arith.constant dense<0.000000e+00> : vector<4x2170xf32>
    %2 = tpu.matmul %0, %1, %cst {dimension_numbers = #tpu.dot_dimension_numbers<[1], [0], [0], [1], [0, 0, 1, 1], [], []>} : vector<4x72xf32>, vector<72x2170xf32>, vector<4x2170xf32> -> vector<4x2170xf32>
    %c0_3 = arith.constant 0 : index
    %c0_4 = arith.constant 0 : index
    %3 = vector.load %arg2[%c0_3, %c0_4] : memref<4x1xf32, #tpu.memory_space<vmem>>, vector<4x1xf32>
    %4 = vector.broadcast %3 : vector<4x1xf32> to vector<4x2170xf32>
    %5 = arith.addf %2, %4 : vector<4x2170xf32>
    %cst_5 = arith.constant dense<0.000000e+00> : vector<4xf32>
    %6 = vector.multi_reduction <add>, %5, %cst_5 [1] : vector<4x2170xf32> to vector<4xf32>
    %7 = vector.shape_cast %6 : vector<4xf32> to vector<4x1xf32>
    %cst_6 = arith.constant 4.60829498E-4 : f32
    %8 = vector.broadcast %cst_6 : f32 to vector<4x1xf32>
    %9 = arith.mulf %7, %8 : vector<4x1xf32>
    %10 = vector.broadcast %9 : vector<4x1xf32> to vector<4x2170xf32>
    %11 = arith.subf %5, %10 : vector<4x2170xf32>
    %12 = arith.mulf %11, %11 : vector<4x2170xf32>
    %cst_7 = arith.constant dense<0.000000e+00> : vector<4xf32>
    %13 = vector.multi_reduction <add>, %12, %cst_7 [1] : vector<4x2170xf32> to vector<4xf32>
    %14 = vector.shape_cast %13 : vector<4xf32> to vector<4x1xf32>
    %cst_8 = arith.constant 4.60829498E-4 : f32
    %15 = vector.broadcast %cst_8 : f32 to vector<4x1xf32>
    %16 = arith.mulf %14, %15 : vector<4x1xf32>
    %c0_9 = arith.constant 0 : index
    %c0_10 = arith.constant 0 : index
    %17 = vector.load %arg3[%c0_9, %c0_10] : memref<4x1xf32, #tpu.memory_space<vmem>>, vector<4x1xf32>
    %cst_11 = arith.constant 9.99999974E-6 : f32
    %18 = vector.broadcast %cst_11 : f32 to vector<4x1xf32>
    %19 = arith.addf %16, %18 : vector<4x1xf32>
    %20 = math.rsqrt %19 : vector<4x1xf32>
    %21 = arith.mulf %17, %20 : vector<4x1xf32>
    %22 = vector.broadcast %21 : vector<4x1xf32> to vector<4x2170xf32>
    %23 = arith.mulf %11, %22 : vector<4x2170xf32>
    %c0_12 = arith.constant 0 : index
    %c0_13 = arith.constant 0 : index
    %24 = vector.load %arg4[%c0_12, %c0_13] : memref<4x1xf32, #tpu.memory_space<vmem>>, vector<4x1xf32>
    %25 = vector.broadcast %24 : vector<4x1xf32> to vector<4x2170xf32>
    %26 = arith.addf %23, %25 : vector<4x2170xf32>
    %cst_14 = arith.constant 0.000000e+00 : f32
    %27 = vector.broadcast %cst_14 : f32 to vector<4x2170xf32>
    %28 = arith.maximumf %26, %27 : vector<4x2170xf32>
    %c0_15 = arith.constant 0 : index
    %c0_16 = arith.constant 0 : index
    %29 = vector.load %arg5[%c0_15, %c0_16] : memref<4x2170xf32, #tpu.memory_space<vmem>>, vector<4x2170xf32>
    tpu.vector_store %arg5[%c0_15, %c0_16], %28 {strides = array<i32>} : memref<4x2170xf32, #tpu.memory_space<vmem>>, vector<4x2170xf32>,
    return
  }
}

module attributes {stable_mosaic.version = 11 : i64} {
  func.func @_conv_tanh_kernel(%arg0: memref<64x9216xf32, #tpu.memory_space<vmem>>, %arg1: memref<3x64xf32, #tpu.memory_space<vmem>>, %arg2: memref<3x1xf32, #tpu.memory_space<vmem>>, %arg3: memref<3x9216xf32, #tpu.memory_space<vmem>>) attributes {dimension_semantics = [], scalar_prefetch = 0 : i64, scratch_operands = 0 : i64, tpu.core_type = #tpu.core_type<tc>} {
    %c0 = arith.constant 0 : index
    %c0_0 = arith.constant 0 : index
    %0 = vector.load %arg1[%c0, %c0_0] : memref<3x64xf32, #tpu.memory_space<vmem>>, vector<3x64xf32>
    %c0_1 = arith.constant 0 : index
    %c0_2 = arith.constant 0 : index
    %1 = vector.load %arg0[%c0_1, %c0_2] : memref<64x9216xf32, #tpu.memory_space<vmem>>, vector<64x9216xf32>
    %cst = arith.constant dense<0.000000e+00> : vector<3x9216xf32>
    %2 = tpu.matmul %0, %1, %cst {dimension_numbers = #tpu.dot_dimension_numbers<[1], [0], [0], [1], [0, 0, 1, 1], [], []>} : vector<3x64xf32>, vector<64x9216xf32>, vector<3x9216xf32> -> vector<3x9216xf32>
    %c0_3 = arith.constant 0 : index
    %c0_4 = arith.constant 0 : index
    %3 = vector.load %arg2[%c0_3, %c0_4] : memref<3x1xf32, #tpu.memory_space<vmem>>, vector<3x1xf32>
    %4 = vector.broadcast %3 : vector<3x1xf32> to vector<3x9216xf32>
    %5 = arith.addf %2, %4 : vector<3x9216xf32>
    %6 = math.tanh %5 : vector<3x9216xf32>
    %c0_5 = arith.constant 0 : index
    %c0_6 = arith.constant 0 : index
    %7 = vector.load %arg3[%c0_5, %c0_6] : memref<3x9216xf32, #tpu.memory_space<vmem>>, vector<3x9216xf32>
    tpu.vector_store %arg3[%c0_5, %c0_6], %6 {strides = array<i32>} : memref<3x9216xf32, #tpu.memory_space<vmem>>, vector<3x9216xf32>,
    return
  }
}

module attributes {stable_mosaic.version = 11 : i64} {
  func.func @_upsample_kernel(%arg0: i32, %arg1: memref<1x72x64xbf16, #tpu.memory_space<vmem>>, %arg2: memref<218x72xbf16, #tpu.memory_space<vmem>>, %arg3: memref<64x256xbf16, #tpu.memory_space<vmem>>, %arg4: memref<1x218x256xf32, #tpu.memory_space<vmem>>) attributes {dimension_semantics = [#tpu.dimension_semantics<parallel>], iteration_bounds = array<i64: 6>, scalar_prefetch = 0 : i64, scratch_operands = 0 : i64, tpu.core_type = #tpu.core_type<tc>, window_params = [{transform_indices = @transform_0, window_bounds = array<i64: 1, 72, 64>}, {pipeline_mode = #tpu.pipeline_mode<synchronous>, transform_indices = @transform_1, window_bounds = array<i64: 218, 72>}, {pipeline_mode = #tpu.pipeline_mode<synchronous>, transform_indices = @transform_2, window_bounds = array<i64: 64, 256>}, {transform_indices = @transform_3, window_bounds = array<i64: 1, 218, 256>}]} {
    %c0 = arith.constant 0 : index
    %c0_0 = arith.constant 0 : index
    %0 = vector.load %arg2[%c0, %c0_0] : memref<218x72xbf16, #tpu.memory_space<vmem>>, vector<218x72xbf16>
    %c0_1 = arith.constant 0 : index
    %c0_2 = arith.constant 0 : index
    %c0_3 = arith.constant 0 : index
    %1 = vector.load %arg1[%c0_1, %c0_2, %c0_3] : memref<1x72x64xbf16, #tpu.memory_space<vmem>>, vector<1x72x64xbf16>
    %2 = vector.shape_cast %1 : vector<1x72x64xbf16> to vector<72x64xbf16>
    %cst = arith.constant dense<0.000000e+00> : vector<218x64xf32>
    %3 = tpu.matmul %0, %2, %cst {dimension_numbers = #tpu.dot_dimension_numbers<[1], [0], [0], [1], [0, 0, 1, 1], [], []>} : vector<218x72xbf16>, vector<72x64xbf16>, vector<218x64xf32> -> vector<218x64xf32>
    %4 = arith.truncf %3 : vector<218x64xf32> to vector<218x64xbf16>
    %c0_4 = arith.constant 0 : index
    %c0_5 = arith.constant 0 : index
    %5 = vector.load %arg3[%c0_4, %c0_5] : memref<64x256xbf16, #tpu.memory_space<vmem>>, vector<64x256xbf16>
    %cst_6 = arith.constant dense<0.000000e+00> : vector<218x256xf32>
    %6 = tpu.matmul %4, %5, %cst_6 {dimension_numbers = #tpu.dot_dimension_numbers<[1], [0], [0], [1], [0, 0, 1, 1], [], []>} : vector<218x64xbf16>, vector<64x256xbf16>, vector<218x256xf32> -> vector<218x256xf32>
    %c0_7 = arith.constant 0 : index
    %c0_8 = arith.constant 0 : index
    %c0_9 = arith.constant 0 : index
    %7 = vector.load %arg4[%c0_7, %c0_8, %c0_9] : memref<1x218x256xf32, #tpu.memory_space<vmem>>, vector<1x218x256xf32>
    %8 = vector.shape_cast %7 : vector<1x218x256xf32> to vector<218x256xf32>
    %9 = vector.shape_cast %6 : vector<218x256xf32> to vector<1x218x256xf32>
    tpu.vector_store %arg4[%c0_7, %c0_8, %c0_9], %9 {strides = array<i32>} : memref<1x218x256xf32, #tpu.memory_space<vmem>>, vector<1x218x256xf32>,
    return
  }
  func.func @transform_0(%arg0: i32) -> (i32, i32, i32) {
    %c0_i32 = arith.constant 0 : i32
    %c0_i32_0 = arith.constant 0 : i32
    %c0_i32_1 = arith.constant 0 : i32
    return %arg0, %c0_i32, %c0_i32_0 : i32, i32, i32
  }
  func.func @transform_1(%arg0: i32) -> (i32, i32) {
    %c0_i32 = arith.constant 0 : i32
    %c0_i32_0 = arith.constant 0 : i32
    %c0_i32_1 = arith.constant 0 : i32
    return %c0_i32, %c0_i32_0 : i32, i32
  }
  func.func @transform_2(%arg0: i32) -> (i32, i32) {
    %c0_i32 = arith.constant 0 : i32
    %c0_i32_0 = arith.constant 0 : i32
    %c0_i32_1 = arith.constant 0 : i32
    return %c0_i32, %c0_i32_0 : i32, i32
  }
  func.func @transform_3(%arg0: i32) -> (i32, i32, i32) {
    %c0_i32 = arith.constant 0 : i32
    %c0_i32_0 = arith.constant 0 : i32
    %c0_i32_1 = arith.constant 0 : i32
    return %arg0, %c0_i32, %c0_i32_0 : i32, i32, i32
  }
}

</mosaic_0001>

<bundles_post_ra>
// kernel: generator_forward.5
= control target key start
LH: loop header
LB: loop body
LE: loop exit
PB: predicated region body
PF: predicated region fallthrough
CT: control target
= control target key end

     0   :  { %vm53_vm0 = vcmask 1042432   ;;  %v266_v3 = vmov 0   ;;  %vm46_vm1 = vcmask 220160   ;;  %vm133_vm2 = vcmask 654336   ;;  %s417_s0 = inlined_call_operand.vmem [shape: f32[27,336], index: 0, kind: input, shape index: {}]   ;;  %s418_s1 = inlined_call_operand.vmem [shape: f32[16,27], index: 1, kind: input, shape index: {}]   ;;  %s419_s2 = inlined_call_operand.vmem [shape: f32[16,1], index: 2, kind: input, shape index: {}]   ;;  %s420_s4 = inlined_call_operand.vmem [shape: f32[16,1], index: 4, kind: input, shape index: {}]   ;;  %s421_s3 = inlined_call_operand.vmem [shape: f32[16,1], index: 3, kind: input, shape index: {}]   ;;  %s422_s5 = inlined_call_operand.vmem [shape: f32[16,336], index: 5, kind: output, shape index: {}]  }
   0x1   :  { %v31_v0 = vld [vmem:[%s417_s0 + $0x48] sm:$0x7]  ;;  %v32_v1 = vld [vmem:[%s417_s0 + $0x50] sm:$0x7]  ;;  %v33_v2 = vld [vmem:[%s417_s0 + $0x58] sm:$0x7]  ;;  %259 = vset.pattern.permute.xlu0 %v266_v3  ;;  %260 = vset.pattern.permute.xlu1 %v266_v3 }
   0x2   :  { %254 = vmatpush.msk.msra.mxu3 %vm53_vm0, %v31_v0  ;;  %248 = vmatpush.msk.msra.mxu1 %vm53_vm0, %v32_v1  ;;  %v28_v4 = vld [vmem:[%s417_s0 + $0x30] sm:$0xff]  ;;  %v29_v5 = vld [vmem:[%s417_s0 + $0x38] sm:$0xff]  ;;  %v30_v6 = vld [vmem:[%s417_s0 + $0x40] sm:$0xff] }
   0x3   :  { %251 = vmatpush.msk.msra.mxu2 %vm53_vm0, %v33_v2  ;;  %v25_v7 = vld [vmem:[%s417_s0 + $0x18] sm:$0xff]  ;;  %v26_v8 = vld [vmem:[%s417_s0 + $0x20] sm:$0xff]  ;;  %245 = vmatpush.msk.msra.mxu0 %vm53_vm0, %v31_v0  ;;  %v27_v9 = vld [vmem:[%s417_s0 + $0x28] sm:$0xff] }
   0x4   :  { %255 = vmatpush.msra.mxu3 %v28_v4  ;;  %99 = vmatpush.msra.mxu1 %v29_v5  ;;  %v22_v10 = vld [vmem:[%s417_s0] sm:$0xff]  ;;  %v23_v11 = vld [vmem:[%s417_s0 + $0x8] sm:$0xff]  ;;  %v24_v12 = vld [vmem:[%s417_s0 + $0x10] sm:$0xff] }
   0x5   :  { %122 = vmatpush.msra.mxu2 %v30_v6  ;;  %76 = vmatpush.msra.mxu0 %v28_v4  ;;  %v21_v13 = vld [vmem:[%s418_s1 + $0x8] sm:$0xff]  ;;  %v20_v14 = vld [vmem:[%s418_s1] sm:$0xff] }
   0x6   :  { %256 = vmatpush.msra.mxu3 %v25_v7  ;;  %100 = vmatpush.msra.mxu1 %v26_v8  ;;  %v34_v15 = vld [vmem:[%s419_s2] sm:$0xff]  ;;  %v35_v16 = vld [vmem:[%s419_s2 + $0x8] sm:$0xff] }
   0x7   :  { %123 = vmatpush.msra.mxu2 %v27_v9  ;;  %77 = vmatpush.msra.mxu0 %v25_v7  ;;  %v211_v61 = vld [vmem:[%s420_s4] sm:$0xff] }
   0x8   :  { %257 = vmatpush.msra.mxu3 %v22_v10  ;;  %101 = vmatpush.msra.mxu1 %v23_v11  ;;  %v169_v9 = vld [vmem:[%s421_s3] sm:$0xff] }
   0x9   :  { %124 = vmatpush.msra.mxu2 %v24_v12  ;;  %247 = vmatmul.msk.f32.vlgmr.msra.gmra.mxu3 %vm46_vm1, %v21_v13 }
   0xa   :  { %249 = vmatmul.msk.f32.vlgmr.msra.gmra.mxu1 %vm46_vm1, %v20_v14  ;;  %252 = vmatmul.msk.f32.vlgmr.msra.gmra.mxu2 %vm46_vm1, %v20_v14 }
   0xb   :  { %78 = vmatpush.msra.mxu0 %v22_v10  ;;  %38 = vperm.xlu0 %259, %v34_v15  }
   0xc   :  { %246 = vmatmul.msk.f32.vlgmr.msra.gmra.mxu0 %vm46_vm1, %v20_v14  ;;  %261 = vset.pattern.permute.xlu2 %v266_v3 }
  0x12   :  { %250 = vmatmul.msk.f32.gmra.mxu1 %vm46_vm1, %v21_v13  ;;  %253 = vmatmul.msk.f32.gmra.mxu2 %vm46_vm1, %v21_v13 }
  0x13   :  { %43 = vperm.xlu0 %259, %v35_v16   ;;  %v170_v16 = vld [vmem:[%s421_s3 + $0x8] sm:$0xff] }
  0x7d   :  { %v39_v18 = vpop.permute.xlu0 %38 }
  0x85   :  { %v44_v28 = vpop.permute.xlu0 %43 }
  0x87   :  { %v103_v17 = vpop.f32.mrf.mxu1 }
  0x88   :  { %v104_v19 = vadd.f32 %v103_v17, %v39_v18 }
  0x89   :  { %v80_v20 = vpop.f32.mrf.mxu0 }
  0x8a   :  { %v81_v21 = vadd.f32 %v80_v20, %v39_v18 }
  0x8c   :  { %v132_v23 = vadd.f32 %v104_v19, %v81_v21  ;;  %v83_v29 = vpop.f32.mrf.mxu3 }
  0x8d   :  { %v126_v22 = vpop.f32.mrf.mxu2  ;;  %v84_v31 = vadd.f32 %v83_v29, %v44_v28 }
  0x8e   :  { %v127_v24 = vadd.f32 %v126_v22, %v39_v18  ;;  %v212_v18 = vld [vmem:[%s420_s4 + $0x8] sm:$0xff] }
  0x8f   :  { %v106_v25 = vpop.f32.mrf.mxu1 }
  0x90   :  { %v134_v26 = vsel %vm133_vm2, %v127_v24, 0.0  ;;  %v107_v30 = vadd.f32 %v106_v25, %v44_v28 }
  0x91   :  { %v135_v27 = vadd.f32 %v134_v26, %v132_v23 }
  0x92   :  { %v138_v34 = vadd.f32 %v107_v30, %v84_v31 }
  0x93   :  { %136 = vadd.xlane.f32.xlu1 %v135_v27 }
  0x95   :  { %v129_v32 = vpop.f32.mrf.mxu2 }
  0x96   :  { %v130_v33 = vadd.f32 %v129_v32, %v44_v28 }
  0x98   :  { %v139_v35 = vsel %vm133_vm2, %v130_v33, 0.0 }
  0x99   :  { %v140_v36 = vadd.f32 %v139_v35, %v138_v34 }
  0x9b   :  { %141 = vadd.xlane.f32.xlu1 %v140_v36 }
 0x106   :  { %v137_v37 = vpop.xlane.xlu1 %136 }
 0x107   :  { %v143_v38 = vmul.f32 0.0029761905, %v137_v37 }
 0x109   :  { %v353_v39 = vsub.f32 %v81_v21, %v143_v38  ;;  %v355_v40 = vsub.f32 %v104_v19, %v143_v38  ;;  %v357_v41 = vsub.f32 %v127_v24, %v143_v38 }
 0x10b   :  { %v151_v42 = vmul.f32 %v353_v39, %v353_v39  ;;  %v152_v43 = vmul.f32 %v355_v40, %v355_v40  ;;  %v153_v44 = vmul.f32 %v357_v41, %v357_v41 }
 0x10d   :  { %v157_v45 = vadd.f32 %v152_v43, %v151_v42  ;;  %v158_v46 = vsel %vm133_vm2, %v153_v44, 0.0 }
 0x10e   :  { %v142_v47 = vpop.xlane.xlu1 %141 }
 0x10f   :  { %v144_v48 = vmul.f32 0.0029761905, %v142_v47  ;;  %v159_v49 = vadd.f32 %v158_v46, %v157_v45 }
 0x111   :  { %v366_v50 = vsub.f32 %v84_v31, %v144_v48  ;;  %v368_v51 = vsub.f32 %v107_v30, %v144_v48  ;;  %v370_v52 = vsub.f32 %v130_v33, %v144_v48  ;;  %160 = vadd.xlane.f32.xlu2 %v159_v49 }
 0x113   :  { %v154_v53 = vmul.f32 %v366_v50, %v366_v50  ;;  %v155_v54 = vmul.f32 %v368_v51, %v368_v51  ;;  %v156_v55 = vmul.f32 %v370_v52, %v370_v52 }
 0x115   :  { %v162_v56 = vadd.f32 %v155_v54, %v154_v53  ;;  %v163_v57 = vsel %vm133_vm2, %v156_v55, 0.0 }
 0x117   :  { %v164_v58 = vadd.f32 %v163_v57, %v162_v56 }
 0x119   :  { %165 = vadd.xlane.f32.xlu2 %v164_v58 }
 0x131   :  { %215 = vperm.xlu2 %261, %v211_v61  }
 0x184   :  { %v161_v59 = vpop.xlane.xlu2 %160 }
 0x185   :  { %v167_v60 = vmul.f32 0.0029761905, %v161_v59 }
 0x187   :  { %v171_v62 = vadd.f32 1e-05, %v167_v60 }
 0x189   :  { %262 = vrsqrt.f32 %v171_v62  ;;  %vm179_vm4 = vweird.f32 %v171_v62 }
 0x18c   :  { %v166_v63 = vpop.xlane.xlu2 %165 }
 0x18d   :  { %v168_v0 = vmul.f32 0.0029761905, %v166_v63 }
 0x18f   :  { %v263_v1 = vpop.eup %262  ;;  %v172_v2 = vadd.f32 1e-05, %v168_v0 }
 0x190   :  { %v174_v3 = vmul.f32 %v263_v1, %v171_v62  ;;  %vm180_vm3 = vweird.f32 %v263_v1 }
 0x191   :  { %264 = vrsqrt.f32 %v172_v2  ;;  %vm181_vm5 = vmor %vm179_vm4, %vm180_vm3  ;;  %vm189_vm7 = vweird.f32 %v172_v2 }
 0x192   :  { %v175_v4 = vmul.f32 %v263_v1, %v174_v3 }
 0x194   :  { %v176_v5 = vmul.f32 0.5, %v175_v4  ;;  %v216_v22 = vpop.permute.xlu2 %215 }
 0x196   :  { %v177_v6 = vsub.f32 1.5, %v176_v5 }
 0x197   :  { %v265_v7 = vpop.eup %264 }
 0x198   :  { %v184_v8 = vmul.f32 %v265_v7, %v172_v2  ;;  %v178_v10 = vmul.f32 %v263_v1, %v177_v6  ;;  %vm190_vm6 = vweird.f32 %v265_v7 }
 0x199   :  { %vm191_vm8 = vmor %vm189_vm7, %vm190_vm6 }
 0x19a   :  { %v185_v11 = vmul.f32 %v265_v7, %v184_v8  ;;  %v182_v12 = vsel %vm181_vm5, %v263_v1, %v178_v10 }
 0x19b   :  { %v193_v13 = vmul.f32 %v182_v12, %v169_v9 }
 0x19c   :  { %v186_v14 = vmul.f32 0.5, %v185_v11 }
 0x19d   :  { %197 = vperm.xlu0 %259, %v193_v13  }
 0x19e   :  { %v187_v15 = vsub.f32 1.5, %v186_v14 }
 0x1a0   :  { %v188_v17 = vmul.f32 %v265_v7, %v187_v15 }
 0x1a2   :  { %v192_v19 = vsel %vm191_vm8, %v265_v7, %v188_v17 }
 0x1a3   :  { %v194_v20 = vmul.f32 %v192_v19, %v170_v16 }
 0x1a5   :  { %220 = vperm.xlu0 %259, %v212_v18   ;;  %202 = vperm.xlu1 %260, %v194_v20  }
 0x20f   :  { %v198_v21 = vpop.permute.xlu0 %197 }
 0x210   :  { %v205_v23 = vmul.f32 %v198_v21, %v353_v39  ;;  %v206_v24 = vmul.f32 %v198_v21, %v355_v40  ;;  %v207_v25 = vmul.f32 %v198_v21, %v357_v41 }
 0x212   :  { %v223_v26 = vadd.f32 %v216_v22, %v205_v23  ;;  %v224_v27 = vadd.f32 %v216_v22, %v206_v24  ;;  %v225_v28 = vadd.f32 %v216_v22, %v207_v25 }
 0x214   :  { %v229_v29 = vmax.f32 %v223_v26, 0.0  ;;  %v230_v30 = vmax.f32 %v224_v27, 0.0  ;;  %v231_v31 = vmax.f32 %v225_v28, 0.0 }
 0x216   :  { %235 = vst [vmem:[%s422_s5] sm:$0xff] %v229_v29 }
 0x217   :  { %236 = vst [vmem:[%s422_s5 + $0x8] sm:$0xff] %v230_v30  ;;  %v203_v32 = vpop.permute.xlu1 %202  ;;  %v221_v36 = vpop.permute.xlu0 %220 }
 0x218   :  { %237 = vst.msk [vmem:[%s422_s5 + $0x10] sm:$0xff] %vm133_vm2, %v231_v31  ;;  %v208_v33 = vmul.f32 %v203_v32, %v366_v50  ;;  %v209_v34 = vmul.f32 %v203_v32, %v368_v51  ;;  %v210_v35 = vmul.f32 %v203_v32, %v370_v52 }
 0x21a   :  { %v226_v37 = vadd.f32 %v221_v36, %v208_v33  ;;  %v227_v38 = vadd.f32 %v221_v36, %v209_v34  ;;  %v228_v39 = vadd.f32 %v221_v36, %v210_v35 }
 0x21c   :  { %v232_v40 = vmax.f32 %v226_v37, 0.0  ;;  %v233_v41 = vmax.f32 %v227_v38, 0.0  ;;  %v234_v42 = vmax.f32 %v228_v39, 0.0 }
 0x21e   :  { %238 = vst [vmem:[%s422_s5 + $0x18] sm:$0xff] %v232_v40 }
 0x21f   :  { %239 = vst [vmem:[%s422_s5 + $0x20] sm:$0xff] %v233_v41 }
 0x220   :  { %240 = vst.msk [vmem:[%s422_s5 + $0x28] sm:$0xff] %vm133_vm2, %v234_v42 }

// kernel: generator_forward.6
= control target key start
LH: loop header
LB: loop body
LE: loop exit
PB: predicated region body
PF: predicated region fallthrough
CT: control target
= control target key end

     0   :  { %vm318_vm0 = vcmask 1031168   ;;  %s834_s0 = inlined_call_operand.vmem [shape: f32[256,510], index: 0, kind: input, shape index: {}]   ;;  %s835_s1 = inlined_call_operand.vmem [shape: f32[8,256], index: 1, kind: input, shape index: {}]   ;;  %s836_s2 = inlined_call_operand.vmem [shape: f32[8,1], index: 2, kind: input, shape index: {}]   ;;  %s837_s4 = inlined_call_operand.vmem [shape: f32[8,1], index: 4, kind: input, shape index: {}]   ;;  %s838_s3 = inlined_call_operand.vmem [shape: f32[8,1], index: 3, kind: input, shape index: {}]   ;;  %s839_s5 = inlined_call_operand.vmem [shape: f32[8,510], index: 5, kind: output, shape index: {}]  }
   0x1   :  { %v82_v0 = vld [vmem:[%s834_s0 + $0x1e0] sm:$0xff]  ;;  %v83_v1 = vld [vmem:[%s834_s0 + $0x1e8] sm:$0xff]  ;;  %v84_v62 = vld [vmem:[%s834_s0 + $0x1f0] sm:$0xff] }
   0x2   :  { %v78_v2 = vld [vmem:[%s834_s0 + $0x1c0] sm:$0xff]  ;;  %156 = vmatpush.msra.mxu0 %v82_v0  ;;  %196 = vmatpush.msra.mxu2 %v83_v1  ;;  %v79_v4 = vld [vmem:[%s834_s0 + $0x1c8] sm:$0xff]  ;;  %v85_v63 = vld [vmem:[%s834_s0 + $0x1f8] sm:$0xff] }
   0x3   :  { %v146_v3 = vld [vmem:[%s834_s0 + $0x3e0] sm:$0xff]  ;;  %v147_v5 = vld [vmem:[%s834_s0 + $0x3e8] sm:$0xff] }
   0x4   :  { %176 = vmatpush.msra.mxu1 %v146_v3  ;;  %216 = vmatpush.msra.mxu3 %v147_v5  ;;  %v74_v6 = vld [vmem:[%s834_s0 + $0x1a0] sm:$0xff]  ;;  %v75_v8 = vld [vmem:[%s834_s0 + $0x1a8] sm:$0xff]  ;;  %v148_v3 = vld [vmem:[%s834_s0 + $0x3f0] sm:$0xff] }
   0x5   :  { %v142_v7 = vld [vmem:[%s834_s0 + $0x3c0] sm:$0xff]  ;;  %157 = vmatpush.msra.mxu0 %v78_v2  ;;  %197 = vmatpush.msra.mxu2 %v79_v4  ;;  %v143_v9 = vld [vmem:[%s834_s0 + $0x3c8] sm:$0xff]  ;;  %v80_v2 = vld [vmem:[%s834_s0 + $0x1d0] sm:$0xff] }
   0x6   :  { %v138_v10 = vld [vmem:[%s834_s0 + $0x3a0] sm:$0xff]  ;;  %177 = vmatpush.msra.mxu1 %v142_v7  ;;  %217 = vmatpush.msra.mxu3 %v143_v9  ;;  %v71_v12 = vld [vmem:[%s834_s0 + $0x188] sm:$0xff]  ;;  %v81_v4 = vld [vmem:[%s834_s0 + $0x1d8] sm:$0xff] }
   0x7   :  { %v70_v11 = vld [vmem:[%s834_s0 + $0x180] sm:$0xff]  ;;  %v139_v13 = vld [vmem:[%s834_s0 + $0x3a8] sm:$0xff]  ;;  %158 = vmatpush.msra.mxu0 %v74_v6  ;;  %198 = vmatpush.msra.mxu2 %v75_v8  ;;  %v149_v5 = vld [vmem:[%s834_s0 + $0x3f8] sm:$0xff] }
   0x8   :  { %v134_v14 = vld [vmem:[%s834_s0 + $0x380] sm:$0xff]  ;;  %v135_v15 = vld [vmem:[%s834_s0 + $0x388] sm:$0xff]  ;;  %178 = vmatpush.msra.mxu1 %v138_v10  ;;  %218 = vmatpush.msra.mxu3 %v139_v13  ;;  %v76_v6 = vld [vmem:[%s834_s0 + $0x1b0] sm:$0xff] }
   0x9   :  { %v66_v16 = vld [vmem:[%s834_s0 + $0x160] sm:$0xff]  ;;  %v67_v17 = vld [vmem:[%s834_s0 + $0x168] sm:$0xff]  ;;  %159 = vmatpush.msra.mxu0 %v70_v11  ;;  %199 = vmatpush.msra.mxu2 %v71_v12  ;;  %v144_v7 = vld [vmem:[%s834_s0 + $0x3d0] sm:$0xff] }
   0xa   :  { %v130_v18 = vld [vmem:[%s834_s0 + $0x360] sm:$0xff]  ;;  %v131_v19 = vld [vmem:[%s834_s0 + $0x368] sm:$0xff]  ;;  %179 = vmatpush.msra.mxu1 %v134_v14  ;;  %219 = vmatpush.msra.mxu3 %v135_v15  ;;  %v77_v8 = vld [vmem:[%s834_s0 + $0x1b8] sm:$0xff] }
   0xb   :  { %v62_v20 = vld [vmem:[%s834_s0 + $0x140] sm:$0xff]  ;;  %v63_v21 = vld [vmem:[%s834_s0 + $0x148] sm:$0xff]  ;;  %160 = vmatpush.msra.mxu0 %v66_v16  ;;  %200 = vmatpush.msra.mxu2 %v67_v17  ;;  %v145_v9 = vld [vmem:[%s834_s0 + $0x3d8] sm:$0xff] }
   0xc   :  { %v126_v22 = vld [vmem:[%s834_s0 + $0x340] sm:$0xff]  ;;  %v127_v23 = vld [vmem:[%s834_s0 + $0x348] sm:$0xff]  ;;  %180 = vmatpush.msra.mxu1 %v130_v18  ;;  %220 = vmatpush.msra.mxu3 %v131_v19  ;;  %v72_v10 = vld [vmem:[%s834_s0 + $0x190] sm:$0xff] }
   0xd   :  { %v58_v24 = vld [vmem:[%s834_s0 + $0x120] sm:$0xff]  ;;  %v59_v25 = vld [vmem:[%s834_s0 + $0x128] sm:$0xff]  ;;  %161 = vmatpush.msra.mxu0 %v62_v20  ;;  %201 = vmatpush.msra.mxu2 %v63_v21  ;;  %v140_v11 = vld [vmem:[%s834_s0 + $0x3b0] sm:$0xff] }
   0xe   :  { %v122_v26 = vld [vmem:[%s834_s0 + $0x320] sm:$0xff]  ;;  %v123_v27 = vld [vmem:[%s834_s0 + $0x328] sm:$0xff]  ;;  %181 = vmatpush.msra.mxu1 %v126_v22  ;;  %221 = vmatpush.msra.mxu3 %v127_v23  ;;  %v73_v12 = vld [vmem:[%s834_s0 + $0x198] sm:$0xff] }
   0xf   :  { %v54_v28 = vld [vmem:[%s834_s0 + $0x100] sm:$0xff]  ;;  %v55_v29 = vld [vmem:[%s834_s0 + $0x108] sm:$0xff]  ;;  %162 = vmatpush.msra.mxu0 %v58_v24  ;;  %202 = vmatpush.msra.mxu2 %v59_v25  ;;  %v141_v13 = vld [vmem:[%s834_s0 + $0x3b8] sm:$0xff] }
  0x10   :  { %v118_v30 = vld [vmem:[%s834_s0 + $0x300] sm:$0xff]  ;;  %v119_v31 = vld [vmem:[%s834_s0 + $0x308] sm:$0xff]  ;;  %182 = vmatpush.msra.mxu1 %v122_v26  ;;  %222 = vmatpush.msra.mxu3 %v123_v27  ;;  %v68_v14 = vld [vmem:[%s834_s0 + $0x170] sm:$0xff] }
  0x11   :  { %v50_v32 = vld [vmem:[%s834_s0 + $0xe0] sm:$0xff]  ;;  %v51_v33 = vld [vmem:[%s834_s0 + $0xe8] sm:$0xff]  ;;  %163 = vmatpush.msra.mxu0 %v54_v28  ;;  %203 = vmatpush.msra.mxu2 %v55_v29  ;;  %v136_v15 = vld [vmem:[%s834_s0 + $0x390] sm:$0xff] }
  0x12   :  { %v114_v34 = vld [vmem:[%s834_s0 + $0x2e0] sm:$0xff]  ;;  %v115_v35 = vld [vmem:[%s834_s0 + $0x2e8] sm:$0xff]  ;;  %183 = vmatpush.msra.mxu1 %v118_v30  ;;  %223 = vmatpush.msra.mxu3 %v119_v31  ;;  %v69_v16 = vld [vmem:[%s834_s0 + $0x178] sm:$0xff] }
  0x13   :  { %v46_v36 = vld [vmem:[%s834_s0 + $0xc0] sm:$0xff]  ;;  %v47_v37 = vld [vmem:[%s834_s0 + $0xc8] sm:$0xff]  ;;  %164 = vmatpush.msra.mxu0 %v50_v32  ;;  %204 = vmatpush.msra.mxu2 %v51_v33  ;;  %v137_v17 = vld [vmem:[%s834_s0 + $0x398] sm:$0xff] }
  0x14   :  { %v110_v38 = vld [vmem:[%s834_s0 + $0x2c0] sm:$0xff]  ;;  %v111_v39 = vld [vmem:[%s834_s0 + $0x2c8] sm:$0xff]  ;;  %184 = vmatpush.msra.mxu1 %v114_v34  ;;  %224 = vmatpush.msra.mxu3 %v115_v35  ;;  %v64_v18 = vld [vmem:[%s834_s0 + $0x150] sm:$0xff] }
  0x15   :  { %v42_v40 = vld [vmem:[%s834_s0 + $0xa0] sm:$0xff]  ;;  %v43_v41 = vld [vmem:[%s834_s0 + $0xa8] sm:$0xff]  ;;  %165 = vmatpush.msra.mxu0 %v46_v36  ;;  %205 = vmatpush.msra.mxu2 %v47_v37  ;;  %v132_v19 = vld [vmem:[%s834_s0 + $0x370] sm:$0xff] }
  0x16   :  { %v106_v42 = vld [vmem:[%s834_s0 + $0x2a0] sm:$0xff]  ;;  %v107_v43 = vld [vmem:[%s834_s0 + $0x2a8] sm:$0xff]  ;;  %185 = vmatpush.msra.mxu1 %v110_v38  ;;  %225 = vmatpush.msra.mxu3 %v111_v39  ;;  %v65_v20 = vld [vmem:[%s834_s0 + $0x158] sm:$0xff] }
  0x17   :  { %v38_v44 = vld [vmem:[%s834_s0 + $0x80] sm:$0xff]  ;;  %v39_v45 = vld [vmem:[%s834_s0 + $0x88] sm:$0xff]  ;;  %166 = vmatpush.msra.mxu0 %v42_v40  ;;  %206 = vmatpush.msra.mxu2 %v43_v41  ;;  %v133_v21 = vld [vmem:[%s834_s0 + $0x378] sm:$0xff] }
  0x18   :  { %v102_v46 = vld [vmem:[%s834_s0 + $0x280] sm:$0xff]  ;;  %v103_v47 = vld [vmem:[%s834_s0 + $0x288] sm:$0xff]  ;;  %186 = vmatpush.msra.mxu1 %v106_v42  ;;  %226 = vmatpush.msra.mxu3 %v107_v43  ;;  %v60_v22 = vld [vmem:[%s834_s0 + $0x130] sm:$0xff] }
  0x19   :  { %v34_v48 = vld [vmem:[%s834_s0 + $0x60] sm:$0xff]  ;;  %v35_v49 = vld [vmem:[%s834_s0 + $0x68] sm:$0xff]  ;;  %167 = vmatpush.msra.mxu0 %v38_v44  ;;  %207 = vmatpush.msra.mxu2 %v39_v45  ;;  %v128_v23 = vld [vmem:[%s834_s0 + $0x350] sm:$0xff] }
  0x1a   :  { %v98_v50 = vld [vmem:[%s834_s0 + $0x260] sm:$0xff]  ;;  %v99_v51 = vld [vmem:[%s834_s0 + $0x268] sm:$0xff]  ;;  %187 = vmatpush.msra.mxu1 %v102_v46  ;;  %227 = vmatpush.msra.mxu3 %v103_v47  ;;  %v61_v24 = vld [vmem:[%s834_s0 + $0x138] sm:$0xff] }
  0x1b   :  { %v30_v52 = vld [vmem:[%s834_s0 + $0x40] sm:$0xff]  ;;  %v31_v53 = vld [vmem:[%s834_s0 + $0x48] sm:$0xff]  ;;  %168 = vmatpush.msra.mxu0 %v34_v48  ;;  %208 = vmatpush.msra.mxu2 %v35_v49  ;;  %v129_v25 = vld [vmem:[%s834_s0 + $0x358] sm:$0xff] }
  0x1c   :  { %v94_v54 = vld [vmem:[%s834_s0 + $0x240] sm:$0xff]  ;;  %v95_v55 = vld [vmem:[%s834_s0 + $0x248] sm:$0xff]  ;;  %188 = vmatpush.msra.mxu1 %v98_v50  ;;  %228 = vmatpush.msra.mxu3 %v99_v51  ;;  %v56_v26 = vld [vmem:[%s834_s0 + $0x110] sm:$0xff] }
  0x1d   :  { %v26_v56 = vld [vmem:[%s834_s0 + $0x20] sm:$0xff]  ;;  %v27_v57 = vld [vmem:[%s834_s0 + $0x28] sm:$0xff]  ;;  %169 = vmatpush.msra.mxu0 %v30_v52  ;;  %209 = vmatpush.msra.mxu2 %v31_v53  ;;  %v124_v27 = vld [vmem:[%s834_s0 + $0x330] sm:$0xff] }
  0x1e   :  { %v90_v58 = vld [vmem:[%s834_s0 + $0x220] sm:$0xff]  ;;  %v91_v59 = vld [vmem:[%s834_s0 + $0x228] sm:$0xff]  ;;  %189 = vmatpush.msra.mxu1 %v94_v54  ;;  %229 = vmatpush.msra.mxu3 %v95_v55  ;;  %v57_v28 = vld [vmem:[%s834_s0 + $0x118] sm:$0xff] }
  0x1f   :  { %v22_v60 = vld [vmem:[%s834_s0] sm:$0xff]  ;;  %v23_v61 = vld [vmem:[%s834_s0 + $0x8] sm:$0xff]  ;;  %170 = vmatpush.msra.mxu0 %v26_v56  ;;  %210 = vmatpush.msra.mxu2 %v27_v57  ;;  %v125_v29 = vld [vmem:[%s834_s0 + $0x338] sm:$0xff] }
  0x20   :  { %190 = vmatpush.msra.mxu1 %v90_v58  ;;  %230 = vmatpush.msra.mxu3 %v91_v59  ;;  %v86_v0 = vld [vmem:[%s834_s0 + $0x200] sm:$0xff]  ;;  %v87_v1 = vld [vmem:[%s834_s0 + $0x208] sm:$0xff]  ;;  %v52_v30 = vld [vmem:[%s834_s0 + $0xf0] sm:$0xff] }
  0x21   :  { %171 = vmatpush.msra.mxu0 %v22_v60  ;;  %211 = vmatpush.msra.mxu2 %v23_v61  ;;  %v120_v31 = vld [vmem:[%s834_s0 + $0x310] sm:$0xff]  ;;  %v53_v32 = vld [vmem:[%s834_s0 + $0xf8] sm:$0xff]  ;;  %v20_v42 = vld [vmem:[%s835_s1] sm:$0xff] }
  0x22   :  { %191 = vmatpush.msra.mxu1 %v86_v0  ;;  %231 = vmatpush.msra.mxu3 %v87_v1  ;;  %v121_v33 = vld [vmem:[%s834_s0 + $0x318] sm:$0xff]  ;;  %v48_v34 = vld [vmem:[%s834_s0 + $0xd0] sm:$0xff]  ;;  %v21_v47 = vld [vmem:[%s835_s1 + $0x8] sm:$0xff] }
  0x23   :  { %236 = vmatpush.msrb.mxu0 %v84_v62  ;;  %276 = vmatpush.msrb.mxu2 %v85_v63  ;;  %v116_v35 = vld [vmem:[%s834_s0 + $0x2f0] sm:$0xff]  ;;  %v49_v36 = vld [vmem:[%s834_s0 + $0xd8] sm:$0xff] }
  0x24   :  { %256 = vmatpush.msrb.mxu1 %v148_v3  ;;  %296 = vmatpush.msrb.mxu3 %v149_v5  ;;  %v117_v37 = vld [vmem:[%s834_s0 + $0x2f8] sm:$0xff]  ;;  %v44_v38 = vld [vmem:[%s834_s0 + $0xb0] sm:$0xff]  ;;  %v389_v3 = vmov 0  }
  0x25   :  { %237 = vmatpush.msrb.mxu0 %v80_v2  ;;  %277 = vmatpush.msrb.mxu2 %v81_v4  ;;  %v112_v39 = vld [vmem:[%s834_s0 + $0x2d0] sm:$0xff]  ;;  %v45_v40 = vld [vmem:[%s834_s0 + $0xb8] sm:$0xff]  ;;  %v150_v2 = vld [vmem:[%s836_s2] sm:$0xff] }
  0x26   :  { %257 = vmatpush.msrb.mxu1 %v144_v7  ;;  %297 = vmatpush.msrb.mxu3 %v145_v9  ;;  %v113_v41 = vld [vmem:[%s834_s0 + $0x2d8] sm:$0xff]  ;;  %v40_v43 = vld [vmem:[%s834_s0 + $0x90] sm:$0xff] }
  0x27   :  { %238 = vmatpush.msrb.mxu0 %v76_v6  ;;  %278 = vmatpush.msrb.mxu2 %v77_v8  ;;  %v108_v44 = vld [vmem:[%s834_s0 + $0x2b0] sm:$0xff]  ;;  %v41_v45 = vld [vmem:[%s834_s0 + $0x98] sm:$0xff] }
  0x28   :  { %258 = vmatpush.msrb.mxu1 %v140_v11  ;;  %298 = vmatpush.msrb.mxu3 %v141_v13  ;;  %v109_v46 = vld [vmem:[%s834_s0 + $0x2b8] sm:$0xff]  ;;  %v36_v48 = vld [vmem:[%s834_s0 + $0x70] sm:$0xff] }
  0x29   :  { %239 = vmatpush.msrb.mxu0 %v72_v10  ;;  %279 = vmatpush.msrb.mxu2 %v73_v12  ;;  %v104_v49 = vld [vmem:[%s834_s0 + $0x290] sm:$0xff]  ;;  %v37_v50 = vld [vmem:[%s834_s0 + $0x78] sm:$0xff] }
  0x2a   :  { %259 = vmatpush.msrb.mxu1 %v136_v15  ;;  %299 = vmatpush.msrb.mxu3 %v137_v17  ;;  %v105_v51 = vld [vmem:[%s834_s0 + $0x298] sm:$0xff]  ;;  %v32_v52 = vld [vmem:[%s834_s0 + $0x50] sm:$0xff] }
  0x2b   :  { %240 = vmatpush.msrb.mxu0 %v68_v14  ;;  %280 = vmatpush.msrb.mxu2 %v69_v16  ;;  %v100_v53 = vld [vmem:[%s834_s0 + $0x270] sm:$0xff]  ;;  %v33_v54 = vld [vmem:[%s834_s0 + $0x58] sm:$0xff] }
  0x2c   :  { %260 = vmatpush.msrb.mxu1 %v132_v19  ;;  %300 = vmatpush.msrb.mxu3 %v133_v21  ;;  %v101_v55 = vld [vmem:[%s834_s0 + $0x278] sm:$0xff]  ;;  %v28_v56 = vld [vmem:[%s834_s0 + $0x30] sm:$0xff] }
  0x2d   :  { %241 = vmatpush.msrb.mxu0 %v64_v18  ;;  %281 = vmatpush.msrb.mxu2 %v65_v20  ;;  %v96_v57 = vld [vmem:[%s834_s0 + $0x250] sm:$0xff]  ;;  %v29_v58 = vld [vmem:[%s834_s0 + $0x38] sm:$0xff] }
  0x2e   :  { %261 = vmatpush.msrb.mxu1 %v128_v23  ;;  %301 = vmatpush.msrb.mxu3 %v129_v25  ;;  %v97_v59 = vld [vmem:[%s834_s0 + $0x258] sm:$0xff]  ;;  %v24_v60 = vld [vmem:[%s834_s0 + $0x10] sm:$0xff] }
  0x2f   :  { %242 = vmatpush.msrb.mxu0 %v60_v22  ;;  %282 = vmatpush.msrb.mxu2 %v61_v24  ;;  %v92_v61 = vld [vmem:[%s834_s0 + $0x230] sm:$0xff]  ;;  %v25_v62 = vld [vmem:[%s834_s0 + $0x18] sm:$0xff] }
  0x30   :  { %262 = vmatpush.msrb.mxu1 %v124_v27  ;;  %302 = vmatpush.msrb.mxu3 %v125_v29  ;;  %v93_v63 = vld [vmem:[%s834_s0 + $0x238] sm:$0xff]  ;;  %v88_v0 = vld [vmem:[%s834_s0 + $0x210] sm:$0xff] }
  0x31   :  { %243 = vmatpush.msrb.mxu0 %v56_v26  ;;  %283 = vmatpush.msrb.mxu2 %v57_v28  ;;  %v89_v1 = vld [vmem:[%s834_s0 + $0x218] sm:$0xff] }
  0x32   :  { %263 = vmatpush.msrb.mxu1 %v120_v31  ;;  %303 = vmatpush.msrb.mxu3 %v121_v33 }
  0x33   :  { %244 = vmatpush.msrb.mxu0 %v52_v30  ;;  %284 = vmatpush.msrb.mxu2 %v53_v32 }
  0x34   :  { %264 = vmatpush.msrb.mxu1 %v116_v35  ;;  %304 = vmatpush.msrb.mxu3 %v117_v37 }
  0x35   :  { %245 = vmatpush.msrb.mxu0 %v48_v34  ;;  %285 = vmatpush.msrb.mxu2 %v49_v36 }
  0x36   :  { %265 = vmatpush.msrb.mxu1 %v112_v39  ;;  %305 = vmatpush.msrb.mxu3 %v113_v41  ;;  %v361_v39 = vld [vmem:[%s837_s4] sm:$0xff] }
  0x37   :  { %246 = vmatpush.msrb.mxu0 %v44_v38  ;;  %286 = vmatpush.msrb.mxu2 %v45_v40 }
  0x38   :  { %212 = vmatmul.f32.vlgmr.msra.gmra.mxu2 %v20_v42  ;;  %266 = vmatpush.msrb.mxu1 %v108_v44 }
  0x39   :  { %247 = vmatpush.msrb.mxu0 %v40_v43  ;;  %287 = vmatpush.msrb.mxu2 %v41_v45 }
  0x3a   :  { %306 = vmatpush.msrb.mxu3 %v109_v46  ;;  %172 = vmatmul.f32.vlgmr.msra.gmra.mxu0 %v20_v42 }
  0x3b   :  { %232 = vmatmul.f32.vlgmr.msra.gmra.mxu3 %v21_v47  ;;  %248 = vmatpush.msrb.mxu0 %v36_v48  ;;  %v339_v48 = vld [vmem:[%s838_s3] sm:$0xff] }
  0x3c   :  { %267 = vmatpush.msrb.mxu1 %v104_v49  ;;  %288 = vmatpush.msrb.mxu2 %v37_v50 }
  0x3d   :  { %307 = vmatpush.msrb.mxu3 %v105_v51  ;;  %192 = vmatmul.f32.vlgmr.msra.gmra.mxu1 %v21_v47 }
  0x3e   :  { %249 = vmatpush.msrb.mxu0 %v32_v52  ;;  %268 = vmatpush.msrb.mxu1 %v100_v53 }
  0x3f   :  { %289 = vmatpush.msrb.mxu2 %v33_v54  ;;  %308 = vmatpush.msrb.mxu3 %v101_v55 }
  0x40   :  { %250 = vmatpush.msrb.mxu0 %v28_v56  ;;  %269 = vmatpush.msrb.mxu1 %v96_v57 }
  0x41   :  { %290 = vmatpush.msrb.mxu2 %v29_v58  ;;  %309 = vmatpush.msrb.mxu3 %v97_v59 }
  0x42   :  { %251 = vmatpush.msrb.mxu0 %v24_v60  ;;  %270 = vmatpush.msrb.mxu1 %v92_v61 }
  0x43   :  { %291 = vmatpush.msrb.mxu2 %v25_v62  ;;  %310 = vmatpush.msrb.mxu3 %v93_v63 }
  0x44   :  { %252 = vmatmul.f32.vlgmr.msrb.gmra.mxu0 %v20_v42  ;;  %292 = vmatmul.f32.vlgmr.msrb.gmra.mxu2 %v20_v42 }
  0x45   :  { %271 = vmatpush.msrb.mxu1 %v88_v0  ;;  %311 = vmatpush.msrb.mxu3 %v89_v1 }
  0x46   :  { %272 = vmatmul.f32.vlgmr.msrb.gmra.mxu1 %v21_v47  ;;  %312 = vmatmul.f32.vlgmr.msrb.gmra.mxu3 %v21_v47 }
  0x47   :  { %384 = vset.pattern.permute.xlu0 %v389_v3  ;;  %385 = vset.pattern.permute.xlu1 %v389_v3 }
  0x48   :  { %153 = vperm.xlu0 %384, %v150_v2   ;;  %386 = vset.pattern.permute.xlu2 %v389_v3 }
  0x49   :  { %364 = vperm.xlu2 %386, %v361_v39  }
  0xa3   :  { %v365_v53 = vpop.permute.xlu2 %364 }
  0xb7   :  { %v173_v4 = vpop.f32.mrf.mxu0 }
  0xba   :  { %v193_v5 = vpop.f32.mrf.mxu1  ;;  %v154_v6 = vpop.permute.xlu0 %153 }
  0xbb   :  { %v213_v7 = vpop.f32.mrf.mxu2  ;;  %v174_v8 = vadd.f32 %v173_v4, %v154_v6 }
  0xbc   :  { %v214_v9 = vadd.f32 %v213_v7, %v154_v6 }
  0xbd   :  { %v194_v12 = vadd.f32 %v193_v5, %v174_v8 }
  0xbe   :  { %v233_v10 = vpop.f32.mrf.mxu3 }
  0xbf   :  { %v234_v13 = vadd.f32 %v233_v10, %v214_v9 }
  0xc1   :  { %v253_v11 = vpop.f32.mrf.mxu0  ;;  %v316_v16 = vadd.f32 %v234_v13, %v194_v12 }
  0xc2   :  { %v254_v14 = vadd.f32 %v253_v11, %v154_v6 }
  0xc3   :  { %v273_v15 = vpop.f32.mrf.mxu1 }
  0xc4   :  { %v274_v17 = vadd.f32 %v273_v15, %v254_v14 }
  0xc6   :  { %v317_v22 = vadd.f32 %v316_v16, %v274_v17 }
  0xc7   :  { %v293_v18 = vpop.f32.mrf.mxu2 }
  0xc8   :  { %v294_v19 = vadd.f32 %v293_v18, %v154_v6 }
  0xc9   :  { %v313_v20 = vpop.f32.mrf.mxu3 }
  0xca   :  { %v314_v21 = vadd.f32 %v313_v20, %v294_v19 }
  0xcc   :  { %v319_v23 = vsel %vm318_vm0, %v314_v21, 0.0 }
  0xcd   :  { %v320_v24 = vadd.f32 %v319_v23, %v317_v22 }
  0xcf   :  { %321 = vadd.xlane.f32.xlu0 %v320_v24 }
 0x142   :  { %v322_v25 = vpop.xlane.xlu0 %321 }
 0x143   :  { %v323_v26 = vmul.f32 0.0019607844, %v322_v25 }
 0x145   :  { %v324_v27 = vsub.f32 %v194_v12, %v323_v26  ;;  %v325_v28 = vsub.f32 %v234_v13, %v323_v26  ;;  %v326_v29 = vsub.f32 %v274_v17, %v323_v26  ;;  %v327_v30 = vsub.f32 %v314_v21, %v323_v26 }
 0x147   :  { %v328_v31 = vmul.f32 %v324_v27, %v324_v27  ;;  %v329_v32 = vmul.f32 %v325_v28, %v325_v28  ;;  %v331_v33 = vmul.f32 %v327_v30, %v327_v30  ;;  %v330_v34 = vmul.f32 %v326_v29, %v326_v29 }
 0x149   :  { %v332_v35 = vadd.f32 %v329_v32, %v328_v31  ;;  %v334_v37 = vsel %vm318_vm0, %v331_v33, 0.0 }
 0x14b   :  { %v333_v36 = vadd.f32 %v332_v35, %v330_v34 }
 0x14d   :  { %v335_v38 = vadd.f32 %v334_v37, %v333_v36 }
 0x14f   :  { %336 = vadd.xlane.f32.xlu1 %v335_v38 }
 0x1c2   :  { %v337_v40 = vpop.xlane.xlu1 %336 }
 0x1c3   :  { %v338_v41 = vmul.f32 0.0019607844, %v337_v40 }
 0x1c5   :  { %v340_v42 = vadd.f32 1e-05, %v338_v41 }
 0x1c7   :  { %387 = vrsqrt.f32 %v340_v42  ;;  %vm347_vm2 = vweird.f32 %v340_v42 }
 0x1cd   :  { %v388_v43 = vpop.eup %387 }
 0x1ce   :  { %v342_v44 = vmul.f32 %v388_v43, %v340_v42  ;;  %vm348_vm1 = vweird.f32 %v388_v43 }
 0x1cf   :  { %vm349_vm3 = vmor %vm347_vm2, %vm348_vm1 }
 0x1d0   :  { %v343_v45 = vmul.f32 %v388_v43, %v342_v44 }
 0x1d2   :  { %v344_v46 = vmul.f32 0.5, %v343_v45 }
 0x1d4   :  { %v345_v47 = vsub.f32 1.5, %v344_v46 }
 0x1d6   :  { %v346_v49 = vmul.f32 %v388_v43, %v345_v47 }
 0x1d8   :  { %v350_v50 = vsel %vm349_vm3, %v388_v43, %v346_v49 }
 0x1d9   :  { %v351_v51 = vmul.f32 %v350_v50, %v339_v48 }
 0x1db   :  { %354 = vperm.xlu1 %385, %v351_v51  }
 0x24d   :  { %v355_v52 = vpop.permute.xlu1 %354 }
 0x24e   :  { %v357_v54 = vmul.f32 %v355_v52, %v324_v27  ;;  %v358_v55 = vmul.f32 %v355_v52, %v325_v28  ;;  %v359_v56 = vmul.f32 %v355_v52, %v326_v29  ;;  %v360_v57 = vmul.f32 %v355_v52, %v327_v30 }
 0x250   :  { %v367_v58 = vadd.f32 %v365_v53, %v357_v54  ;;  %v368_v59 = vadd.f32 %v365_v53, %v358_v55  ;;  %v369_v60 = vadd.f32 %v365_v53, %v359_v56  ;;  %v370_v61 = vadd.f32 %v365_v53, %v360_v57 }
 0x252   :  { %v371_v62 = vmax.f32 %v367_v58, 0.0  ;;  %v372_v63 = vmax.f32 %v368_v59, 0.0  ;;  %v373_v0 = vmax.f32 %v369_v60, 0.0  ;;  %v374_v1 = vmax.f32 %v370_v61, 0.0 }
 0x254   :  { %375 = vst [vmem:[%s839_s5] sm:$0xff] %v371_v62 }
 0x255   :  { %376 = vst [vmem:[%s839_s5 + $0x8] sm:$0xff] %v372_v63 }
 0x256   :  { %377 = vst [vmem:[%s839_s5 + $0x10] sm:$0xff] %v373_v0 }
 0x257   :  { %378 = vst.msk [vmem:[%s839_s5 + $0x18] sm:$0xff] %vm318_vm0, %v374_v1 }

// kernel: generator_forward.7
= control target key start
LH: loop header
LB: loop body
LE: loop exit
PB: predicated region body
PF: predicated region fallthrough
CT: control target
= control target key end

     0   :  { %vm180_vm0 = vcmask 588800   ;;  %vm524_vm1 = vcmask 1043456   ;;  %vm556_vm2 = vcmask 994304   ;;  %s1515_s0 = inlined_call_operand.vmem [shape: f32[72,2170], index: 0, kind: input, shape index: {}]   ;;  %s1516_s1 = inlined_call_operand.vmem [shape: f32[4,72], index: 1, kind: input, shape index: {}]   ;;  %s1517_s2 = inlined_call_operand.vmem [shape: f32[4,1], index: 2, kind: input, shape index: {}]   ;;  %s1518_s4 = inlined_call_operand.vmem [shape: f32[4,1], index: 4, kind: input, shape index: {}]   ;;  %s1519_s3 = inlined_call_operand.vmem [shape: f32[4,1], index: 3, kind: input, shape index: {}]   ;;  %s1520_s5 = inlined_call_operand.vmem [shape: f32[4,2170], index: 5, kind: output, shape index: {}]  }
   0x1   :  { %v157_v0 = vld [vmem:[%s1515_s0 + $0x440] sm:$0xff]  ;;  %v158_v1 = vld [vmem:[%s1515_s0 + $0x448] sm:$0xff]  ;;  %v159_v2 = vld [vmem:[%s1515_s0 + $0x450] sm:$0xff] }
   0x2   :  { %191 = vmatpush.msra.mxu0 %v157_v0  ;;  %211 = vmatpush.msra.mxu1 %v158_v1  ;;  %v160_v3 = vld [vmem:[%s1515_s0 + $0x458] sm:$0xff]  ;;  %v141_v5 = vld [vmem:[%s1515_s0 + $0x3c0] sm:$0xff]  ;;  %v142_v6 = vld [vmem:[%s1515_s0 + $0x3c8] sm:$0xff] }
   0x3   :  { %v140_v4 = vld [vmem:[%s1515_s0 + $0x3b8] sm:$0xff]  ;;  %231 = vmatpush.msra.mxu2 %v159_v2  ;;  %251 = vmatpush.msra.mxu3 %v160_v3  ;;  %v143_v7 = vld [vmem:[%s1515_s0 + $0x3d0] sm:$0xff]  ;;  %v125_v10 = vld [vmem:[%s1515_s0 + $0x340] sm:$0xff] }
   0x4   :  { %v123_v8 = vld [vmem:[%s1515_s0 + $0x330] sm:$0xff]  ;;  %192 = vmatpush.msra.mxu0 %v140_v4  ;;  %212 = vmatpush.msra.mxu1 %v141_v5  ;;  %v124_v9 = vld [vmem:[%s1515_s0 + $0x338] sm:$0xff]  ;;  %v126_v11 = vld [vmem:[%s1515_s0 + $0x348] sm:$0xff] }
   0x5   :  { %232 = vmatpush.msra.mxu2 %v142_v6  ;;  %252 = vmatpush.msra.mxu3 %v143_v7  ;;  %v106_v12 = vld [vmem:[%s1515_s0 + $0x2a8] sm:$0xff]  ;;  %v107_v13 = vld [vmem:[%s1515_s0 + $0x2b0] sm:$0xff]  ;;  %v108_v14 = vld [vmem:[%s1515_s0 + $0x2b8] sm:$0xff] }
   0x6   :  { %193 = vmatpush.msra.mxu0 %v123_v8  ;;  %213 = vmatpush.msra.mxu1 %v124_v9  ;;  %v109_v15 = vld [vmem:[%s1515_s0 + $0x2c0] sm:$0xff]  ;;  %v90_v17 = vld [vmem:[%s1515_s0 + $0x228] sm:$0xff]  ;;  %v91_v18 = vld [vmem:[%s1515_s0 + $0x230] sm:$0xff] }
   0x7   :  { %233 = vmatpush.msra.mxu2 %v125_v10  ;;  %253 = vmatpush.msra.mxu3 %v126_v11  ;;  %v89_v16 = vld [vmem:[%s1515_s0 + $0x220] sm:$0xff]  ;;  %v92_v19 = vld [vmem:[%s1515_s0 + $0x238] sm:$0xff]  ;;  %v74_v22 = vld [vmem:[%s1515_s0 + $0x1a8] sm:$0xff] }
   0x8   :  { %194 = vmatpush.msra.mxu0 %v106_v12  ;;  %214 = vmatpush.msra.mxu1 %v107_v13  ;;  %v72_v20 = vld [vmem:[%s1515_s0 + $0x198] sm:$0xff]  ;;  %v73_v21 = vld [vmem:[%s1515_s0 + $0x1a0] sm:$0xff]  ;;  %v75_v23 = vld [vmem:[%s1515_s0 + $0x1b0] sm:$0xff] }
   0x9   :  { %234 = vmatpush.msra.mxu2 %v108_v14  ;;  %254 = vmatpush.msra.mxu3 %v109_v15  ;;  %v55_v24 = vld [vmem:[%s1515_s0 + $0x110] sm:$0xff]  ;;  %v56_v25 = vld [vmem:[%s1515_s0 + $0x118] sm:$0xff]  ;;  %v57_v26 = vld [vmem:[%s1515_s0 + $0x120] sm:$0xff] }
   0xa   :  { %195 = vmatpush.msra.mxu0 %v89_v16  ;;  %215 = vmatpush.msra.mxu1 %v90_v17  ;;  %v58_v27 = vld [vmem:[%s1515_s0 + $0x128] sm:$0xff]  ;;  %v39_v29 = vld [vmem:[%s1515_s0 + $0x90] sm:$0xff]  ;;  %v40_v30 = vld [vmem:[%s1515_s0 + $0x98] sm:$0xff] }
   0xb   :  { %235 = vmatpush.msra.mxu2 %v91_v18  ;;  %255 = vmatpush.msra.mxu3 %v92_v19  ;;  %v38_v28 = vld [vmem:[%s1515_s0 + $0x88] sm:$0xff]  ;;  %v41_v31 = vld [vmem:[%s1515_s0 + $0xa0] sm:$0xff]  ;;  %v23_v34 = vld [vmem:[%s1515_s0 + $0x10] sm:$0xff] }
   0xc   :  { %196 = vmatpush.msra.mxu0 %v72_v20  ;;  %216 = vmatpush.msra.mxu1 %v73_v21  ;;  %v21_v32 = vld [vmem:[%s1515_s0] sm:$0xff]  ;;  %v22_v33 = vld [vmem:[%s1515_s0 + $0x8] sm:$0xff]  ;;  %v24_v35 = vld [vmem:[%s1515_s0 + $0x18] sm:$0xff] }
   0xd   :  { %236 = vmatpush.msra.mxu2 %v74_v22  ;;  %256 = vmatpush.msra.mxu3 %v75_v23  ;;  %v161_v36 = vld [vmem:[%s1515_s0 + $0x460] sm:$0xff]  ;;  %v162_v37 = vld [vmem:[%s1515_s0 + $0x468] sm:$0xff]  ;;  %v163_v38 = vld [vmem:[%s1515_s0 + $0x470] sm:$0xff] }
   0xe   :  { %197 = vmatpush.msra.mxu0 %v55_v24  ;;  %217 = vmatpush.msra.mxu1 %v56_v25  ;;  %v164_v39 = vld [vmem:[%s1515_s0 + $0x478] sm:$0xff]  ;;  %v145_v41 = vld [vmem:[%s1515_s0 + $0x3e0] sm:$0xff]  ;;  %v146_v42 = vld [vmem:[%s1515_s0 + $0x3e8] sm:$0xff] }
   0xf   :  { %237 = vmatpush.msra.mxu2 %v57_v26  ;;  %257 = vmatpush.msra.mxu3 %v58_v27  ;;  %v144_v40 = vld [vmem:[%s1515_s0 + $0x3d8] sm:$0xff]  ;;  %v147_v43 = vld [vmem:[%s1515_s0 + $0x3f0] sm:$0xff]  ;;  %v129_v46 = vld [vmem:[%s1515_s0 + $0x360] sm:$0xff] }
  0x10   :  { %198 = vmatpush.msra.mxu0 %v38_v28  ;;  %218 = vmatpush.msra.mxu1 %v39_v29  ;;  %v127_v44 = vld [vmem:[%s1515_s0 + $0x350] sm:$0xff]  ;;  %v128_v45 = vld [vmem:[%s1515_s0 + $0x358] sm:$0xff]  ;;  %v130_v47 = vld [vmem:[%s1515_s0 + $0x368] sm:$0xff] }
  0x11   :  { %238 = vmatpush.msra.mxu2 %v40_v30  ;;  %258 = vmatpush.msra.mxu3 %v41_v31  ;;  %v110_v48 = vld [vmem:[%s1515_s0 + $0x2c8] sm:$0xff]  ;;  %v111_v49 = vld [vmem:[%s1515_s0 + $0x2d0] sm:$0xff]  ;;  %v112_v50 = vld [vmem:[%s1515_s0 + $0x2d8] sm:$0xff] }
  0x12   :  { %199 = vmatpush.msra.mxu0 %v21_v32  ;;  %219 = vmatpush.msra.mxu1 %v22_v33  ;;  %v113_v51 = vld [vmem:[%s1515_s0 + $0x2e0] sm:$0xff]  ;;  %v94_v53 = vld [vmem:[%s1515_s0 + $0x248] sm:$0xff]  ;;  %v95_v54 = vld [vmem:[%s1515_s0 + $0x250] sm:$0xff] }
  0x13   :  { %239 = vmatpush.msra.mxu2 %v23_v34  ;;  %259 = vmatpush.msra.mxu3 %v24_v35  ;;  %v93_v52 = vld [vmem:[%s1515_s0 + $0x240] sm:$0xff]  ;;  %v96_v55 = vld [vmem:[%s1515_s0 + $0x258] sm:$0xff]  ;;  %v78_v58 = vld [vmem:[%s1515_s0 + $0x1c8] sm:$0xff]  ;;  %v783_v34 = vmov 0  }
  0x14   :  { %271 = vmatpush.msrb.mxu0 %v161_v36  ;;  %291 = vmatpush.msrb.mxu1 %v162_v37  ;;  %v76_v56 = vld [vmem:[%s1515_s0 + $0x1b8] sm:$0xff]  ;;  %v77_v57 = vld [vmem:[%s1515_s0 + $0x1c0] sm:$0xff]  ;;  %v79_v59 = vld [vmem:[%s1515_s0 + $0x1d0] sm:$0xff] }
  0x15   :  { %311 = vmatpush.msrb.mxu2 %v163_v38  ;;  %331 = vmatpush.msrb.mxu3 %v164_v39  ;;  %v59_v60 = vld [vmem:[%s1515_s0 + $0x130] sm:$0xff]  ;;  %v60_v61 = vld [vmem:[%s1515_s0 + $0x138] sm:$0xff]  ;;  %v61_v62 = vld [vmem:[%s1515_s0 + $0x140] sm:$0xff] }
  0x16   :  { %272 = vmatpush.msrb.mxu0 %v144_v40  ;;  %292 = vmatpush.msrb.mxu1 %v145_v41  ;;  %v62_v63 = vld [vmem:[%s1515_s0 + $0x148] sm:$0xff]  ;;  %v1009_v0 = vld [vmem:[%s1516_s1] sm:$0xf]  ;;  %v43_v2 = vld [vmem:[%s1515_s0 + $0xb0] sm:$0xff] }
  0x17   :  { %312 = vmatpush.msrb.mxu2 %v146_v42  ;;  %332 = vmatpush.msrb.mxu3 %v147_v43  ;;  %v42_v1 = vld [vmem:[%s1515_s0 + $0xa8] sm:$0xff]  ;;  %v44_v3 = vld [vmem:[%s1515_s0 + $0xb8] sm:$0xff]  ;;  %v45_v4 = vld [vmem:[%s1515_s0 + $0xc0] sm:$0xff] }
  0x18   :  { %273 = vmatpush.msrb.mxu0 %v127_v44  ;;  %293 = vmatpush.msrb.mxu1 %v128_v45  ;;  %v25_v5 = vld [vmem:[%s1515_s0 + $0x20] sm:$0xff]  ;;  %v26_v6 = vld [vmem:[%s1515_s0 + $0x28] sm:$0xff]  ;;  %v27_v7 = vld [vmem:[%s1515_s0 + $0x30] sm:$0xff] }
  0x19   :  { %313 = vmatpush.msrb.mxu2 %v129_v46  ;;  %333 = vmatpush.msrb.mxu3 %v130_v47  ;;  %v28_v8 = vld [vmem:[%s1515_s0 + $0x38] sm:$0xff]  ;;  %v165_v9 = vld [vmem:[%s1515_s0 + $0x480] sm:$0xff]  ;;  %v166_v10 = vld [vmem:[%s1515_s0 + $0x488] sm:$0xff] }
  0x1a   :  { %274 = vmatpush.msrb.mxu0 %v110_v48  ;;  %294 = vmatpush.msrb.mxu1 %v111_v49  ;;  %v167_v11 = vld [vmem:[%s1515_s0 + $0x490] sm:$0xff]  ;;  %v168_v12 = vld [vmem:[%s1515_s0 + $0x498] sm:$0xff]  ;;  %v149_v14 = vld [vmem:[%s1515_s0 + $0x400] sm:$0xff] }
  0x1b   :  { %314 = vmatpush.msrb.mxu2 %v112_v50  ;;  %334 = vmatpush.msrb.mxu3 %v113_v51  ;;  %v148_v13 = vld [vmem:[%s1515_s0 + $0x3f8] sm:$0xff]  ;;  %v150_v15 = vld [vmem:[%s1515_s0 + $0x408] sm:$0xff]  ;;  %v151_v16 = vld [vmem:[%s1515_s0 + $0x410] sm:$0xff] }
  0x1c   :  { %275 = vmatpush.msrb.mxu0 %v93_v52  ;;  %295 = vmatpush.msrb.mxu1 %v94_v53  ;;  %v131_v17 = vld [vmem:[%s1515_s0 + $0x370] sm:$0xff]  ;;  %v132_v18 = vld [vmem:[%s1515_s0 + $0x378] sm:$0xff]  ;;  %v133_v19 = vld [vmem:[%s1515_s0 + $0x380] sm:$0xff] }
  0x1d   :  { %315 = vmatpush.msrb.mxu2 %v95_v54  ;;  %335 = vmatpush.msrb.mxu3 %v96_v55  ;;  %v134_v20 = vld [vmem:[%s1515_s0 + $0x388] sm:$0xff]  ;;  %v115_v22 = vld [vmem:[%s1515_s0 + $0x2f0] sm:$0xff]  ;;  %v116_v23 = vld [vmem:[%s1515_s0 + $0x2f8] sm:$0xff] }
  0x1e   :  { %276 = vmatpush.msrb.mxu0 %v76_v56  ;;  %296 = vmatpush.msrb.mxu1 %v77_v57  ;;  %v114_v21 = vld [vmem:[%s1515_s0 + $0x2e8] sm:$0xff]  ;;  %v117_v24 = vld [vmem:[%s1515_s0 + $0x300] sm:$0xff]  ;;  %v99_v27 = vld [vmem:[%s1515_s0 + $0x270] sm:$0xff] }
  0x1f   :  { %316 = vmatpush.msrb.mxu2 %v78_v58  ;;  %336 = vmatpush.msrb.mxu3 %v79_v59  ;;  %v97_v25 = vld [vmem:[%s1515_s0 + $0x260] sm:$0xff]  ;;  %v98_v26 = vld [vmem:[%s1515_s0 + $0x268] sm:$0xff]  ;;  %v100_v28 = vld [vmem:[%s1515_s0 + $0x278] sm:$0xff] }
  0x20   :  { %277 = vmatpush.msrb.mxu0 %v59_v60  ;;  %297 = vmatpush.msrb.mxu1 %v60_v61  ;;  %v80_v29 = vld [vmem:[%s1515_s0 + $0x1d8] sm:$0xff]  ;;  %v81_v30 = vld [vmem:[%s1515_s0 + $0x1e0] sm:$0xff]  ;;  %v82_v31 = vld [vmem:[%s1515_s0 + $0x1e8] sm:$0xff] }
  0x21   :  { %317 = vmatpush.msrb.mxu2 %v61_v62  ;;  %337 = vmatpush.msrb.mxu3 %v62_v63  ;;  %v83_v32 = vld [vmem:[%s1515_s0 + $0x1f0] sm:$0xff]  ;;  %v174_v33 = vld [vmem:[%s1517_s2] sm:$0xf]  ;;  %v64_v36 = vld [vmem:[%s1515_s0 + $0x158] sm:$0xff] }
  0x22   :  { %762 = vmatmul.msk.f32.vlgmr.msra.gmra.mxu2 %vm180_vm0, %v1009_v0  ;;  %278 = vmatpush.msrb.mxu0 %v42_v1  ;;  %v63_v35 = vld [vmem:[%s1515_s0 + $0x150] sm:$0xff]  ;;  %v65_v37 = vld [vmem:[%s1515_s0 + $0x160] sm:$0xff]  ;;  %v66_v38 = vld [vmem:[%s1515_s0 + $0x168] sm:$0xff] }
  0x23   :  { %298 = vmatpush.msrb.mxu1 %v43_v2  ;;  %318 = vmatpush.msrb.mxu2 %v44_v3  ;;  %v46_v39 = vld [vmem:[%s1515_s0 + $0xc8] sm:$0xff]  ;;  %v47_v40 = vld [vmem:[%s1515_s0 + $0xd0] sm:$0xff]  ;;  %v48_v41 = vld [vmem:[%s1515_s0 + $0xd8] sm:$0xff] }
  0x24   :  { %338 = vmatpush.msrb.mxu3 %v45_v4  ;;  %760 = vmatmul.msk.f32.vlgmr.msra.gmra.mxu0 %vm180_vm0, %v1009_v0  ;;  %v49_v42 = vld [vmem:[%s1515_s0 + $0xe0] sm:$0xff]  ;;  %v30_v44 = vld [vmem:[%s1515_s0 + $0x48] sm:$0xff]  ;;  %v31_v45 = vld [vmem:[%s1515_s0 + $0x50] sm:$0xff] }
  0x25   :  { %763 = vmatmul.msk.f32.vlgmr.msra.gmra.mxu3 %vm180_vm0, %v1009_v0  ;;  %279 = vmatpush.msrb.mxu0 %v25_v5  ;;  %v29_v43 = vld [vmem:[%s1515_s0 + $0x40] sm:$0xff]  ;;  %v32_v46 = vld [vmem:[%s1515_s0 + $0x58] sm:$0xff]  ;;  %v170_v48 = vld [vmem:[%s1515_s0 + $0x4a8] sm:$0xff] }
  0x26   :  { %299 = vmatpush.msrb.mxu1 %v26_v6  ;;  %319 = vmatpush.msrb.mxu2 %v27_v7  ;;  %v169_v47 = vld [vmem:[%s1515_s0 + $0x4a0] sm:$0xff]  ;;  %v171_v49 = vld [vmem:[%s1515_s0 + $0x4b0] sm:$0xff]  ;;  %v172_v50 = vld [vmem:[%s1515_s0 + $0x4b8] sm:$0xff] }
  0x27   :  { %339 = vmatpush.msrb.mxu3 %v28_v8  ;;  %761 = vmatmul.msk.f32.vlgmr.msra.gmra.mxu1 %vm180_vm0, %v1009_v0  ;;  %v152_v51 = vld [vmem:[%s1515_s0 + $0x418] sm:$0xff]  ;;  %v153_v52 = vld [vmem:[%s1515_s0 + $0x420] sm:$0xff]  ;;  %v154_v53 = vld [vmem:[%s1515_s0 + $0x428] sm:$0xff] }
  0x28   :  { %351 = vmatpush.msra.mxu0 %v165_v9  ;;  %371 = vmatpush.msra.mxu1 %v166_v10  ;;  %v155_v54 = vld [vmem:[%s1515_s0 + $0x430] sm:$0xff]  ;;  %v136_v56 = vld [vmem:[%s1515_s0 + $0x398] sm:$0xff]  ;;  %v137_v57 = vld [vmem:[%s1515_s0 + $0x3a0] sm:$0xff] }
  0x29   :  { %391 = vmatpush.msra.mxu2 %v167_v11  ;;  %411 = vmatpush.msra.mxu3 %v168_v12  ;;  %v135_v55 = vld [vmem:[%s1515_s0 + $0x390] sm:$0xff]  ;;  %v138_v58 = vld [vmem:[%s1515_s0 + $0x3a8] sm:$0xff]  ;;  %v120_v61 = vld [vmem:[%s1515_s0 + $0x318] sm:$0xff] }
  0x2a   :  { %352 = vmatpush.msra.mxu0 %v148_v13  ;;  %372 = vmatpush.msra.mxu1 %v149_v14  ;;  %v118_v59 = vld [vmem:[%s1515_s0 + $0x308] sm:$0xff]  ;;  %v119_v60 = vld [vmem:[%s1515_s0 + $0x310] sm:$0xff]  ;;  %v121_v62 = vld [vmem:[%s1515_s0 + $0x320] sm:$0xff] }
  0x2b   :  { %392 = vmatpush.msra.mxu2 %v150_v15  ;;  %412 = vmatpush.msra.mxu3 %v151_v16  ;;  %v101_v63 = vld [vmem:[%s1515_s0 + $0x280] sm:$0xff]  ;;  %v102_v1 = vld [vmem:[%s1515_s0 + $0x288] sm:$0xff]  ;;  %v103_v2 = vld [vmem:[%s1515_s0 + $0x290] sm:$0xff] }
  0x2c   :  { %766 = vmatmul.msk.f32.vlgmr.msrb.gmra.mxu2 %vm180_vm0, %v1009_v0  ;;  %353 = vmatpush.msra.mxu0 %v131_v17  ;;  %v104_v3 = vld [vmem:[%s1515_s0 + $0x298] sm:$0xff]  ;;  %v85_v5 = vld [vmem:[%s1515_s0 + $0x200] sm:$0xff]  ;;  %v86_v6 = vld [vmem:[%s1515_s0 + $0x208] sm:$0xff] }
  0x2d   :  { %373 = vmatpush.msra.mxu1 %v132_v18  ;;  %393 = vmatpush.msra.mxu2 %v133_v19  ;;  %v84_v4 = vld [vmem:[%s1515_s0 + $0x1f8] sm:$0xff]  ;;  %v87_v7 = vld [vmem:[%s1515_s0 + $0x210] sm:$0xff]  ;;  %v69_v10 = vld [vmem:[%s1515_s0 + $0x180] sm:$0xff] }
  0x2e   :  { %413 = vmatpush.msra.mxu3 %v134_v20  ;;  %764 = vmatmul.msk.f32.vlgmr.msrb.gmra.mxu0 %vm180_vm0, %v1009_v0  ;;  %v67_v8 = vld [vmem:[%s1515_s0 + $0x170] sm:$0xff]  ;;  %v68_v9 = vld [vmem:[%s1515_s0 + $0x178] sm:$0xff]  ;;  %v70_v11 = vld [vmem:[%s1515_s0 + $0x188] sm:$0xff] }
  0x2f   :  { %767 = vmatmul.msk.f32.vlgmr.msrb.gmra.mxu3 %vm180_vm0, %v1009_v0  ;;  %354 = vmatpush.msra.mxu0 %v114_v21  ;;  %v50_v12 = vld [vmem:[%s1515_s0 + $0xe8] sm:$0xff]  ;;  %v51_v13 = vld [vmem:[%s1515_s0 + $0xf0] sm:$0xff]  ;;  %v52_v14 = vld [vmem:[%s1515_s0 + $0xf8] sm:$0xff] }
  0x30   :  { %374 = vmatpush.msra.mxu1 %v115_v22  ;;  %394 = vmatpush.msra.mxu2 %v116_v23  ;;  %v53_v15 = vld [vmem:[%s1515_s0 + $0x100] sm:$0xff]  ;;  %v34_v17 = vld [vmem:[%s1515_s0 + $0x68] sm:$0xff]  ;;  %v35_v18 = vld [vmem:[%s1515_s0 + $0x70] sm:$0xff] }
  0x31   :  { %414 = vmatpush.msra.mxu3 %v117_v24  ;;  %765 = vmatmul.msk.f32.vlgmr.msrb.gmra.mxu1 %vm180_vm0, %v1009_v0  ;;  %v33_v16 = vld [vmem:[%s1515_s0 + $0x60] sm:$0xff]  ;;  %v36_v19 = vld [vmem:[%s1515_s0 + $0x78] sm:$0xff]  ;;  %v139_v22 = vld [vmem:[%s1515_s0 + $0x3b0] sm:$0xff] }
  0x32   :  { %355 = vmatpush.msra.mxu0 %v97_v25  ;;  %375 = vmatpush.msra.mxu1 %v98_v26  ;;  %v173_v20 = vld [vmem:[%s1515_s0 + $0x4c0] sm:$0xff]  ;;  %v156_v21 = vld [vmem:[%s1515_s0 + $0x438] sm:$0xff]  ;;  %v122_v23 = vld [vmem:[%s1515_s0 + $0x328] sm:$0xff] }
  0x33   :  { %395 = vmatpush.msra.mxu2 %v99_v27  ;;  %415 = vmatpush.msra.mxu3 %v100_v28  ;;  %v105_v24 = vld [vmem:[%s1515_s0 + $0x2a0] sm:$0xff]  ;;  %v88_v25 = vld [vmem:[%s1515_s0 + $0x218] sm:$0xff]  ;;  %v71_v26 = vld [vmem:[%s1515_s0 + $0x190] sm:$0xff] }
  0x34   :  { %778 = vset.pattern.permute.xlu0 %v783_v34  ;;  %356 = vmatpush.msra.mxu0 %v80_v29  ;;  %v54_v27 = vld [vmem:[%s1515_s0 + $0x108] sm:$0xff]  ;;  %v37_v28 = vld [vmem:[%s1515_s0 + $0x80] sm:$0xff] }
  0x35   :  { %376 = vmatpush.msra.mxu1 %v81_v30  ;;  %396 = vmatpush.msra.mxu2 %v82_v31 }
  0x36   :  { %416 = vmatpush.msra.mxu3 %v83_v32  ;;  %177 = vperm.xlu0 %778, %v174_v33  }
  0x37   :  { %357 = vmatpush.msra.mxu0 %v63_v35  ;;  %377 = vmatpush.msra.mxu1 %v64_v36 }
  0x38   :  { %397 = vmatpush.msra.mxu2 %v65_v37  ;;  %417 = vmatpush.msra.mxu3 %v66_v38 }
  0x39   :  { %358 = vmatpush.msra.mxu0 %v46_v39  ;;  %378 = vmatpush.msra.mxu1 %v47_v40 }
  0x3a   :  { %398 = vmatpush.msra.mxu2 %v48_v41  ;;  %418 = vmatpush.msra.mxu3 %v49_v42 }
  0x3b   :  { %359 = vmatpush.msra.mxu0 %v29_v43  ;;  %379 = vmatpush.msra.mxu1 %v30_v44 }
  0x3c   :  { %399 = vmatpush.msra.mxu2 %v31_v45  ;;  %419 = vmatpush.msra.mxu3 %v32_v46 }
  0x3d   :  { %768 = vmatmul.msk.f32.vlgmr.msra.gmra.mxu0 %vm180_vm0, %v1009_v0  ;;  %770 = vmatmul.msk.f32.vlgmr.msra.gmra.mxu2 %vm180_vm0, %v1009_v0 }
  0x3e   :  { %771 = vmatmul.msk.f32.vlgmr.msra.gmra.mxu3 %vm180_vm0, %v1009_v0  ;;  %431 = vmatpush.msrb.mxu0 %v169_v47 }
  0x3f   :  { %451 = vmatpush.msrb.mxu1 %v170_v48  ;;  %471 = vmatpush.msrb.mxu2 %v171_v49 }
  0x40   :  { %491 = vmatpush.msrb.mxu3 %v172_v50  ;;  %769 = vmatmul.msk.f32.vlgmr.msra.gmra.mxu1 %vm180_vm0, %v1009_v0 }
  0x41   :  { %432 = vmatpush.msrb.mxu0 %v152_v51  ;;  %452 = vmatpush.msrb.mxu1 %v153_v52 }
  0x42   :  { %472 = vmatpush.msrb.mxu2 %v154_v53  ;;  %492 = vmatpush.msrb.mxu3 %v155_v54 }
  0x43   :  { %433 = vmatpush.msrb.mxu0 %v135_v55  ;;  %453 = vmatpush.msrb.mxu1 %v136_v56 }
  0x44   :  { %473 = vmatpush.msrb.mxu2 %v137_v57  ;;  %493 = vmatpush.msrb.mxu3 %v138_v58 }
  0x45   :  { %434 = vmatpush.msrb.mxu0 %v118_v59  ;;  %454 = vmatpush.msrb.mxu1 %v119_v60 }
  0x46   :  { %474 = vmatpush.msrb.mxu2 %v120_v61  ;;  %494 = vmatpush.msrb.mxu3 %v121_v62 }
  0x47   :  { %435 = vmatpush.msrb.mxu0 %v101_v63  ;;  %455 = vmatpush.msrb.mxu1 %v102_v1 }
  0x48   :  { %475 = vmatpush.msrb.mxu2 %v103_v2  ;;  %495 = vmatpush.msrb.mxu3 %v104_v3 }
  0x49   :  { %436 = vmatpush.msrb.mxu0 %v84_v4  ;;  %456 = vmatpush.msrb.mxu1 %v85_v5 }
  0x4a   :  { %476 = vmatpush.msrb.mxu2 %v86_v6  ;;  %496 = vmatpush.msrb.mxu3 %v87_v7 }
  0x4b   :  { %437 = vmatpush.msrb.mxu0 %v67_v8  ;;  %457 = vmatpush.msrb.mxu1 %v68_v9 }
  0x4c   :  { %477 = vmatpush.msrb.mxu2 %v69_v10  ;;  %497 = vmatpush.msrb.mxu3 %v70_v11 }
  0x4d   :  { %438 = vmatpush.msrb.mxu0 %v50_v12  ;;  %458 = vmatpush.msrb.mxu1 %v51_v13 }
  0x4e   :  { %478 = vmatpush.msrb.mxu2 %v52_v14  ;;  %498 = vmatpush.msrb.mxu3 %v53_v15 }
  0x4f   :  { %439 = vmatpush.msrb.mxu0 %v33_v16  ;;  %459 = vmatpush.msrb.mxu1 %v34_v17 }
  0x50   :  { %479 = vmatpush.msrb.mxu2 %v35_v18  ;;  %499 = vmatpush.msrb.mxu3 %v36_v19 }
  0x51   :  { %772 = vmatmul.msk.f32.vlgmr.msrb.gmra.mxu0 %vm180_vm0, %v1009_v0  ;;  %773 = vmatmul.msk.f32.vlgmr.msrb.gmra.mxu1 %vm180_vm0, %v1009_v0 }
  0x52   :  { %774 = vmatmul.msk.f32.vlgmr.msrb.gmra.mxu2 %vm180_vm0, %v1009_v0  ;;  %775 = vmatmul.msk.f32.vlgmr.msrb.gmra.mxu3 %vm180_vm0, %v1009_v0 }
  0x53   :  { %511 = vmatpush.msra.mxu0 %v173_v20  ;;  %779 = vset.pattern.permute.xlu1 %v783_v34 }
  0x54   :  { %780 = vset.pattern.permute.xlu2 %v783_v34 }
  0x55   :  { %512 = vmatpush.msra.mxu0 %v156_v21 }
  0x57   :  { %513 = vmatpush.msra.mxu0 %v139_v22 }
  0x59   :  { %514 = vmatpush.msra.mxu0 %v122_v23 }
  0x5b   :  { %515 = vmatpush.msra.mxu0 %v105_v24 }
  0x5d   :  { %516 = vmatpush.msra.mxu0 %v88_v25 }
  0x5f   :  { %517 = vmatpush.msra.mxu0 %v71_v26 }
  0x61   :  { %518 = vmatpush.msra.mxu0 %v54_v27 }
  0x63   :  { %519 = vmatpush.msra.mxu0 %v37_v28 }
  0x64   :  { %776 = vmatmul.msk.f32.vlgmr.msra.gmra.mxu0 %vm180_vm0, %v1009_v0 }
  0xa1   :  { %v201_v31 = vpop.f32.mrf.mxu0 }
  0xa4   :  { %v221_v30 = vpop.f32.mrf.mxu1 }
  0xa5   :  { %v241_v34 = vpop.f32.mrf.mxu2 }
  0xa8   :  { %v1318_v29 = vpop.permute.xlu0 %177  ;;  %v261_v37 = vpop.f32.mrf.mxu3 }
  0xa9   :  { %v1321_v32 = vadd.f32 %v201_v31, %v1318_v29  ;;  %v1324_v33 = vadd.f32 %v221_v30, %v1318_v29  ;;  %v1331_v0 = vadd.f32 %v241_v34, %v1318_v29  ;;  %v1336_v40 = vadd.f32 %v261_v37, %v1318_v29 }
  0xab   :  { %v525_v35 = vsel %vm524_vm1, %v1321_v32, 0.0  ;;  %v526_v36 = vsel %vm524_vm1, %v1324_v33, 0.0  ;;  %v528_v39 = vsel %vm524_vm1, %v1331_v0, 0.0  ;;  %v281_v41 = vpop.f32.mrf.mxu0  ;;  %v530_v43 = vsel %vm524_vm1, %v1336_v40, 0.0 }
  0xac   :  { %v527_v38 = vadd.f32 %v526_v36, %v525_v35  ;;  %v282_v44 = vadd.f32 %v281_v41, %v1318_v29 }
  0xae   :  { %v529_v42 = vadd.f32 %v528_v39, %v527_v38  ;;  %v301_v45 = vpop.f32.mrf.mxu1  ;;  %v532_v47 = vsel %vm524_vm1, %v282_v44, 0.0 }
  0xaf   :  { %v302_v48 = vadd.f32 %v301_v45, %v1318_v29  ;;  %v321_v49 = vpop.f32.mrf.mxu2 }
  0xb0   :  { %v531_v46 = vadd.f32 %v530_v43, %v529_v42  ;;  %v322_v52 = vadd.f32 %v321_v49, %v1318_v29 }
  0xb1   :  { %v534_v51 = vsel %vm524_vm1, %v302_v48, 0.0 }
  0xb2   :  { %v533_v50 = vadd.f32 %v532_v47, %v531_v46  ;;  %v341_v53 = vpop.f32.mrf.mxu3  ;;  %v536_v56 = vsel %vm524_vm1, %v322_v52, 0.0 }
  0xb3   :  { %v342_v57 = vadd.f32 %v341_v53, %v1318_v29 }
  0xb4   :  { %v535_v54 = vadd.f32 %v534_v51, %v533_v50 }
  0xb5   :  { %v538_v61 = vsel %vm524_vm1, %v342_v57, 0.0 }
  0xb6   :  { %v537_v59 = vadd.f32 %v536_v56, %v535_v54 }
  0xb8   :  { %v539_v2 = vadd.f32 %v538_v61, %v537_v59 }
  0xba   :  { %v361_v55 = vpop.f32.mrf.mxu0 }
  0xbb   :  { %v1348_v58 = vadd.f32 %v361_v55, %v1318_v29 }
  0xbd   :  { %v381_v60 = vpop.f32.mrf.mxu1  ;;  %v540_v63 = vsel %vm524_vm1, %v1348_v58, 0.0 }
  0xbe   :  { %v382_v1 = vadd.f32 %v381_v60, %v1318_v29  ;;  %v541_v4 = vadd.f32 %v540_v63, %v539_v2 }
  0xc0   :  { %v401_v62 = vpop.f32.mrf.mxu2  ;;  %v542_v5 = vsel %vm524_vm1, %v382_v1, 0.0 }
  0xc1   :  { %v1355_v3 = vadd.f32 %v401_v62, %v1318_v29  ;;  %v421_v6 = vpop.f32.mrf.mxu3  ;;  %v543_v9 = vadd.f32 %v542_v5, %v541_v4 }
  0xc2   :  { %v422_v10 = vadd.f32 %v421_v6, %v1318_v29 }
  0xc3   :  { %v544_v8 = vsel %vm524_vm1, %v1355_v3, 0.0 }
  0xc4   :  { %v545_v12 = vadd.f32 %v544_v8, %v543_v9  ;;  %v546_v15 = vsel %vm524_vm1, %v422_v10, 0.0 }
  0xc6   :  { %v547_v17 = vadd.f32 %v546_v15, %v545_v12 }
  0xce   :  { %v441_v7 = vpop.f32.mrf.mxu0  ;;  %v461_v13 = vpop.f32.mrf.mxu1 }
  0xcf   :  { %v1362_v11 = vadd.f32 %v441_v7, %v1318_v29  ;;  %v462_v18 = vadd.f32 %v461_v13, %v1318_v29 }
  0xd1   :  { %v548_v16 = vsel %vm524_vm1, %v1362_v11, 0.0  ;;  %v550_v22 = vsel %vm524_vm1, %v462_v18, 0.0 }
  0xd2   :  { %v549_v20 = vadd.f32 %v548_v16, %v547_v17 }
  0xd4   :  { %v551_v24 = vadd.f32 %v550_v22, %v549_v20 }
  0xd5   :  { %v481_v14 = vpop.f32.mrf.mxu2  ;;  %v501_v21 = vpop.f32.mrf.mxu3 }
  0xd6   :  { %v1369_v19 = vadd.f32 %v481_v14, %v1318_v29  ;;  %v502_v25 = vadd.f32 %v501_v21, %v1318_v29 }
  0xd8   :  { %v552_v23 = vsel %vm524_vm1, %v1369_v19, 0.0  ;;  %v554_v28 = vsel %vm524_vm1, %v502_v25, 0.0 }
  0xd9   :  { %v553_v26 = vadd.f32 %v552_v23, %v551_v24 }
  0xdb   :  { %v555_v31 = vadd.f32 %v554_v28, %v553_v26 }
  0xe1   :  { %v521_v27 = vpop.f32.mrf.mxu0 }
  0xe2   :  { %v522_v30 = vadd.f32 %v521_v27, %v1318_v29 }
  0xe4   :  { %v557_v34 = vsel %vm556_vm2, %v522_v30, 0.0 }
  0xe5   :  { %v558_v35 = vadd.f32 %v557_v34, %v555_v31 }
  0xe7   :  { %559 = vadd.xlane.f32.xlu0 %v558_v35 }
 0x15a   :  { %v560_v36 = vpop.xlane.xlu0 %559 }
 0x15b   :  { %v561_v37 = vmul.f32 0.0004608295, %v560_v36 }
 0x15d   :  { %v1379_v38 = vsub.f32 %v1321_v32, %v561_v37  ;;  %v1382_v39 = vsub.f32 %v1324_v33, %v561_v37  ;;  %v1385_v41 = vsub.f32 %v1331_v0, %v561_v37  ;;  %v1388_v42 = vsub.f32 %v1336_v40, %v561_v37 }
 0x15e   :  { %v1394_v45 = vsub.f32 %v282_v44, %v561_v37  ;;  %v1398_v46 = vsub.f32 %v302_v48, %v561_v37  ;;  %v1404_v49 = vsub.f32 %v322_v52, %v561_v37  ;;  %v1409_v53 = vsub.f32 %v342_v57, %v561_v37 }
 0x15f   :  { %v579_v29 = vmul.f32 %v1379_v38, %v1379_v38  ;;  %v580_v43 = vmul.f32 %v1382_v39, %v1382_v39  ;;  %v581_v32 = vmul.f32 %v1385_v41, %v1385_v41  ;;  %v582_v33 = vmul.f32 %v1388_v42, %v1388_v42 }
 0x160   :  { %v583_v50 = vmul.f32 %v1394_v45, %v1394_v45  ;;  %v584_v48 = vmul.f32 %v1398_v46, %v1398_v46  ;;  %v1415_v56 = vsub.f32 %v1348_v58, %v561_v37  ;;  %v585_v52 = vmul.f32 %v1404_v49, %v1404_v49 }
 0x161   :  { %v596_v0 = vsel %vm524_vm1, %v579_v29, 0.0  ;;  %v597_v40 = vsel %vm524_vm1, %v580_v43, 0.0  ;;  %v599_v44 = vsel %vm524_vm1, %v581_v32, 0.0  ;;  %v601_v54 = vsel %vm524_vm1, %v582_v33, 0.0 }
 0x162   :  { %v598_v47 = vadd.f32 %v597_v40, %v596_v0  ;;  %v603_v59 = vsel %vm524_vm1, %v583_v50, 0.0  ;;  %v1420_v61 = vsub.f32 %v382_v1, %v561_v37  ;;  %v586_v57 = vmul.f32 %v1409_v53, %v1409_v53 }
 0x163   :  { %v605_v62 = vsel %vm524_vm1, %v584_v48, 0.0  ;;  %v1426_v2 = vsub.f32 %v1355_v3, %v561_v37  ;;  %v587_v58 = vmul.f32 %v1415_v56, %v1415_v56  ;;  %v607_v4 = vsel %vm524_vm1, %v585_v52, 0.0 }
 0x164   :  { %v600_v51 = vadd.f32 %v599_v44, %v598_v47  ;;  %v1431_v6 = vsub.f32 %v422_v10, %v561_v37  ;;  %v588_v1 = vmul.f32 %v1420_v61, %v1420_v61  ;;  %v609_v7 = vsel %vm524_vm1, %v586_v57, 0.0 }
 0x165   :  { %v1437_v9 = vsub.f32 %v1362_v11, %v561_v37  ;;  %v589_v3 = vmul.f32 %v1426_v2, %v1426_v2  ;;  %v611_v12 = vsel %vm524_vm1, %v587_v58, 0.0  ;;  %v575_v14 = vsub.f32 %v462_v18, %v561_v37 }
 0x166   :  { %v602_v55 = vadd.f32 %v601_v54, %v600_v51  ;;  %v590_v10 = vmul.f32 %v1431_v6, %v1431_v6  ;;  %v613_v15 = vsel %vm524_vm1, %v588_v1, 0.0  ;;  %v1446_v17 = vsub.f32 %v1369_v19, %v561_v37 }
 0x167   :  { %v591_v11 = vmul.f32 %v1437_v9, %v1437_v9  ;;  %v615_v20 = vsel %vm524_vm1, %v589_v3, 0.0  ;;  %v577_v22 = vsub.f32 %v502_v25, %v561_v37  ;;  %v592_v23 = vmul.f32 %v575_v14, %v575_v14 }
 0x168   :  { %v604_v60 = vadd.f32 %v603_v59, %v602_v55  ;;  %v617_v24 = vsel %vm524_vm1, %v590_v10, 0.0  ;;  %v578_v26 = vsub.f32 %v522_v30, %v561_v37  ;;  %v593_v27 = vmul.f32 %v1446_v17, %v1446_v17  ;;  %v667_v37 = vld [vmem:[%s1518_s4] sm:$0xf] }
 0x169   :  { %v619_v28 = vsel %vm524_vm1, %v591_v11, 0.0  ;;  %v594_v19 = vmul.f32 %v577_v22, %v577_v22  ;;  %v621_v34 = vsel %vm524_vm1, %v592_v23, 0.0  ;;  %670 = vperm.xlu2 %780, %v667_v37   ;;  %v632_v55 = vld [vmem:[%s1519_s3] sm:$0xf] }
 0x16a   :  { %v606_v63 = vadd.f32 %v605_v62, %v604_v60  ;;  %v595_v36 = vmul.f32 %v578_v26, %v578_v26  ;;  %v623_v29 = vsel %vm524_vm1, %v593_v27, 0.0 }
 0x16b   :  { %v625_v25 = vsel %vm524_vm1, %v594_v19, 0.0 }
 0x16c   :  { %v608_v5 = vadd.f32 %v607_v4, %v606_v63  ;;  %v627_v33 = vsel %vm556_vm2, %v595_v36, 0.0 }
 0x16e   :  { %v610_v8 = vadd.f32 %v609_v7, %v608_v5 }
 0x170   :  { %v612_v13 = vadd.f32 %v611_v12, %v610_v8 }
 0x172   :  { %v614_v16 = vadd.f32 %v613_v15, %v612_v13 }
 0x174   :  { %v616_v21 = vadd.f32 %v615_v20, %v614_v16 }
 0x176   :  { %v618_v18 = vadd.f32 %v617_v24, %v616_v21 }
 0x178   :  { %v620_v31 = vadd.f32 %v619_v28, %v618_v18 }
 0x17a   :  { %v622_v35 = vadd.f32 %v621_v34, %v620_v31 }
 0x17c   :  { %v624_v43 = vadd.f32 %v623_v29, %v622_v35 }
 0x17e   :  { %v626_v32 = vadd.f32 %v625_v25, %v624_v43 }
 0x180   :  { %v628_v30 = vadd.f32 %v627_v33, %v626_v32 }
 0x182   :  { %629 = vadd.xlane.f32.xlu1 %v628_v30 }
 0x1c3   :  { %v671_v1 = vpop.permute.xlu2 %670 }
 0x1f5   :  { %v630_v0 = vpop.xlane.xlu1 %629 }
 0x1f6   :  { %v631_v40 = vmul.f32 0.0004608295, %v630_v0 }
 0x1f8   :  { %v633_v47 = vadd.f32 1e-05, %v631_v40 }
 0x1fa   :  { %781 = vrsqrt.f32 %v633_v47  ;;  %vm640_vm4 = vweird.f32 %v633_v47 }
 0x200   :  { %v782_v50 = vpop.eup %781 }
 0x201   :  { %v635_v44 = vmul.f32 %v782_v50, %v633_v47  ;;  %vm641_vm3 = vweird.f32 %v782_v50 }
 0x202   :  { %vm642_vm5 = vmor %vm640_vm4, %vm641_vm3 }
 0x203   :  { %v636_v51 = vmul.f32 %v782_v50, %v635_v44 }
 0x205   :  { %v637_v48 = vmul.f32 0.5, %v636_v51 }
 0x207   :  { %v638_v54 = vsub.f32 1.5, %v637_v48 }
 0x209   :  { %v639_v52 = vmul.f32 %v782_v50, %v638_v54 }
 0x20b   :  { %v643_v59 = vsel %vm642_vm5, %v782_v50, %v639_v52 }
 0x20c   :  { %v644_v60 = vmul.f32 %v643_v59, %v632_v55 }
 0x20e   :  { %647 = vperm.xlu1 %779, %v644_v60  }
 0x280   :  { %v648_v57 = vpop.permute.xlu1 %647 }
 0x281   :  { %v651_v62 = vmul.f32 %v648_v57, %v1382_v39  ;;  %v650_v63 = vmul.f32 %v648_v57, %v1379_v38  ;;  %v652_v58 = vmul.f32 %v648_v57, %v1385_v41  ;;  %v653_v4 = vmul.f32 %v648_v57, %v1388_v42 }
 0x282   :  { %v655_v5 = vmul.f32 %v648_v57, %v1398_v46  ;;  %v654_v7 = vmul.f32 %v648_v57, %v1394_v45  ;;  %v656_v8 = vmul.f32 %v648_v57, %v1404_v49  ;;  %v657_v3 = vmul.f32 %v648_v57, %v1409_v53 }
 0x283   :  { %v659_v12 = vmul.f32 %v648_v57, %v1420_v61  ;;  %v658_v13 = vmul.f32 %v648_v57, %v1415_v56  ;;  %v660_v39 = vmul.f32 %v648_v57, %v1426_v2  ;;  %v661_v38 = vmul.f32 %v648_v57, %v1431_v6 }
 0x284   :  { %v663_v41 = vmul.f32 %v648_v57, %v575_v14  ;;  %v662_v42 = vmul.f32 %v648_v57, %v1437_v9  ;;  %v665_v10 = vmul.f32 %v648_v57, %v577_v22  ;;  %v666_v46 = vmul.f32 %v648_v57, %v578_v26 }
 0x285   :  { %v674_v15 = vadd.f32 %v671_v1, %v651_v62  ;;  %v664_v45 = vmul.f32 %v648_v57, %v1446_v17  ;;  %v673_v16 = vadd.f32 %v671_v1, %v650_v63  ;;  %v676_v49 = vadd.f32 %v671_v1, %v653_v4 }
 0x286   :  { %v678_v11 = vadd.f32 %v671_v1, %v655_v5  ;;  %v675_v53 = vadd.f32 %v671_v1, %v652_v58  ;;  %v677_v20 = vadd.f32 %v671_v1, %v654_v7  ;;  %v680_v61 = vadd.f32 %v671_v1, %v657_v3 }
 0x287   :  { %v682_v21 = vadd.f32 %v671_v1, %v659_v12  ;;  %v679_v56 = vadd.f32 %v671_v1, %v656_v8  ;;  %v681_v23 = vadd.f32 %v671_v1, %v658_v13  ;;  %v684_v2 = vadd.f32 %v671_v1, %v661_v38 }
 0x288   :  { %v686_v24 = vadd.f32 %v671_v1, %v663_v41  ;;  %v683_v6 = vadd.f32 %v671_v1, %v660_v39  ;;  %v688_v14 = vadd.f32 %v671_v1, %v665_v10  ;;  %v689_v18 = vadd.f32 %v671_v1, %v666_v46 }
 0x289   :  { %v691_v9 = vmax.f32 %v674_v15, 0.0  ;;  %v685_v22 = vadd.f32 %v671_v1, %v662_v42  ;;  %v687_v26 = vadd.f32 %v671_v1, %v664_v45  ;;  %v693_v27 = vmax.f32 %v676_v49, 0.0 }
 0x28a   :  { %v695_v28 = vmax.f32 %v678_v11, 0.0  ;;  %v690_v17 = vmax.f32 %v673_v16, 0.0  ;;  %v692_v31 = vmax.f32 %v675_v53, 0.0  ;;  %v697_v19 = vmax.f32 %v680_v61, 0.0 }
 0x28b   :  { %v699_v34 = vmax.f32 %v682_v21, 0.0  ;;  %v694_v35 = vmax.f32 %v677_v20, 0.0  ;;  %v696_v36 = vmax.f32 %v679_v56, 0.0  ;;  %v701_v29 = vmax.f32 %v684_v2, 0.0 }
 0x28c   :  { %v703_v43 = vmax.f32 %v686_v24, 0.0  ;;  %v698_v25 = vmax.f32 %v681_v23, 0.0  ;;  %v705_v32 = vmax.f32 %v688_v14, 0.0  ;;  %v706_v33 = vmax.f32 %v689_v18, 0.0 }
 0x28d   :  { %v723_v30 = vrot.slane %v691_v9, 4  ;;  %v724_v37 = vrot.slane %v693_v27, 4  ;;  %v725_v0 = vrot.slane %v695_v28, 4  ;;  %v726_v40 = vrot.slane %v697_v19, 4 }
 0x28e   :  { %v727_v47 = vrot.slane %v699_v34, 4  ;;  %v700_v50 = vmax.f32 %v683_v6, 0.0  ;;  %v728_v44 = vrot.slane %v701_v29, 4  ;;  %v729_v51 = vrot.slane %v703_v43, 4  ;;  %755 = vst.msk [vmem:[%s1520_s5 + $0x40] sm:$0xf] %vm556_vm2, %v706_v33 }
 0x28f   :  { %v731_v48 = vsel %vm524_vm1, %v690_v17, %v723_v30  ;;  %v730_v54 = vrot.slane %v705_v32, 4  ;;  %v732_v55 = vsel %vm524_vm1, %v692_v31, %v724_v37  ;;  %v733_v52 = vsel %vm524_vm1, %v694_v35, %v725_v0 }
 0x290   :  { %v734_v59 = vsel %vm524_vm1, %v696_v36, %v726_v40  ;;  %747 = vst [vmem:[%s1520_s5] sm:$0xff] %v731_v48  ;;  %v702_v60 = vmax.f32 %v685_v22, 0.0  ;;  %v735_v57 = vsel %vm524_vm1, %v698_v25, %v727_v47  ;;  %v704_v62 = vmax.f32 %v687_v26, 0.0 }
 0x291   :  { %748 = vst [vmem:[%s1520_s5 + $0x8] sm:$0xff] %v732_v55  ;;  %v736_v63 = vsel %vm524_vm1, %v700_v50, %v728_v44 }
 0x292   :  { %749 = vst [vmem:[%s1520_s5 + $0x10] sm:$0xff] %v733_v52  ;;  %v737_v58 = vsel %vm524_vm1, %v702_v60, %v729_v51  ;;  %v738_v4 = vsel %vm524_vm1, %v704_v62, %v730_v54 }
 0x293   :  { %750 = vst [vmem:[%s1520_s5 + $0x18] sm:$0xff] %v734_v59 }
 0x294   :  { %751 = vst [vmem:[%s1520_s5 + $0x20] sm:$0xff] %v735_v57 }
 0x295   :  { %752 = vst [vmem:[%s1520_s5 + $0x28] sm:$0xff] %v736_v63 }
 0x296   :  { %753 = vst [vmem:[%s1520_s5 + $0x30] sm:$0xff] %v737_v58 }
 0x297   :  { %754 = vst [vmem:[%s1520_s5 + $0x38] sm:$0xff] %v738_v4 }

// kernel: generator_forward.8
= control target key start
LH: loop header
LB: loop body
LE: loop exit
PB: predicated region body
PF: predicated region fallthrough
CT: control target
= control target key end

     0   :  { %vm597_vm0 = vcmask 523264   ;;  %vm2221_vm1 = vcmask 1043456   ;;  %s4683_s0 = inlined_call_operand.vmem [shape: f32[64,9216], index: 0, kind: input, shape index: {}]   ;;  %s4684_s1 = inlined_call_operand.vmem [shape: f32[3,64], index: 1, kind: input, shape index: {}]   ;;  %s4685_s2 = inlined_call_operand.vmem [shape: f32[3,1], index: 2, kind: input, shape index: {}]   ;;  %s4686_s3 = inlined_call_operand.vmem [shape: f32[3,9216], index: 3, kind: output, shape index: {}]  }
   0x1   :  { %v521_v0 = vld [vmem:[%s4683_s0 + $0xfd0] sm:$0xff]  ;;  %v522_v1 = vld [vmem:[%s4683_s0 + $0xfd8] sm:$0xff]  ;;  %v520_v4 = vld [vmem:[%s4683_s0 + $0xfc8] sm:$0xff] }
   0x2   :  { %v449_v2 = vld [vmem:[%s4683_s0 + $0xd90] sm:$0xff]  ;;  %649 = vmatpush.msra.mxu2 %v521_v0  ;;  %669 = vmatpush.msra.mxu3 %v522_v1  ;;  %v450_v3 = vld [vmem:[%s4683_s0 + $0xd98] sm:$0xff]  ;;  %v519_v7 = vld [vmem:[%s4683_s0 + $0xfc0] sm:$0xff] }
   0x3   :  { %v377_v5 = vld [vmem:[%s4683_s0 + $0xb50] sm:$0xff]  ;;  %629 = vmatpush.msra.mxu1 %v520_v4  ;;  %v378_v6 = vld [vmem:[%s4683_s0 + $0xb58] sm:$0xff]  ;;  %v448_v8 = vld [vmem:[%s4683_s0 + $0xd88] sm:$0xff]  ;;  %609 = vmatpush.msra.mxu0 %v519_v7 }
   0x4   :  { %650 = vmatpush.msra.mxu2 %v449_v2  ;;  %670 = vmatpush.msra.mxu3 %v450_v3  ;;  %v447_v9 = vld [vmem:[%s4683_s0 + $0xd80] sm:$0xff]  ;;  %v305_v10 = vld [vmem:[%s4683_s0 + $0x910] sm:$0xff]  ;;  %v306_v11 = vld [vmem:[%s4683_s0 + $0x918] sm:$0xff] }
   0x5   :  { %630 = vmatpush.msra.mxu1 %v448_v8  ;;  %v376_v12 = vld [vmem:[%s4683_s0 + $0xb48] sm:$0xff]  ;;  %v375_v13 = vld [vmem:[%s4683_s0 + $0xb40] sm:$0xff]  ;;  %610 = vmatpush.msra.mxu0 %v447_v9  ;;  %v233_v15 = vld [vmem:[%s4683_s0 + $0x6d0] sm:$0xff] }
   0x6   :  { %651 = vmatpush.msra.mxu2 %v377_v5  ;;  %671 = vmatpush.msra.mxu3 %v378_v6  ;;  %v304_v14 = vld [vmem:[%s4683_s0 + $0x908] sm:$0xff]  ;;  %v234_v16 = vld [vmem:[%s4683_s0 + $0x6d8] sm:$0xff]  ;;  %v303_v17 = vld [vmem:[%s4683_s0 + $0x900] sm:$0xff] }
   0x7   :  { %631 = vmatpush.msra.mxu1 %v376_v12  ;;  %v232_v18 = vld [vmem:[%s4683_s0 + $0x6c8] sm:$0xff]  ;;  %611 = vmatpush.msra.mxu0 %v375_v13  ;;  %v161_v19 = vld [vmem:[%s4683_s0 + $0x490] sm:$0xff]  ;;  %v162_v20 = vld [vmem:[%s4683_s0 + $0x498] sm:$0xff] }
   0x8   :  { %652 = vmatpush.msra.mxu2 %v305_v10  ;;  %672 = vmatpush.msra.mxu3 %v306_v11  ;;  %v231_v21 = vld [vmem:[%s4683_s0 + $0x6c0] sm:$0xff]  ;;  %v160_v22 = vld [vmem:[%s4683_s0 + $0x488] sm:$0xff]  ;;  %v89_v23 = vld [vmem:[%s4683_s0 + $0x250] sm:$0xff] }
   0x9   :  { %632 = vmatpush.msra.mxu1 %v304_v14  ;;  %612 = vmatpush.msra.mxu0 %v303_v17  ;;  %v90_v24 = vld [vmem:[%s4683_s0 + $0x258] sm:$0xff]  ;;  %v159_v25 = vld [vmem:[%s4683_s0 + $0x480] sm:$0xff]  ;;  %v88_v26 = vld [vmem:[%s4683_s0 + $0x248] sm:$0xff] }
   0xa   :  { %653 = vmatpush.msra.mxu2 %v233_v15  ;;  %673 = vmatpush.msra.mxu3 %v234_v16  ;;  %v17_v27 = vld [vmem:[%s4683_s0 + $0x10] sm:$0xff]  ;;  %v18_v28 = vld [vmem:[%s4683_s0 + $0x18] sm:$0xff]  ;;  %v87_v31 = vld [vmem:[%s4683_s0 + $0x240] sm:$0xff] }
   0xb   :  { %633 = vmatpush.msra.mxu1 %v232_v18  ;;  %613 = vmatpush.msra.mxu0 %v231_v21  ;;  %v525_v29 = vld [vmem:[%s4683_s0 + $0xff0] sm:$0xff]  ;;  %v526_v30 = vld [vmem:[%s4683_s0 + $0xff8] sm:$0xff]  ;;  %v16_v32 = vld [vmem:[%s4683_s0 + $0x8] sm:$0xff] }
   0xc   :  { %654 = vmatpush.msra.mxu2 %v161_v19  ;;  %674 = vmatpush.msra.mxu3 %v162_v20  ;;  %v453_v33 = vld [vmem:[%s4683_s0 + $0xdb0] sm:$0xff]  ;;  %v454_v34 = vld [vmem:[%s4683_s0 + $0xdb8] sm:$0xff]  ;;  %v524_v35 = vld [vmem:[%s4683_s0 + $0xfe8] sm:$0xff] }
   0xd   :  { %634 = vmatpush.msra.mxu1 %v160_v22  ;;  %614 = vmatpush.msra.mxu0 %v159_v25  ;;  %v15_v36 = vld [vmem:[%s4683_s0] sm:$0xff]  ;;  %v381_v37 = vld [vmem:[%s4683_s0 + $0xb70] sm:$0xff]  ;;  %v382_v38 = vld [vmem:[%s4683_s0 + $0xb78] sm:$0xff] }
   0xe   :  { %655 = vmatpush.msra.mxu2 %v89_v23  ;;  %675 = vmatpush.msra.mxu3 %v90_v24  ;;  %v523_v39 = vld [vmem:[%s4683_s0 + $0xfe0] sm:$0xff]  ;;  %v452_v40 = vld [vmem:[%s4683_s0 + $0xda8] sm:$0xff]  ;;  %v309_v41 = vld [vmem:[%s4683_s0 + $0x930] sm:$0xff] }
   0xf   :  { %635 = vmatpush.msra.mxu1 %v88_v26  ;;  %615 = vmatpush.msra.mxu0 %v87_v31  ;;  %v310_v42 = vld [vmem:[%s4683_s0 + $0x938] sm:$0xff]  ;;  %v451_v43 = vld [vmem:[%s4683_s0 + $0xda0] sm:$0xff]  ;;  %v380_v44 = vld [vmem:[%s4683_s0 + $0xb68] sm:$0xff] }
  0x10   :  { %656 = vmatpush.msra.mxu2 %v17_v27  ;;  %676 = vmatpush.msra.mxu3 %v18_v28  ;;  %v237_v45 = vld [vmem:[%s4683_s0 + $0x6f0] sm:$0xff]  ;;  %v238_v46 = vld [vmem:[%s4683_s0 + $0x6f8] sm:$0xff]  ;;  %v379_v47 = vld [vmem:[%s4683_s0 + $0xb60] sm:$0xff] }
  0x11   :  { %636 = vmatpush.msra.mxu1 %v16_v32  ;;  %616 = vmatpush.msra.mxu0 %v15_v36  ;;  %v308_v48 = vld [vmem:[%s4683_s0 + $0x928] sm:$0xff]  ;;  %v165_v49 = vld [vmem:[%s4683_s0 + $0x4b0] sm:$0xff]  ;;  %v166_v50 = vld [vmem:[%s4683_s0 + $0x4b8] sm:$0xff] }
  0x12   :  { %729 = vmatpush.msrb.mxu2 %v525_v29  ;;  %749 = vmatpush.msrb.mxu3 %v526_v30  ;;  %v307_v51 = vld [vmem:[%s4683_s0 + $0x920] sm:$0xff]  ;;  %v236_v52 = vld [vmem:[%s4683_s0 + $0x6e8] sm:$0xff]  ;;  %v93_v53 = vld [vmem:[%s4683_s0 + $0x270] sm:$0xff] }
  0x13   :  { %709 = vmatpush.msrb.mxu1 %v524_v35  ;;  %689 = vmatpush.msrb.mxu0 %v523_v39  ;;  %v94_v54 = vld [vmem:[%s4683_s0 + $0x278] sm:$0xff]  ;;  %v235_v55 = vld [vmem:[%s4683_s0 + $0x6e0] sm:$0xff]  ;;  %v164_v56 = vld [vmem:[%s4683_s0 + $0x4a8] sm:$0xff]  ;;  %v2554_v35 = vmov 0  }
  0x14   :  { %730 = vmatpush.msrb.mxu2 %v453_v33  ;;  %750 = vmatpush.msrb.mxu3 %v454_v34  ;;  %v21_v57 = vld [vmem:[%s4683_s0 + $0x30] sm:$0xff]  ;;  %v22_v58 = vld [vmem:[%s4683_s0 + $0x38] sm:$0xff]  ;;  %v2755_v59 = vld [vmem:[%s4684_s1] sm:$0x7] }
  0x15   :  { %710 = vmatpush.msrb.mxu1 %v452_v40  ;;  %690 = vmatpush.msrb.mxu0 %v451_v43  ;;  %v529_v60 = vld [vmem:[%s4683_s0 + $0x1010] sm:$0xff]  ;;  %v530_v61 = vld [vmem:[%s4683_s0 + $0x1018] sm:$0xff]  ;;  %v163_v62 = vld [vmem:[%s4683_s0 + $0x4a0] sm:$0xff] }
  0x16   :  { %731 = vmatpush.msrb.mxu2 %v381_v37  ;;  %751 = vmatpush.msrb.mxu3 %v382_v38  ;;  %v92_v63 = vld [vmem:[%s4683_s0 + $0x268] sm:$0xff]  ;;  %v457_v0 = vld [vmem:[%s4683_s0 + $0xdd0] sm:$0xff]  ;;  %v458_v1 = vld [vmem:[%s4683_s0 + $0xdd8] sm:$0xff] }
  0x17   :  { %711 = vmatpush.msrb.mxu1 %v380_v44  ;;  %691 = vmatpush.msrb.mxu0 %v379_v47  ;;  %v91_v2 = vld [vmem:[%s4683_s0 + $0x260] sm:$0xff]  ;;  %v20_v3 = vld [vmem:[%s4683_s0 + $0x28] sm:$0xff]  ;;  %v385_v4 = vld [vmem:[%s4683_s0 + $0xb90] sm:$0xff] }
  0x18   :  { %732 = vmatpush.msrb.mxu2 %v309_v41  ;;  %752 = vmatpush.msrb.mxu3 %v310_v42  ;;  %v528_v5 = vld [vmem:[%s4683_s0 + $0x1008] sm:$0xff]  ;;  %v386_v6 = vld [vmem:[%s4683_s0 + $0xb98] sm:$0xff]  ;;  %v19_v7 = vld [vmem:[%s4683_s0 + $0x20] sm:$0xff] }
  0x19   :  { %712 = vmatpush.msrb.mxu1 %v308_v48  ;;  %692 = vmatpush.msrb.mxu0 %v307_v51  ;;  %v313_v8 = vld [vmem:[%s4683_s0 + $0x950] sm:$0xff]  ;;  %v456_v9 = vld [vmem:[%s4683_s0 + $0xdc8] sm:$0xff]  ;;  %v527_v10 = vld [vmem:[%s4683_s0 + $0x1000] sm:$0xff] }
  0x1a   :  { %733 = vmatpush.msrb.mxu2 %v237_v45  ;;  %753 = vmatpush.msrb.mxu3 %v238_v46  ;;  %v314_v11 = vld [vmem:[%s4683_s0 + $0x958] sm:$0xff]  ;;  %v384_v12 = vld [vmem:[%s4683_s0 + $0xb88] sm:$0xff]  ;;  %v241_v13 = vld [vmem:[%s4683_s0 + $0x710] sm:$0xff] }
  0x1b   :  { %713 = vmatpush.msrb.mxu1 %v236_v52  ;;  %693 = vmatpush.msrb.mxu0 %v235_v55  ;;  %v455_v14 = vld [vmem:[%s4683_s0 + $0xdc0] sm:$0xff]  ;;  %v242_v15 = vld [vmem:[%s4683_s0 + $0x718] sm:$0xff]  ;;  %v312_v16 = vld [vmem:[%s4683_s0 + $0x948] sm:$0xff] }
  0x1c   :  { %734 = vmatpush.msrb.mxu2 %v165_v49  ;;  %754 = vmatpush.msrb.mxu3 %v166_v50  ;;  %v169_v17 = vld [vmem:[%s4683_s0 + $0x4d0] sm:$0xff]  ;;  %v383_v18 = vld [vmem:[%s4683_s0 + $0xb80] sm:$0xff]  ;;  %v170_v19 = vld [vmem:[%s4683_s0 + $0x4d8] sm:$0xff] }
  0x1d   :  { %714 = vmatpush.msrb.mxu1 %v164_v56  ;;  %2336 = vmatmul.msk.f32.vlgmr.msra.gmra.mxu2 %vm597_vm0, %v2755_v59  ;;  %v240_v20 = vld [vmem:[%s4683_s0 + $0x708] sm:$0xff]  ;;  %v97_v21 = vld [vmem:[%s4683_s0 + $0x290] sm:$0xff]  ;;  %v311_v22 = vld [vmem:[%s4683_s0 + $0x940] sm:$0xff] }
  0x1e   :  { %735 = vmatpush.msrb.mxu2 %v93_v53  ;;  %755 = vmatpush.msrb.mxu3 %v94_v54  ;;  %v98_v23 = vld [vmem:[%s4683_s0 + $0x298] sm:$0xff]  ;;  %v168_v24 = vld [vmem:[%s4683_s0 + $0x4c8] sm:$0xff]  ;;  %v25_v25 = vld [vmem:[%s4683_s0 + $0x50] sm:$0xff] }
  0x1f   :  { %2337 = vmatmul.msk.f32.vlgmr.msra.gmra.mxu3 %vm597_vm0, %v2755_v59  ;;  %694 = vmatpush.msrb.mxu0 %v163_v62  ;;  %v239_v26 = vld [vmem:[%s4683_s0 + $0x700] sm:$0xff]  ;;  %v26_v27 = vld [vmem:[%s4683_s0 + $0x58] sm:$0xff]  ;;  %v533_v28 = vld [vmem:[%s4683_s0 + $0x1030] sm:$0xff] }
  0x20   :  { %736 = vmatpush.msrb.mxu2 %v21_v57  ;;  %756 = vmatpush.msrb.mxu3 %v22_v58  ;;  %v534_v29 = vld [vmem:[%s4683_s0 + $0x1038] sm:$0xff]  ;;  %v167_v30 = vld [vmem:[%s4683_s0 + $0x4c0] sm:$0xff]  ;;  %v96_v31 = vld [vmem:[%s4683_s0 + $0x288] sm:$0xff] }
  0x21   :  { %715 = vmatpush.msrb.mxu1 %v92_v63  ;;  %695 = vmatpush.msrb.mxu0 %v91_v2  ;;  %v591_v32 = vld [vmem:[%s4685_s2] sm:$0x7]  ;;  %v461_v33 = vld [vmem:[%s4683_s0 + $0xdf0] sm:$0xff]  ;;  %v462_v34 = vld [vmem:[%s4683_s0 + $0xdf8] sm:$0xff] }
  0x22   :  { %809 = vmatpush.msra.mxu2 %v529_v60  ;;  %829 = vmatpush.msra.mxu3 %v530_v61  ;;  %v95_v36 = vld [vmem:[%s4683_s0 + $0x280] sm:$0xff]  ;;  %v24_v37 = vld [vmem:[%s4683_s0 + $0x48] sm:$0xff]  ;;  %v389_v38 = vld [vmem:[%s4683_s0 + $0xbb0] sm:$0xff] }
  0x23   :  { %716 = vmatpush.msrb.mxu1 %v20_v3  ;;  %696 = vmatpush.msrb.mxu0 %v19_v7  ;;  %v532_v39 = vld [vmem:[%s4683_s0 + $0x1028] sm:$0xff]  ;;  %v390_v40 = vld [vmem:[%s4683_s0 + $0xbb8] sm:$0xff]  ;;  %v23_v41 = vld [vmem:[%s4683_s0 + $0x40] sm:$0xff] }
  0x24   :  { %810 = vmatpush.msra.mxu2 %v457_v0  ;;  %830 = vmatpush.msra.mxu3 %v458_v1  ;;  %v317_v42 = vld [vmem:[%s4683_s0 + $0x970] sm:$0xff]  ;;  %v460_v43 = vld [vmem:[%s4683_s0 + $0xde8] sm:$0xff]  ;;  %v531_v44 = vld [vmem:[%s4683_s0 + $0x1020] sm:$0xff] }
  0x25   :  { %2335 = vmatmul.msk.f32.vlgmr.msra.gmra.mxu1 %vm597_vm0, %v2755_v59  ;;  %2334 = vmatmul.msk.f32.vlgmr.msra.gmra.mxu0 %vm597_vm0, %v2755_v59  ;;  %v318_v45 = vld [vmem:[%s4683_s0 + $0x978] sm:$0xff]  ;;  %v388_v46 = vld [vmem:[%s4683_s0 + $0xba8] sm:$0xff]  ;;  %v245_v47 = vld [vmem:[%s4683_s0 + $0x730] sm:$0xff] }
  0x26   :  { %811 = vmatpush.msra.mxu2 %v385_v4  ;;  %789 = vmatpush.msra.mxu1 %v528_v5  ;;  %v459_v48 = vld [vmem:[%s4683_s0 + $0xde0] sm:$0xff]  ;;  %v246_v49 = vld [vmem:[%s4683_s0 + $0x738] sm:$0xff]  ;;  %v316_v50 = vld [vmem:[%s4683_s0 + $0x968] sm:$0xff] }
  0x27   :  { %831 = vmatpush.msra.mxu3 %v386_v6  ;;  %769 = vmatpush.msra.mxu0 %v527_v10  ;;  %v173_v51 = vld [vmem:[%s4683_s0 + $0x4f0] sm:$0xff]  ;;  %v387_v52 = vld [vmem:[%s4683_s0 + $0xba0] sm:$0xff]  ;;  %v174_v53 = vld [vmem:[%s4683_s0 + $0x4f8] sm:$0xff] }
  0x28   :  { %812 = vmatpush.msra.mxu2 %v313_v8  ;;  %790 = vmatpush.msra.mxu1 %v456_v9  ;;  %v244_v54 = vld [vmem:[%s4683_s0 + $0x728] sm:$0xff]  ;;  %v101_v55 = vld [vmem:[%s4683_s0 + $0x2b0] sm:$0xff]  ;;  %v315_v56 = vld [vmem:[%s4683_s0 + $0x960] sm:$0xff] }
  0x29   :  { %832 = vmatpush.msra.mxu3 %v314_v11  ;;  %770 = vmatpush.msra.mxu0 %v455_v14  ;;  %v102_v57 = vld [vmem:[%s4683_s0 + $0x2b8] sm:$0xff]  ;;  %v172_v58 = vld [vmem:[%s4683_s0 + $0x4e8] sm:$0xff]  ;;  %v29_v60 = vld [vmem:[%s4683_s0 + $0x70] sm:$0xff] }
  0x2a   :  { %791 = vmatpush.msra.mxu1 %v384_v12  ;;  %813 = vmatpush.msra.mxu2 %v241_v13  ;;  %v243_v61 = vld [vmem:[%s4683_s0 + $0x720] sm:$0xff]  ;;  %v30_v62 = vld [vmem:[%s4683_s0 + $0x78] sm:$0xff]  ;;  %v537_v63 = vld [vmem:[%s4683_s0 + $0x1050] sm:$0xff] }
  0x2b   :  { %833 = vmatpush.msra.mxu3 %v242_v15  ;;  %771 = vmatpush.msra.mxu0 %v383_v18  ;;  %v538_v0 = vld [vmem:[%s4683_s0 + $0x1058] sm:$0xff]  ;;  %v171_v1 = vld [vmem:[%s4683_s0 + $0x4e0] sm:$0xff]  ;;  %v100_v2 = vld [vmem:[%s4683_s0 + $0x2a8] sm:$0xff] }
  0x2c   :  { %792 = vmatpush.msra.mxu1 %v312_v16  ;;  %814 = vmatpush.msra.mxu2 %v169_v17  ;;  %v465_v3 = vld [vmem:[%s4683_s0 + $0xe10] sm:$0xff]  ;;  %v466_v4 = vld [vmem:[%s4683_s0 + $0xe18] sm:$0xff]  ;;  %v99_v5 = vld [vmem:[%s4683_s0 + $0x2a0] sm:$0xff] }
  0x2d   :  { %834 = vmatpush.msra.mxu3 %v170_v19  ;;  %772 = vmatpush.msra.mxu0 %v311_v22  ;;  %v28_v6 = vld [vmem:[%s4683_s0 + $0x68] sm:$0xff]  ;;  %v393_v7 = vld [vmem:[%s4683_s0 + $0xbd0] sm:$0xff]  ;;  %v394_v9 = vld [vmem:[%s4683_s0 + $0xbd8] sm:$0xff] }
  0x2e   :  { %793 = vmatpush.msra.mxu1 %v240_v20  ;;  %815 = vmatpush.msra.mxu2 %v97_v21  ;;  %v536_v8 = vld [vmem:[%s4683_s0 + $0x1048] sm:$0xff]  ;;  %v27_v10 = vld [vmem:[%s4683_s0 + $0x60] sm:$0xff]  ;;  %v321_v11 = vld [vmem:[%s4683_s0 + $0x990] sm:$0xff] }
  0x2f   :  { %835 = vmatpush.msra.mxu3 %v98_v23  ;;  %773 = vmatpush.msra.mxu0 %v239_v26  ;;  %v464_v12 = vld [vmem:[%s4683_s0 + $0xe08] sm:$0xff]  ;;  %v535_v13 = vld [vmem:[%s4683_s0 + $0x1040] sm:$0xff]  ;;  %v322_v14 = vld [vmem:[%s4683_s0 + $0x998] sm:$0xff] }
  0x30   :  { %794 = vmatpush.msra.mxu1 %v168_v24  ;;  %816 = vmatpush.msra.mxu2 %v25_v25  ;;  %v392_v15 = vld [vmem:[%s4683_s0 + $0xbc8] sm:$0xff]  ;;  %v249_v16 = vld [vmem:[%s4683_s0 + $0x750] sm:$0xff]  ;;  %v463_v17 = vld [vmem:[%s4683_s0 + $0xe00] sm:$0xff] }
  0x31   :  { %836 = vmatpush.msra.mxu3 %v26_v27  ;;  %2340 = vmatmul.msk.f32.vlgmr.msrb.gmra.mxu2 %vm597_vm0, %v2755_v59  ;;  %v250_v18 = vld [vmem:[%s4683_s0 + $0x758] sm:$0xff]  ;;  %v320_v19 = vld [vmem:[%s4683_s0 + $0x988] sm:$0xff]  ;;  %v177_v20 = vld [vmem:[%s4683_s0 + $0x510] sm:$0xff] }
  0x32   :  { %2341 = vmatmul.msk.f32.vlgmr.msrb.gmra.mxu3 %vm597_vm0, %v2755_v59  ;;  %889 = vmatpush.msrb.mxu2 %v533_v28  ;;  %v391_v21 = vld [vmem:[%s4683_s0 + $0xbc0] sm:$0xff]  ;;  %v178_v22 = vld [vmem:[%s4683_s0 + $0x518] sm:$0xff]  ;;  %v248_v23 = vld [vmem:[%s4683_s0 + $0x748] sm:$0xff] }
  0x33   :  { %909 = vmatpush.msrb.mxu3 %v534_v29  ;;  %2407 = vset.pattern.permute.xlu0 %v2554_v35  ;;  %v105_v24 = vld [vmem:[%s4683_s0 + $0x2d0] sm:$0xff]  ;;  %v319_v25 = vld [vmem:[%s4683_s0 + $0x980] sm:$0xff]  ;;  %v106_v26 = vld [vmem:[%s4683_s0 + $0x2d8] sm:$0xff] }
  0x34   :  { %774 = vmatpush.msra.mxu0 %v167_v30  ;;  %795 = vmatpush.msra.mxu1 %v96_v31  ;;  %v176_v27 = vld [vmem:[%s4683_s0 + $0x508] sm:$0xff]  ;;  %v33_v28 = vld [vmem:[%s4683_s0 + $0x90] sm:$0xff]  ;;  %v247_v29 = vld [vmem:[%s4683_s0 + $0x740] sm:$0xff] }
  0x35   :  { %594 = vperm.xlu0 %2407, %v591_v32   ;;  %890 = vmatpush.msrb.mxu2 %v461_v33  ;;  %v34_v30 = vld [vmem:[%s4683_s0 + $0x98] sm:$0xff]  ;;  %v541_v31 = vld [vmem:[%s4683_s0 + $0x1070] sm:$0xff]  ;;  %v175_v33 = vld [vmem:[%s4683_s0 + $0x500] sm:$0xff] }
  0x36   :  { %910 = vmatpush.msrb.mxu3 %v462_v34  ;;  %775 = vmatpush.msra.mxu0 %v95_v36  ;;  %v542_v32 = vld [vmem:[%s4683_s0 + $0x1078] sm:$0xff]  ;;  %v104_v34 = vld [vmem:[%s4683_s0 + $0x2c8] sm:$0xff]  ;;  %v469_v35 = vld [vmem:[%s4683_s0 + $0xe30] sm:$0xff] }
  0x37   :  { %796 = vmatpush.msra.mxu1 %v24_v37  ;;  %891 = vmatpush.msrb.mxu2 %v389_v38  ;;  %v470_v36 = vld [vmem:[%s4683_s0 + $0xe38] sm:$0xff]  ;;  %v103_v37 = vld [vmem:[%s4683_s0 + $0x2c0] sm:$0xff]  ;;  %v32_v38 = vld [vmem:[%s4683_s0 + $0x88] sm:$0xff] }
  0x38   :  { %2339 = vmatmul.msk.f32.vlgmr.msrb.gmra.mxu1 %vm597_vm0, %v2755_v59  ;;  %911 = vmatpush.msrb.mxu3 %v390_v40  ;;  %v540_v40 = vld [vmem:[%s4683_s0 + $0x1068] sm:$0xff] }
  0x39   :  { %869 = vmatpush.msrb.mxu1 %v532_v39  ;;  %776 = vmatpush.msra.mxu0 %v23_v41  ;;  %v397_v39 = vld [vmem:[%s4683_s0 + $0xbf0] sm:$0xff]  ;;  %v398_v41 = vld [vmem:[%s4683_s0 + $0xbf8] sm:$0xff] }
  0x3a   :  { %892 = vmatpush.msrb.mxu2 %v317_v42  ;;  %2338 = vmatmul.msk.f32.vlgmr.msrb.gmra.mxu0 %vm597_vm0, %v2755_v59  ;;  %v31_v42 = vld [vmem:[%s4683_s0 + $0x80] sm:$0xff] }
  0x3b   :  { %870 = vmatpush.msrb.mxu1 %v460_v43  ;;  %849 = vmatpush.msrb.mxu0 %v531_v44  ;;  %v325_v43 = vld [vmem:[%s4683_s0 + $0x9b0] sm:$0xff]  ;;  %v468_v44 = vld [vmem:[%s4683_s0 + $0xe28] sm:$0xff] }
  0x3c   :  { %912 = vmatpush.msrb.mxu3 %v318_v45  ;;  %893 = vmatpush.msrb.mxu2 %v245_v47  ;;  %v539_v45 = vld [vmem:[%s4683_s0 + $0x1060] sm:$0xff]  ;;  %v396_v47 = vld [vmem:[%s4683_s0 + $0xbe8] sm:$0xff] }
  0x3d   :  { %871 = vmatpush.msrb.mxu1 %v388_v46  ;;  %850 = vmatpush.msrb.mxu0 %v459_v48  ;;  %v326_v46 = vld [vmem:[%s4683_s0 + $0x9b8] sm:$0xff]  ;;  %v253_v48 = vld [vmem:[%s4683_s0 + $0x770] sm:$0xff] }
  0x3e   :  { %913 = vmatpush.msrb.mxu3 %v246_v49  ;;  %894 = vmatpush.msrb.mxu2 %v173_v51  ;;  %v467_v49 = vld [vmem:[%s4683_s0 + $0xe20] sm:$0xff]  ;;  %v324_v51 = vld [vmem:[%s4683_s0 + $0x9a8] sm:$0xff] }
  0x3f   :  { %872 = vmatpush.msrb.mxu1 %v316_v50  ;;  %851 = vmatpush.msrb.mxu0 %v387_v52  ;;  %v254_v50 = vld [vmem:[%s4683_s0 + $0x778] sm:$0xff]  ;;  %v181_v52 = vld [vmem:[%s4683_s0 + $0x530] sm:$0xff] }
  0x40   :  { %914 = vmatpush.msrb.mxu3 %v174_v53  ;;  %895 = vmatpush.msrb.mxu2 %v101_v55  ;;  %v395_v53 = vld [vmem:[%s4683_s0 + $0xbe0] sm:$0xff]  ;;  %v252_v55 = vld [vmem:[%s4683_s0 + $0x768] sm:$0xff] }
  0x41   :  { %873 = vmatpush.msrb.mxu1 %v244_v54  ;;  %852 = vmatpush.msrb.mxu0 %v315_v56  ;;  %v182_v54 = vld [vmem:[%s4683_s0 + $0x538] sm:$0xff]  ;;  %v109_v56 = vld [vmem:[%s4683_s0 + $0x2f0] sm:$0xff] }
  0x42   :  { %915 = vmatpush.msrb.mxu3 %v102_v57  ;;  %896 = vmatpush.msrb.mxu2 %v29_v60  ;;  %v323_v57 = vld [vmem:[%s4683_s0 + $0x9a0] sm:$0xff]  ;;  %v180_v60 = vld [vmem:[%s4683_s0 + $0x528] sm:$0xff] }
  0x43   :  { %874 = vmatpush.msrb.mxu1 %v172_v58  ;;  %853 = vmatpush.msrb.mxu0 %v243_v61  ;;  %v110_v58 = vld [vmem:[%s4683_s0 + $0x2f8] sm:$0xff]  ;;  %v37_v61 = vld [vmem:[%s4683_s0 + $0xb0] sm:$0xff] }
  0x44   :  { %916 = vmatpush.msrb.mxu3 %v30_v62  ;;  %2344 = vmatmul.msk.f32.vlgmr.msra.gmra.mxu2 %vm597_vm0, %v2755_v59  ;;  %v251_v62 = vld [vmem:[%s4683_s0 + $0x760] sm:$0xff] }
  0x45   :  { %2345 = vmatmul.msk.f32.vlgmr.msra.gmra.mxu3 %vm597_vm0, %v2755_v59  ;;  %969 = vmatpush.msra.mxu2 %v537_v63  ;;  %v38_v63 = vld [vmem:[%s4683_s0 + $0xb8] sm:$0xff] }
  0x46   :  { %989 = vmatpush.msra.mxu3 %v538_v0  ;;  %854 = vmatpush.msrb.mxu0 %v171_v1  ;;  %v545_v0 = vld [vmem:[%s4683_s0 + $0x1090] sm:$0xff]  ;;  %v546_v1 = vld [vmem:[%s4683_s0 + $0x1098] sm:$0xff] }
  0x47   :  { %875 = vmatpush.msrb.mxu1 %v100_v2  ;;  %970 = vmatpush.msra.mxu2 %v465_v3  ;;  %v179_v2 = vld [vmem:[%s4683_s0 + $0x520] sm:$0xff]  ;;  %v108_v3 = vld [vmem:[%s4683_s0 + $0x2e8] sm:$0xff] }
  0x48   :  { %990 = vmatpush.msra.mxu3 %v466_v4  ;;  %855 = vmatpush.msrb.mxu0 %v99_v5  ;;  %v473_v4 = vld [vmem:[%s4683_s0 + $0xe50] sm:$0xff]  ;;  %v474_v5 = vld [vmem:[%s4683_s0 + $0xe58] sm:$0xff] }
  0x49   :  { %876 = vmatpush.msrb.mxu1 %v28_v6  ;;  %971 = vmatpush.msra.mxu2 %v393_v7  ;;  %v107_v6 = vld [vmem:[%s4683_s0 + $0x2e0] sm:$0xff]  ;;  %v36_v7 = vld [vmem:[%s4683_s0 + $0xa8] sm:$0xff] }
  0x4a   :  { %2343 = vmatmul.msk.f32.vlgmr.msra.gmra.mxu1 %vm597_vm0, %v2755_v59  ;;  %991 = vmatpush.msra.mxu3 %v394_v9  ;;  %v544_v9 = vld [vmem:[%s4683_s0 + $0x1088] sm:$0xff] }
  0x4b   :  { %949 = vmatpush.msra.mxu1 %v536_v8  ;;  %856 = vmatpush.msrb.mxu0 %v27_v10  ;;  %v401_v8 = vld [vmem:[%s4683_s0 + $0xc10] sm:$0xff]  ;;  %v402_v10 = vld [vmem:[%s4683_s0 + $0xc18] sm:$0xff] }
  0x4c   :  { %972 = vmatpush.msra.mxu2 %v321_v11  ;;  %2342 = vmatmul.msk.f32.vlgmr.msra.gmra.mxu0 %vm597_vm0, %v2755_v59  ;;  %v35_v11 = vld [vmem:[%s4683_s0 + $0xa0] sm:$0xff] }
  0x4d   :  { %950 = vmatpush.msra.mxu1 %v464_v12  ;;  %929 = vmatpush.msra.mxu0 %v535_v13  ;;  %v329_v12 = vld [vmem:[%s4683_s0 + $0x9d0] sm:$0xff]  ;;  %v472_v13 = vld [vmem:[%s4683_s0 + $0xe48] sm:$0xff] }
  0x4e   :  { %992 = vmatpush.msra.mxu3 %v322_v14  ;;  %973 = vmatpush.msra.mxu2 %v249_v16  ;;  %v543_v14 = vld [vmem:[%s4683_s0 + $0x1080] sm:$0xff]  ;;  %v400_v16 = vld [vmem:[%s4683_s0 + $0xc08] sm:$0xff] }
  0x4f   :  { %951 = vmatpush.msra.mxu1 %v392_v15  ;;  %930 = vmatpush.msra.mxu0 %v463_v17  ;;  %v330_v15 = vld [vmem:[%s4683_s0 + $0x9d8] sm:$0xff]  ;;  %v257_v17 = vld [vmem:[%s4683_s0 + $0x790] sm:$0xff] }
  0x50   :  { %993 = vmatpush.msra.mxu3 %v250_v18  ;;  %974 = vmatpush.msra.mxu2 %v177_v20  ;;  %v471_v18 = vld [vmem:[%s4683_s0 + $0xe40] sm:$0xff]  ;;  %v328_v20 = vld [vmem:[%s4683_s0 + $0x9c8] sm:$0xff] }
  0x51   :  { %952 = vmatpush.msra.mxu1 %v320_v19  ;;  %931 = vmatpush.msra.mxu0 %v391_v21  ;;  %v258_v19 = vld [vmem:[%s4683_s0 + $0x798] sm:$0xff]  ;;  %v185_v21 = vld [vmem:[%s4683_s0 + $0x550] sm:$0xff] }
  0x52   :  { %994 = vmatpush.msra.mxu3 %v178_v22  ;;  %975 = vmatpush.msra.mxu2 %v105_v24  ;;  %v399_v22 = vld [vmem:[%s4683_s0 + $0xc00] sm:$0xff]  ;;  %v256_v24 = vld [vmem:[%s4683_s0 + $0x788] sm:$0xff] }
  0x53   :  { %953 = vmatpush.msra.mxu1 %v248_v23  ;;  %932 = vmatpush.msra.mxu0 %v319_v25  ;;  %v186_v23 = vld [vmem:[%s4683_s0 + $0x558] sm:$0xff]  ;;  %v113_v25 = vld [vmem:[%s4683_s0 + $0x310] sm:$0xff] }
  0x54   :  { %995 = vmatpush.msra.mxu3 %v106_v26  ;;  %976 = vmatpush.msra.mxu2 %v33_v28  ;;  %v327_v26 = vld [vmem:[%s4683_s0 + $0x9c0] sm:$0xff]  ;;  %v184_v28 = vld [vmem:[%s4683_s0 + $0x548] sm:$0xff] }
  0x55   :  { %954 = vmatpush.msra.mxu1 %v176_v27  ;;  %933 = vmatpush.msra.mxu0 %v247_v29  ;;  %v114_v27 = vld [vmem:[%s4683_s0 + $0x318] sm:$0xff]  ;;  %v41_v29 = vld [vmem:[%s4683_s0 + $0xd0] sm:$0xff] }
  0x56   :  { %996 = vmatpush.msra.mxu3 %v34_v30  ;;  %2348 = vmatmul.msk.f32.vlgmr.msrb.gmra.mxu2 %vm597_vm0, %v2755_v59  ;;  %v255_v30 = vld [vmem:[%s4683_s0 + $0x780] sm:$0xff] }
  0x57   :  { %2349 = vmatmul.msk.f32.vlgmr.msrb.gmra.mxu3 %vm597_vm0, %v2755_v59  ;;  %1049 = vmatpush.msrb.mxu2 %v541_v31  ;;  %v42_v31 = vld [vmem:[%s4683_s0 + $0xd8] sm:$0xff] }
  0x58   :  { %1069 = vmatpush.msrb.mxu3 %v542_v32  ;;  %934 = vmatpush.msra.mxu0 %v175_v33  ;;  %v549_v32 = vld [vmem:[%s4683_s0 + $0x10b0] sm:$0xff]  ;;  %v550_v33 = vld [vmem:[%s4683_s0 + $0x10b8] sm:$0xff] }
  0x59   :  { %955 = vmatpush.msra.mxu1 %v104_v34  ;;  %1050 = vmatpush.msrb.mxu2 %v469_v35  ;;  %v183_v34 = vld [vmem:[%s4683_s0 + $0x540] sm:$0xff]  ;;  %v112_v35 = vld [vmem:[%s4683_s0 + $0x308] sm:$0xff] }
  0x5a   :  { %1070 = vmatpush.msrb.mxu3 %v470_v36  ;;  %935 = vmatpush.msra.mxu0 %v103_v37  ;;  %v477_v36 = vld [vmem:[%s4683_s0 + $0xe70] sm:$0xff]  ;;  %v478_v37 = vld [vmem:[%s4683_s0 + $0xe78] sm:$0xff] }
  0x5b   :  { %956 = vmatpush.msra.mxu1 %v32_v38  ;;  %1051 = vmatpush.msrb.mxu2 %v397_v39  ;;  %v111_v38 = vld [vmem:[%s4683_s0 + $0x300] sm:$0xff]  ;;  %v40_v39 = vld [vmem:[%s4683_s0 + $0xc8] sm:$0xff] }
  0x5c   :  { %2347 = vmatmul.msk.f32.vlgmr.msrb.gmra.mxu1 %vm597_vm0, %v2755_v59  ;;  %1071 = vmatpush.msrb.mxu3 %v398_v41  ;;  %v548_v41 = vld [vmem:[%s4683_s0 + $0x10a8] sm:$0xff] }
  0x5d   :  { %1029 = vmatpush.msrb.mxu1 %v540_v40  ;;  %936 = vmatpush.msra.mxu0 %v31_v42  ;;  %v405_v40 = vld [vmem:[%s4683_s0 + $0xc30] sm:$0xff]  ;;  %v406_v42 = vld [vmem:[%s4683_s0 + $0xc38] sm:$0xff] }
  0x5e   :  { %1052 = vmatpush.msrb.mxu2 %v325_v43  ;;  %2346 = vmatmul.msk.f32.vlgmr.msrb.gmra.mxu0 %vm597_vm0, %v2755_v59  ;;  %v39_v43 = vld [vmem:[%s4683_s0 + $0xc0] sm:$0xff] }
  0x5f   :  { %1030 = vmatpush.msrb.mxu1 %v468_v44  ;;  %1009 = vmatpush.msrb.mxu0 %v539_v45  ;;  %v333_v44 = vld [vmem:[%s4683_s0 + $0x9f0] sm:$0xff]  ;;  %v476_v45 = vld [vmem:[%s4683_s0 + $0xe68] sm:$0xff] }
  0x60   :  { %1072 = vmatpush.msrb.mxu3 %v326_v46  ;;  %1053 = vmatpush.msrb.mxu2 %v253_v48  ;;  %v547_v46 = vld [vmem:[%s4683_s0 + $0x10a0] sm:$0xff]  ;;  %v404_v48 = vld [vmem:[%s4683_s0 + $0xc28] sm:$0xff] }
  0x61   :  { %1031 = vmatpush.msrb.mxu1 %v396_v47  ;;  %1010 = vmatpush.msrb.mxu0 %v467_v49  ;;  %v334_v47 = vld [vmem:[%s4683_s0 + $0x9f8] sm:$0xff]  ;;  %v261_v49 = vld [vmem:[%s4683_s0 + $0x7b0] sm:$0xff] }
  0x62   :  { %1073 = vmatpush.msrb.mxu3 %v254_v50  ;;  %1054 = vmatpush.msrb.mxu2 %v181_v52  ;;  %v475_v50 = vld [vmem:[%s4683_s0 + $0xe60] sm:$0xff]  ;;  %v332_v52 = vld [vmem:[%s4683_s0 + $0x9e8] sm:$0xff] }
  0x63   :  { %1032 = vmatpush.msrb.mxu1 %v324_v51  ;;  %1011 = vmatpush.msrb.mxu0 %v395_v53  ;;  %v262_v51 = vld [vmem:[%s4683_s0 + $0x7b8] sm:$0xff]  ;;  %v189_v53 = vld [vmem:[%s4683_s0 + $0x570] sm:$0xff] }
  0x64   :  { %1074 = vmatpush.msrb.mxu3 %v182_v54  ;;  %1055 = vmatpush.msrb.mxu2 %v109_v56  ;;  %v403_v54 = vld [vmem:[%s4683_s0 + $0xc20] sm:$0xff]  ;;  %v260_v56 = vld [vmem:[%s4683_s0 + $0x7a8] sm:$0xff] }
  0x65   :  { %1033 = vmatpush.msrb.mxu1 %v252_v55  ;;  %1012 = vmatpush.msrb.mxu0 %v323_v57  ;;  %v190_v55 = vld [vmem:[%s4683_s0 + $0x578] sm:$0xff]  ;;  %v117_v57 = vld [vmem:[%s4683_s0 + $0x330] sm:$0xff] }
  0x66   :  { %1075 = vmatpush.msrb.mxu3 %v110_v58  ;;  %1056 = vmatpush.msrb.mxu2 %v37_v61  ;;  %v331_v58 = vld [vmem:[%s4683_s0 + $0x9e0] sm:$0xff]  ;;  %v188_v61 = vld [vmem:[%s4683_s0 + $0x568] sm:$0xff] }
  0x67   :  { %1034 = vmatpush.msrb.mxu1 %v180_v60  ;;  %1013 = vmatpush.msrb.mxu0 %v251_v62  ;;  %v118_v60 = vld [vmem:[%s4683_s0 + $0x338] sm:$0xff]  ;;  %v45_v62 = vld [vmem:[%s4683_s0 + $0xf0] sm:$0xff] }
  0x68   :  { %1076 = vmatpush.msrb.mxu3 %v38_v63  ;;  %2352 = vmatmul.msk.f32.vlgmr.msra.gmra.mxu2 %vm597_vm0, %v2755_v59  ;;  %v259_v63 = vld [vmem:[%s4683_s0 + $0x7a0] sm:$0xff] }
  0x69   :  { %2353 = vmatmul.msk.f32.vlgmr.msra.gmra.mxu3 %vm597_vm0, %v2755_v59  ;;  %1129 = vmatpush.msra.mxu2 %v545_v0  ;;  %v46_v0 = vld [vmem:[%s4683_s0 + $0xf8] sm:$0xff] }
  0x6a   :  { %1149 = vmatpush.msra.mxu3 %v546_v1  ;;  %1014 = vmatpush.msrb.mxu0 %v179_v2  ;;  %v553_v1 = vld [vmem:[%s4683_s0 + $0x10d0] sm:$0xff]  ;;  %v554_v2 = vld [vmem:[%s4683_s0 + $0x10d8] sm:$0xff] }
  0x6b   :  { %1035 = vmatpush.msrb.mxu1 %v108_v3  ;;  %1130 = vmatpush.msra.mxu2 %v473_v4  ;;  %v187_v3 = vld [vmem:[%s4683_s0 + $0x560] sm:$0xff]  ;;  %v116_v4 = vld [vmem:[%s4683_s0 + $0x328] sm:$0xff] }
  0x6c   :  { %1150 = vmatpush.msra.mxu3 %v474_v5  ;;  %1015 = vmatpush.msrb.mxu0 %v107_v6  ;;  %v481_v5 = vld [vmem:[%s4683_s0 + $0xe90] sm:$0xff]  ;;  %v482_v6 = vld [vmem:[%s4683_s0 + $0xe98] sm:$0xff] }
  0x6d   :  { %1036 = vmatpush.msrb.mxu1 %v36_v7  ;;  %1131 = vmatpush.msra.mxu2 %v401_v8  ;;  %v115_v7 = vld [vmem:[%s4683_s0 + $0x320] sm:$0xff]  ;;  %v44_v8 = vld [vmem:[%s4683_s0 + $0xe8] sm:$0xff] }
  0x6e   :  { %2351 = vmatmul.msk.f32.vlgmr.msra.gmra.mxu1 %vm597_vm0, %v2755_v59  ;;  %1151 = vmatpush.msra.mxu3 %v402_v10  ;;  %v552_v10 = vld [vmem:[%s4683_s0 + $0x10c8] sm:$0xff] }
  0x6f   :  { %1109 = vmatpush.msra.mxu1 %v544_v9  ;;  %1016 = vmatpush.msrb.mxu0 %v35_v11  ;;  %v409_v9 = vld [vmem:[%s4683_s0 + $0xc50] sm:$0xff]  ;;  %v410_v11 = vld [vmem:[%s4683_s0 + $0xc58] sm:$0xff] }
  0x70   :  { %1132 = vmatpush.msra.mxu2 %v329_v12  ;;  %2350 = vmatmul.msk.f32.vlgmr.msra.gmra.mxu0 %vm597_vm0, %v2755_v59  ;;  %v43_v12 = vld [vmem:[%s4683_s0 + $0xe0] sm:$0xff] }
  0x71   :  { %1110 = vmatpush.msra.mxu1 %v472_v13  ;;  %1089 = vmatpush.msra.mxu0 %v543_v14  ;;  %v337_v13 = vld [vmem:[%s4683_s0 + $0xa10] sm:$0xff]  ;;  %v480_v14 = vld [vmem:[%s4683_s0 + $0xe88] sm:$0xff] }
  0x72   :  { %1152 = vmatpush.msra.mxu3 %v330_v15  ;;  %1133 = vmatpush.msra.mxu2 %v257_v17  ;;  %v551_v15 = vld [vmem:[%s4683_s0 + $0x10c0] sm:$0xff]  ;;  %v408_v17 = vld [vmem:[%s4683_s0 + $0xc48] sm:$0xff] }
  0x73   :  { %1111 = vmatpush.msra.mxu1 %v400_v16  ;;  %1090 = vmatpush.msra.mxu0 %v471_v18  ;;  %v338_v16 = vld [vmem:[%s4683_s0 + $0xa18] sm:$0xff]  ;;  %v265_v18 = vld [vmem:[%s4683_s0 + $0x7d0] sm:$0xff] }
  0x74   :  { %1153 = vmatpush.msra.mxu3 %v258_v19  ;;  %1134 = vmatpush.msra.mxu2 %v185_v21  ;;  %v479_v19 = vld [vmem:[%s4683_s0 + $0xe80] sm:$0xff]  ;;  %v336_v21 = vld [vmem:[%s4683_s0 + $0xa08] sm:$0xff] }
  0x75   :  { %1112 = vmatpush.msra.mxu1 %v328_v20  ;;  %1091 = vmatpush.msra.mxu0 %v399_v22  ;;  %v266_v20 = vld [vmem:[%s4683_s0 + $0x7d8] sm:$0xff]  ;;  %v193_v22 = vld [vmem:[%s4683_s0 + $0x590] sm:$0xff] }
  0x76   :  { %1154 = vmatpush.msra.mxu3 %v186_v23  ;;  %1135 = vmatpush.msra.mxu2 %v113_v25  ;;  %v407_v23 = vld [vmem:[%s4683_s0 + $0xc40] sm:$0xff]  ;;  %v264_v25 = vld [vmem:[%s4683_s0 + $0x7c8] sm:$0xff] }
  0x77   :  { %1113 = vmatpush.msra.mxu1 %v256_v24  ;;  %1092 = vmatpush.msra.mxu0 %v327_v26  ;;  %v194_v24 = vld [vmem:[%s4683_s0 + $0x598] sm:$0xff]  ;;  %v121_v26 = vld [vmem:[%s4683_s0 + $0x350] sm:$0xff] }
  0x78   :  { %1155 = vmatpush.msra.mxu3 %v114_v27  ;;  %1136 = vmatpush.msra.mxu2 %v41_v29  ;;  %v335_v27 = vld [vmem:[%s4683_s0 + $0xa00] sm:$0xff]  ;;  %v192_v29 = vld [vmem:[%s4683_s0 + $0x588] sm:$0xff] }
  0x79   :  { %1114 = vmatpush.msra.mxu1 %v184_v28  ;;  %1093 = vmatpush.msra.mxu0 %v255_v30  ;;  %v122_v28 = vld [vmem:[%s4683_s0 + $0x358] sm:$0xff]  ;;  %v49_v30 = vld [vmem:[%s4683_s0 + $0x110] sm:$0xff] }
  0x7a   :  { %1156 = vmatpush.msra.mxu3 %v42_v31  ;;  %2356 = vmatmul.msk.f32.vlgmr.msrb.gmra.mxu2 %vm597_vm0, %v2755_v59  ;;  %v263_v31 = vld [vmem:[%s4683_s0 + $0x7c0] sm:$0xff] }
  0x7b   :  { %2357 = vmatmul.msk.f32.vlgmr.msrb.gmra.mxu3 %vm597_vm0, %v2755_v59  ;;  %1209 = vmatpush.msrb.mxu2 %v549_v32  ;;  %v50_v32 = vld [vmem:[%s4683_s0 + $0x118] sm:$0xff] }
  0x7c   :  { %1229 = vmatpush.msrb.mxu3 %v550_v33  ;;  %1094 = vmatpush.msra.mxu0 %v183_v34  ;;  %v557_v33 = vld [vmem:[%s4683_s0 + $0x10f0] sm:$0xff]  ;;  %v558_v34 = vld [vmem:[%s4683_s0 + $0x10f8] sm:$0xff] }
  0x7d   :  { %1115 = vmatpush.msra.mxu1 %v112_v35  ;;  %1210 = vmatpush.msrb.mxu2 %v477_v36  ;;  %v191_v35 = vld [vmem:[%s4683_s0 + $0x580] sm:$0xff]  ;;  %v120_v36 = vld [vmem:[%s4683_s0 + $0x348] sm:$0xff] }
  0x7e   :  { %1230 = vmatpush.msrb.mxu3 %v478_v37  ;;  %1095 = vmatpush.msra.mxu0 %v111_v38  ;;  %v485_v37 = vld [vmem:[%s4683_s0 + $0xeb0] sm:$0xff]  ;;  %v486_v38 = vld [vmem:[%s4683_s0 + $0xeb8] sm:$0xff] }
  0x7f   :  { %1116 = vmatpush.msra.mxu1 %v40_v39  ;;  %1211 = vmatpush.msrb.mxu2 %v405_v40  ;;  %v119_v39 = vld [vmem:[%s4683_s0 + $0x340] sm:$0xff]  ;;  %v48_v40 = vld [vmem:[%s4683_s0 + $0x108] sm:$0xff] }
  0x80   :  { %2355 = vmatmul.msk.f32.vlgmr.msrb.gmra.mxu1 %vm597_vm0, %v2755_v59  ;;  %1231 = vmatpush.msrb.mxu3 %v406_v42  ;;  %v556_v42 = vld [vmem:[%s4683_s0 + $0x10e8] sm:$0xff] }
  0x81   :  { %1189 = vmatpush.msrb.mxu1 %v548_v41  ;;  %1096 = vmatpush.msra.mxu0 %v39_v43  ;;  %v413_v41 = vld [vmem:[%s4683_s0 + $0xc70] sm:$0xff]  ;;  %v414_v43 = vld [vmem:[%s4683_s0 + $0xc78] sm:$0xff] }
  0x82   :  { %1212 = vmatpush.msrb.mxu2 %v333_v44  ;;  %2354 = vmatmul.msk.f32.vlgmr.msrb.gmra.mxu0 %vm597_vm0, %v2755_v59  ;;  %v47_v44 = vld [vmem:[%s4683_s0 + $0x100] sm:$0xff] }
  0x83   :  { %1190 = vmatpush.msrb.mxu1 %v476_v45  ;;  %1169 = vmatpush.msrb.mxu0 %v547_v46  ;;  %v341_v45 = vld [vmem:[%s4683_s0 + $0xa30] sm:$0xff]  ;;  %v484_v46 = vld [vmem:[%s4683_s0 + $0xea8] sm:$0xff] }
  0x84   :  { %1232 = vmatpush.msrb.mxu3 %v334_v47  ;;  %1213 = vmatpush.msrb.mxu2 %v261_v49  ;;  %v342_v49 = vld [vmem:[%s4683_s0 + $0xa38] sm:$0xff] }
  0x85   :  { %1191 = vmatpush.msrb.mxu1 %v404_v48  ;;  %1170 = vmatpush.msrb.mxu0 %v475_v50  ;;  %v555_v48 = vld [vmem:[%s4683_s0 + $0x10e0] sm:$0xff] }
  0x86   :  { %1233 = vmatpush.msrb.mxu3 %v262_v51  ;;  %1214 = vmatpush.msrb.mxu2 %v189_v53 }
  0x87   :  { %1192 = vmatpush.msrb.mxu1 %v332_v52  ;;  %1171 = vmatpush.msrb.mxu0 %v403_v54  ;;  %v269_v52 = vld [vmem:[%s4683_s0 + $0x7f0] sm:$0xff]  ;;  %v3551_v54 = vld [vmem:[%s4684_s1] sm:$0x7] }
  0x88   :  { %1234 = vmatpush.msrb.mxu3 %v190_v55  ;;  %1215 = vmatpush.msrb.mxu2 %v117_v57  ;;  %v483_v55 = vld [vmem:[%s4683_s0 + $0xea0] sm:$0xff] }
  0x89   :  { %1193 = vmatpush.msrb.mxu1 %v260_v56  ;;  %1172 = vmatpush.msrb.mxu0 %v331_v58  ;;  %v270_v56 = vld [vmem:[%s4683_s0 + $0x7f8] sm:$0xff]  ;;  %v340_v58 = vld [vmem:[%s4683_s0 + $0xa28] sm:$0xff] }
  0x8a   :  { %1235 = vmatpush.msrb.mxu3 %v118_v60  ;;  %1216 = vmatpush.msrb.mxu2 %v45_v62  ;;  %v197_v60 = vld [vmem:[%s4683_s0 + $0x5b0] sm:$0xff] }
  0x8b   :  { %1194 = vmatpush.msrb.mxu1 %v188_v61  ;;  %1173 = vmatpush.msrb.mxu0 %v259_v63 }
  0x8c   :  { %1236 = vmatpush.msrb.mxu3 %v46_v0  ;;  %2360 = vmatmul.msk.f32.vlgmr.msra.gmra.mxu2 %vm597_vm0, %v2755_v59  ;;  %v411_v0 = vld [vmem:[%s4683_s0 + $0xc60] sm:$0xff] }
  0x8d   :  { %2361 = vmatmul.msk.f32.vlgmr.msra.gmra.mxu3 %vm597_vm0, %v2755_v59  ;;  %1289 = vmatpush.msra.mxu2 %v553_v1  ;;  %v198_v1 = vld [vmem:[%s4683_s0 + $0x5b8] sm:$0xff] }
  0x8e   :  { %1309 = vmatpush.msra.mxu3 %v554_v2  ;;  %1174 = vmatpush.msrb.mxu0 %v187_v3  ;;  %v268_v3 = vld [vmem:[%s4683_s0 + $0x7e8] sm:$0xff] }
  0x8f   :  { %1195 = vmatpush.msrb.mxu1 %v116_v4  ;;  %1290 = vmatpush.msra.mxu2 %v481_v5  ;;  %v125_v4 = vld [vmem:[%s4683_s0 + $0x370] sm:$0xff]  ;;  %v339_v5 = vld [vmem:[%s4683_s0 + $0xa20] sm:$0xff] }
  0x90   :  { %1310 = vmatpush.msra.mxu3 %v482_v6  ;;  %1175 = vmatpush.msrb.mxu0 %v115_v7  ;;  %v126_v6 = vld [vmem:[%s4683_s0 + $0x378] sm:$0xff]  ;;  %v196_v7 = vld [vmem:[%s4683_s0 + $0x5a8] sm:$0xff] }
  0x91   :  { %1196 = vmatpush.msrb.mxu1 %v44_v8  ;;  %1291 = vmatpush.msra.mxu2 %v409_v9  ;;  %v53_v8 = vld [vmem:[%s4683_s0 + $0x130] sm:$0xff]  ;;  %v267_v9 = vld [vmem:[%s4683_s0 + $0x7e0] sm:$0xff] }
  0x92   :  { %2359 = vmatmul.msk.f32.vlgmr.msra.gmra.mxu1 %vm597_vm0, %v2755_v59  ;;  %1311 = vmatpush.msra.mxu3 %v410_v11  ;;  %v561_v11 = vld [vmem:[%s4683_s0 + $0x1110] sm:$0xff] }
  0x93   :  { %1269 = vmatpush.msra.mxu1 %v552_v10  ;;  %1176 = vmatpush.msrb.mxu0 %v43_v12  ;;  %v54_v10 = vld [vmem:[%s4683_s0 + $0x138] sm:$0xff] }
  0x94   :  { %1292 = vmatpush.msra.mxu2 %v337_v13  ;;  %2358 = vmatmul.msk.f32.vlgmr.msra.gmra.mxu0 %vm597_vm0, %v2755_v59  ;;  %v562_v12 = vld [vmem:[%s4683_s0 + $0x1118] sm:$0xff] }
  0x95   :  { %1270 = vmatpush.msra.mxu1 %v480_v14  ;;  %1249 = vmatpush.msra.mxu0 %v551_v15  ;;  %v195_v14 = vld [vmem:[%s4683_s0 + $0x5a0] sm:$0xff]  ;;  %v124_v15 = vld [vmem:[%s4683_s0 + $0x368] sm:$0xff] }
  0x96   :  { %1312 = vmatpush.msra.mxu3 %v338_v16  ;;  %1293 = vmatpush.msra.mxu2 %v265_v18  ;;  %v490_v18 = vld [vmem:[%s4683_s0 + $0xed8] sm:$0xff] }
  0x97   :  { %1271 = vmatpush.msra.mxu1 %v408_v17  ;;  %1250 = vmatpush.msra.mxu0 %v479_v19  ;;  %v489_v17 = vld [vmem:[%s4683_s0 + $0xed0] sm:$0xff] }
  0x98   :  { %1313 = vmatpush.msra.mxu3 %v266_v20  ;;  %1294 = vmatpush.msra.mxu2 %v193_v22  ;;  %v52_v22 = vld [vmem:[%s4683_s0 + $0x128] sm:$0xff] }
  0x99   :  { %1272 = vmatpush.msra.mxu1 %v336_v21  ;;  %1251 = vmatpush.msra.mxu0 %v407_v23  ;;  %v123_v21 = vld [vmem:[%s4683_s0 + $0x360] sm:$0xff] }
  0x9a   :  { %1314 = vmatpush.msra.mxu3 %v194_v24  ;;  %1295 = vmatpush.msra.mxu2 %v121_v26 }
  0x9b   :  { %1273 = vmatpush.msra.mxu1 %v264_v25  ;;  %1252 = vmatpush.msra.mxu0 %v335_v27  ;;  %v417_v25 = vld [vmem:[%s4683_s0 + $0xc90] sm:$0xff]  ;;  %v560_v27 = vld [vmem:[%s4683_s0 + $0x1108] sm:$0xff] }
  0x9c   :  { %1315 = vmatpush.msra.mxu3 %v122_v28  ;;  %1296 = vmatpush.msra.mxu2 %v49_v30  ;;  %v418_v28 = vld [vmem:[%s4683_s0 + $0xc98] sm:$0xff]  ;;  %v51_v30 = vld [vmem:[%s4683_s0 + $0x120] sm:$0xff] }
  0x9d   :  { %1274 = vmatpush.msra.mxu1 %v192_v29  ;;  %1253 = vmatpush.msra.mxu0 %v263_v31  ;;  %v345_v31 = vld [vmem:[%s4683_s0 + $0xa50] sm:$0xff] }
  0x9e   :  { %1316 = vmatpush.msra.mxu3 %v50_v32  ;;  %2364 = vmatmul.msk.f32.vlgmr.msrb.gmra.mxu2 %vm597_vm0, %v2755_v59 }
  0x9f   :  { %2365 = vmatmul.msk.f32.vlgmr.msrb.gmra.mxu3 %vm597_vm0, %v2755_v59  ;;  %1369 = vmatpush.msrb.mxu2 %v557_v33 }
  0xa0   :  { %1389 = vmatpush.msrb.mxu3 %v558_v34  ;;  %1254 = vmatpush.msra.mxu0 %v191_v35  ;;  %v658_v53 = vpop.f32.mrf.mxu2  ;;  %v488_v34 = vld [vmem:[%s4683_s0 + $0xec8] sm:$0xff] }
  0xa1   :  { %1275 = vmatpush.msra.mxu1 %v120_v36  ;;  %1370 = vmatpush.msrb.mxu2 %v485_v37 }
  0xa2   :  { %1390 = vmatpush.msrb.mxu3 %v486_v38  ;;  %1255 = vmatpush.msra.mxu0 %v119_v39  ;;  %v638_v47 = vpop.f32.mrf.mxu1  ;;  %v678_v50 = vpop.f32.mrf.mxu3  ;;  %v559_v38 = vld [vmem:[%s4683_s0 + $0x1100] sm:$0xff]  ;;  %v346_v39 = vld [vmem:[%s4683_s0 + $0xa58] sm:$0xff] }
  0xa3   :  { %1276 = vmatpush.msra.mxu1 %v48_v40  ;;  %1371 = vmatpush.msrb.mxu2 %v413_v41  ;;  %v618_v51 = vpop.f32.mrf.mxu0  ;;  %v416_v41 = vld [vmem:[%s4683_s0 + $0xc88] sm:$0xff] }
  0xa4   :  { %2363 = vmatmul.msk.f32.vlgmr.msrb.gmra.mxu1 %vm597_vm0, %v2755_v59  ;;  %1391 = vmatpush.msrb.mxu3 %v414_v43  ;;  %v412_v59 = vld [vmem:[%s4683_s0 + $0xc68] sm:$0xff] }
  0xa5   :  { %1349 = vmatpush.msrb.mxu1 %v556_v42  ;;  %1256 = vmatpush.msra.mxu0 %v47_v44  ;;  %v273_v42 = vld [vmem:[%s4683_s0 + $0x810] sm:$0xff]  ;;  %v487_v44 = vld [vmem:[%s4683_s0 + $0xec0] sm:$0xff] }
  0xa6   :  { %1372 = vmatpush.msrb.mxu2 %v341_v45  ;;  %2362 = vmatmul.msk.f32.vlgmr.msrb.gmra.mxu0 %vm597_vm0, %v3551_v54  ;;  %v274_v45 = vld [vmem:[%s4683_s0 + $0x818] sm:$0xff] }
  0xa7   :  { %1350 = vmatpush.msrb.mxu1 %v484_v46  ;;  %v3561_v57 = vpop.permute.xlu0 %594  ;;  %1329 = vmatpush.msrb.mxu0 %v555_v48  ;;  %v201_v48 = vld [vmem:[%s4683_s0 + $0x5d0] sm:$0xff] }
  0xa8   :  { %1392 = vmatpush.msrb.mxu3 %v342_v49  ;;  %v639_v61 = vadd.f32 %v638_v47, %v3561_v57  ;;  %v679_v62 = vadd.f32 %v678_v50, %v3561_v57  ;;  %v619_v63 = vadd.f32 %v618_v51, %v3561_v57  ;;  %1373 = vmatpush.msrb.mxu2 %v269_v52  ;;  %v344_v47 = vld [vmem:[%s4683_s0 + $0xa48] sm:$0xff]  ;;  %v415_v49 = vld [vmem:[%s4683_s0 + $0xc80] sm:$0xff]  ;;  %v202_v50 = vld [vmem:[%s4683_s0 + $0x5d8] sm:$0xff] }
  0xa9   :  { %1351 = vmatpush.msrb.mxu1 %v412_v59  ;;  %v659_v2 = vadd.f32 %v658_v53, %v3561_v57  ;;  %1330 = vmatpush.msrb.mxu0 %v483_v55  ;;  %v272_v51 = vld [vmem:[%s4683_s0 + $0x808] sm:$0xff]  ;;  %v129_v59 = vld [vmem:[%s4683_s0 + $0x390] sm:$0xff]  ;;  %v343_v52 = vld [vmem:[%s4683_s0 + $0xa40] sm:$0xff] }
  0xaa   :  { %1393 = vmatpush.msrb.mxu3 %v270_v56  ;;  %2408 = vtanh.f32 %v639_v61  ;;  %1374 = vmatpush.msrb.mxu2 %v197_v60  ;;  %v130_v53 = vld [vmem:[%s4683_s0 + $0x398] sm:$0xff]  ;;  %v200_v56 = vld [vmem:[%s4683_s0 + $0x5c8] sm:$0xff]  ;;  %v271_v61 = vld [vmem:[%s4683_s0 + $0x800] sm:$0xff] }
  0xab   :  { %1352 = vmatpush.msrb.mxu1 %v340_v58  ;;  %2410 = vtanh.f32 %v679_v62  ;;  %1331 = vmatpush.msrb.mxu0 %v411_v0  ;;  %v57_v58 = vld [vmem:[%s4683_s0 + $0x150] sm:$0xff]  ;;  %v58_v62 = vld [vmem:[%s4683_s0 + $0x158] sm:$0xff] }
  0xac   :  { %1394 = vmatpush.msrb.mxu3 %v198_v1  ;;  %2412 = vtanh.f32 %v619_v63  ;;  %1375 = vmatpush.msrb.mxu2 %v125_v4  ;;  %v566_v4 = vld [vmem:[%s4683_s0 + $0x1138] sm:$0xff] }
  0xad   :  { %1353 = vmatpush.msrb.mxu1 %v268_v3  ;;  %2414 = vtanh.f32 %v659_v2  ;;  %1332 = vmatpush.msrb.mxu0 %v339_v5  ;;  %v565_v3 = vld [vmem:[%s4683_s0 + $0x1130] sm:$0xff]  ;;  %v199_v5 = vld [vmem:[%s4683_s0 + $0x5c0] sm:$0xff] }
  0xae   :  { %1395 = vmatpush.msrb.mxu3 %v126_v6  ;;  %1376 = vmatpush.msrb.mxu2 %v53_v8  ;;  %v128_v6 = vld [vmem:[%s4683_s0 + $0x388] sm:$0xff] }
  0xaf   :  { %1354 = vmatpush.msrb.mxu1 %v196_v7  ;;  %1333 = vmatpush.msrb.mxu0 %v267_v9  ;;  %v493_v9 = vld [vmem:[%s4683_s0 + $0xef0] sm:$0xff] }
  0xb0   :  { %v2409_v13 = vpop.eup %2408  ;;  %1396 = vmatpush.msrb.mxu3 %v54_v10  ;;  %2368 = vmatmul.msk.f32.vlgmr.msra.gmra.mxu2 %vm597_vm0, %v3551_v54  ;;  %v494_v10 = vld [vmem:[%s4683_s0 + $0xef8] sm:$0xff] }
  0xb1   :  { %v2411_v16 = vpop.eup %2410  ;;  %2369 = vmatmul.msk.f32.vlgmr.msra.gmra.mxu3 %vm597_vm0, %v3551_v54  ;;  %v2185_v19 = vrot.slane %v2409_v13, 4  ;;  %1449 = vmatpush.msra.mxu2 %v561_v11  ;;  %v127_v11 = vld [vmem:[%s4683_s0 + $0x380] sm:$0xff]  ;;  %v421_v13 = vld [vmem:[%s4683_s0 + $0xcb0] sm:$0xff] }
  0xb2   :  { %v2413_v20 = vpop.eup %2412  ;;  %1469 = vmatpush.msra.mxu3 %v562_v12  ;;  %v2186_v23 = vrot.slane %v2411_v16, 4  ;;  %1334 = vmatpush.msrb.mxu0 %v195_v14  ;;  %v56_v12 = vld [vmem:[%s4683_s0 + $0x148] sm:$0xff]  ;;  %v55_v16 = vld [vmem:[%s4683_s0 + $0x140] sm:$0xff] }
  0xb3   :  { %v2415_v24 = vpop.eup %2414  ;;  %1355 = vmatpush.msrb.mxu1 %v124_v15  ;;  %v2222_v26 = vsel %vm2221_vm1, %v2413_v20, %v2185_v19  ;;  %1450 = vmatpush.msra.mxu2 %v489_v17  ;;  %v564_v14 = vld [vmem:[%s4683_s0 + $0x1128] sm:$0xff]  ;;  %v422_v15 = vld [vmem:[%s4683_s0 + $0xcb8] sm:$0xff]  ;;  %v349_v17 = vld [vmem:[%s4683_s0 + $0xa70] sm:$0xff] }
  0xb4   :  { %1470 = vmatpush.msra.mxu3 %v490_v18  ;;  %2294 = vst [vmem:[%s4686_s3] sm:$0x77] %v2222_v26  ;;  %v2223_v29 = vsel %vm2221_vm1, %v2415_v24, %v2186_v23  ;;  %1335 = vmatpush.msrb.mxu0 %v123_v21  ;;  %v738_v37 = vpop.f32.mrf.mxu2  ;;  %v492_v19 = vld [vmem:[%s4683_s0 + $0xee8] sm:$0xff]  ;;  %v563_v23 = vld [vmem:[%s4683_s0 + $0x1120] sm:$0xff]  ;;  %v350_v24 = vld [vmem:[%s4683_s0 + $0xa78] sm:$0xff] }
  0xb5   :  { %1356 = vmatpush.msrb.mxu1 %v52_v22  ;;  %2295 = vst [vmem:[%s4686_s3 + $0x8] sm:$0x77] %v2223_v29  ;;  %v718_v32 = vpop.f32.mrf.mxu1  ;;  %v758_v33 = vpop.f32.mrf.mxu3  ;;  %1451 = vmatpush.msra.mxu2 %v417_v25  ;;  %v739_v40 = vadd.f32 %v738_v37, %v3561_v57  ;;  %v276_v37 = vld [vmem:[%s4683_s0 + $0x828] sm:$0xff] }
  0xb6   :  { %2367 = vmatmul.msk.f32.vlgmr.msra.gmra.mxu1 %vm597_vm0, %v3551_v54  ;;  %v719_v35 = vadd.f32 %v718_v32, %v3561_v57  ;;  %v759_v36 = vadd.f32 %v758_v33, %v3561_v57  ;;  %1471 = vmatpush.msra.mxu3 %v418_v28  ;;  %v277_v28 = vld [vmem:[%s4683_s0 + $0x830] sm:$0xff]  ;;  %v348_v33 = vld [vmem:[%s4683_s0 + $0xa68] sm:$0xff] }
  0xb7   :  { %1429 = vmatpush.msra.mxu1 %v560_v27  ;;  %1336 = vmatpush.msrb.mxu0 %v51_v30  ;;  %v698_v43 = vpop.f32.mrf.mxu0  ;;  %v420_v27 = vld [vmem:[%s4683_s0 + $0xca8] sm:$0xff]  ;;  %v491_v30 = vld [vmem:[%s4683_s0 + $0xee0] sm:$0xff] }
  0xb8   :  { %1452 = vmatpush.msra.mxu2 %v345_v31  ;;  %2416 = vtanh.f32 %v719_v35  ;;  %2366 = vmatmul.msk.f32.vlgmr.msra.gmra.mxu0 %vm597_vm0, %v3551_v54  ;;  %v699_v46 = vadd.f32 %v698_v43, %v3561_v57  ;;  %v278_v31 = vld [vmem:[%s4683_s0 + $0x838] sm:$0xff]  ;;  %v419_v35 = vld [vmem:[%s4683_s0 + $0xca0] sm:$0xff]  ;;  %v61_v43 = vld [vmem:[%s4683_s0 + $0x170] sm:$0xff] }
  0xb9   :  { %1430 = vmatpush.msra.mxu1 %v488_v34  ;;  %2418 = vtanh.f32 %v759_v36  ;;  %1409 = vmatpush.msra.mxu0 %v559_v38  ;;  %v205_v34 = vld [vmem:[%s4683_s0 + $0x5f0] sm:$0xff]  ;;  %v206_v36 = vld [vmem:[%s4683_s0 + $0x5f8] sm:$0xff] }
  0xba   :  { %1472 = vmatpush.msra.mxu3 %v346_v39  ;;  %2420 = vtanh.f32 %v739_v40  ;;  %1453 = vmatpush.msra.mxu2 %v273_v42  ;;  %v133_v38 = vld [vmem:[%s4683_s0 + $0x3b0] sm:$0xff]  ;;  %v347_v39 = vld [vmem:[%s4683_s0 + $0xa60] sm:$0xff]  ;;  %v134_v40 = vld [vmem:[%s4683_s0 + $0x3b8] sm:$0xff] }
  0xbb   :  { %1431 = vmatpush.msra.mxu1 %v416_v41  ;;  %2422 = vtanh.f32 %v699_v46  ;;  %1410 = vmatpush.msra.mxu0 %v487_v44  ;;  %v204_v42 = vld [vmem:[%s4683_s0 + $0x5e8] sm:$0xff]  ;;  %v62_v46 = vld [vmem:[%s4683_s0 + $0x178] sm:$0xff] }
  0xbc   :  { %1473 = vmatpush.msra.mxu3 %v274_v45  ;;  %1454 = vmatpush.msra.mxu2 %v201_v48  ;;  %v275_v45 = vld [vmem:[%s4683_s0 + $0x820] sm:$0xff] }
  0xbd   :  { %1432 = vmatpush.msra.mxu1 %v344_v47  ;;  %1411 = vmatpush.msra.mxu0 %v415_v49 }
  0xbe   :  { %v2417_v55 = vpop.eup %2416  ;;  %1474 = vmatpush.msra.mxu3 %v202_v50  ;;  %1455 = vmatpush.msra.mxu2 %v129_v59  ;;  %v570_v59 = vld [vmem:[%s4683_s0 + $0x1158] sm:$0xff] }
  0xbf   :  { %v2419_v60 = vpop.eup %2418  ;;  %1433 = vmatpush.msra.mxu1 %v272_v51  ;;  %v2187_v63 = vrot.slane %v2417_v55, 4  ;;  %1412 = vmatpush.msra.mxu0 %v343_v52  ;;  %v569_v51 = vld [vmem:[%s4683_s0 + $0x1150] sm:$0xff]  ;;  %v203_v52 = vld [vmem:[%s4683_s0 + $0x5e0] sm:$0xff] }
  0xc0   :  { %v2421_v0 = vpop.eup %2420  ;;  %1475 = vmatpush.msra.mxu3 %v130_v53  ;;  %v2188_v1 = vrot.slane %v2419_v60, 4  ;;  %1456 = vmatpush.msra.mxu2 %v57_v58  ;;  %v132_v53 = vld [vmem:[%s4683_s0 + $0x3a8] sm:$0xff]  ;;  %v497_v58 = vld [vmem:[%s4683_s0 + $0xf10] sm:$0xff]  ;;  %v498_v60 = vld [vmem:[%s4683_s0 + $0xf18] sm:$0xff] }
  0xc1   :  { %v2423_v2 = vpop.eup %2422  ;;  %1434 = vmatpush.msra.mxu1 %v200_v56  ;;  %1413 = vmatpush.msra.mxu0 %v271_v61  ;;  %v131_v61 = vld [vmem:[%s4683_s0 + $0x3a0] sm:$0xff] }
  0xc2   :  { %1476 = vmatpush.msra.mxu3 %v58_v62  ;;  %v2224_v7 = vsel %vm2221_vm1, %v2423_v2, %v2187_v63  ;;  %v2225_v8 = vsel %vm2221_vm1, %v2421_v0, %v2188_v1  ;;  %2372 = vmatmul.msk.f32.vlgmr.msrb.gmra.mxu2 %vm597_vm0, %v3551_v54  ;;  %v60_v62 = vld [vmem:[%s4683_s0 + $0x168] sm:$0xff]  ;;  %v425_v63 = vld [vmem:[%s4683_s0 + $0xcd0] sm:$0xff]  ;;  %v426_v1 = vld [vmem:[%s4683_s0 + $0xcd8] sm:$0xff] }
  0xc3   :  { %2373 = vmatmul.msk.f32.vlgmr.msrb.gmra.mxu3 %vm597_vm0, %v3551_v54  ;;  %2296 = vst [vmem:[%s4686_s3 + $0x10] sm:$0x77] %v2224_v7  ;;  %1529 = vmatpush.msrb.mxu2 %v565_v3  ;;  %v568_v0 = vld [vmem:[%s4683_s0 + $0x1148] sm:$0xff]  ;;  %v59_v2 = vld [vmem:[%s4683_s0 + $0x160] sm:$0xff]  ;;  %v353_v3 = vld [vmem:[%s4683_s0 + $0xa90] sm:$0xff] }
  0xc4   :  { %1549 = vmatpush.msrb.mxu3 %v566_v4  ;;  %2297 = vst [vmem:[%s4686_s3 + $0x18] sm:$0x77] %v2225_v8  ;;  %1414 = vmatpush.msra.mxu0 %v199_v5  ;;  %v496_v5 = vld [vmem:[%s4683_s0 + $0xf08] sm:$0xff] }
  0xc5   :  { %1435 = vmatpush.msra.mxu1 %v128_v6  ;;  %1530 = vmatpush.msrb.mxu2 %v493_v9  ;;  %v567_v9 = vld [vmem:[%s4683_s0 + $0x1140] sm:$0xff] }
  0xc6   :  { %1550 = vmatpush.msrb.mxu3 %v494_v10  ;;  %1415 = vmatpush.msra.mxu0 %v127_v11  ;;  %v354_v10 = vld [vmem:[%s4683_s0 + $0xa98] sm:$0xff] }
  0xc7   :  { %1436 = vmatpush.msra.mxu1 %v56_v12  ;;  %v798_v18 = vpop.f32.mrf.mxu1  ;;  %1531 = vmatpush.msrb.mxu2 %v421_v13  ;;  %v818_v22 = vpop.f32.mrf.mxu2  ;;  %v424_v13 = vld [vmem:[%s4683_s0 + $0xcc8] sm:$0xff] }
  0xc8   :  { %2371 = vmatmul.msk.f32.vlgmr.msrb.gmra.mxu1 %vm597_vm0, %v3551_v54  ;;  %v799_v20 = vadd.f32 %v798_v18, %v3561_v57  ;;  %v838_v21 = vpop.f32.mrf.mxu3  ;;  %1551 = vmatpush.msrb.mxu3 %v422_v15  ;;  %v819_v26 = vadd.f32 %v818_v22, %v3561_v57  ;;  %v210_v22 = vld [vmem:[%s4683_s0 + $0x618] sm:$0xff] }
  0xc9   :  { %1509 = vmatpush.msrb.mxu1 %v564_v14  ;;  %v839_v25 = vadd.f32 %v838_v21, %v3561_v57  ;;  %1416 = vmatpush.msra.mxu0 %v55_v16  ;;  %v778_v29 = vpop.f32.mrf.mxu0  ;;  %v281_v14 = vld [vmem:[%s4683_s0 + $0x850] sm:$0xff]  ;;  %v495_v16 = vld [vmem:[%s4683_s0 + $0xf00] sm:$0xff] }
  0xca   :  { %1532 = vmatpush.msrb.mxu2 %v349_v17  ;;  %2424 = vtanh.f32 %v799_v20  ;;  %2370 = vmatmul.msk.f32.vlgmr.msrb.gmra.mxu0 %vm597_vm0, %v3551_v54  ;;  %v779_v32 = vadd.f32 %v778_v29, %v3561_v57  ;;  %v282_v17 = vld [vmem:[%s4683_s0 + $0x858] sm:$0xff]  ;;  %v209_v20 = vld [vmem:[%s4683_s0 + $0x610] sm:$0xff]  ;;  %v423_v21 = vld [vmem:[%s4683_s0 + $0xcc0] sm:$0xff] }
  0xcb   :  { %1510 = vmatpush.msrb.mxu1 %v492_v19  ;;  %2426 = vtanh.f32 %v839_v25  ;;  %1489 = vmatpush.msrb.mxu0 %v563_v23  ;;  %v352_v19 = vld [vmem:[%s4683_s0 + $0xa88] sm:$0xff]  ;;  %v351_v25 = vld [vmem:[%s4683_s0 + $0xa80] sm:$0xff]  ;;  %v65_v29 = vld [vmem:[%s4683_s0 + $0x190] sm:$0xff] }
  0xcc   :  { %1552 = vmatpush.msrb.mxu3 %v350_v24  ;;  %2428 = vtanh.f32 %v819_v26  ;;  %1533 = vmatpush.msrb.mxu2 %v277_v28  ;;  %v280_v23 = vld [vmem:[%s4683_s0 + $0x848] sm:$0xff]  ;;  %v137_v24 = vld [vmem:[%s4683_s0 + $0x3d0] sm:$0xff]  ;;  %v138_v26 = vld [vmem:[%s4683_s0 + $0x3d8] sm:$0xff] }
  0xcd   :  { %1511 = vmatpush.msrb.mxu1 %v420_v27  ;;  %2430 = vtanh.f32 %v779_v32  ;;  %1490 = vmatpush.msrb.mxu0 %v491_v30  ;;  %v208_v28 = vld [vmem:[%s4683_s0 + $0x608] sm:$0xff]  ;;  %v66_v32 = vld [vmem:[%s4683_s0 + $0x198] sm:$0xff] }
  0xce   :  { %1553 = vmatpush.msrb.mxu3 %v278_v31  ;;  %1534 = vmatpush.msrb.mxu2 %v205_v34  ;;  %v279_v31 = vld [vmem:[%s4683_s0 + $0x840] sm:$0xff] }
  0xcf   :  { %1512 = vmatpush.msrb.mxu1 %v348_v33  ;;  %1491 = vmatpush.msrb.mxu0 %v419_v35 }
  0xd0   :  { %v2425_v41 = vpop.eup %2424  ;;  %1554 = vmatpush.msrb.mxu3 %v206_v36  ;;  %1535 = vmatpush.msrb.mxu2 %v133_v38  ;;  %v574_v38 = vld [vmem:[%s4683_s0 + $0x1178] sm:$0xff] }
  0xd1   :  { %v2427_v44 = vpop.eup %2426  ;;  %1513 = vmatpush.msrb.mxu1 %v276_v37  ;;  %v2189_v47 = vrot.slane %v2425_v41, 4  ;;  %1492 = vmatpush.msrb.mxu0 %v347_v39  ;;  %v573_v37 = vld [vmem:[%s4683_s0 + $0x1170] sm:$0xff]  ;;  %v207_v39 = vld [vmem:[%s4683_s0 + $0x600] sm:$0xff] }
  0xd2   :  { %v2429_v48 = vpop.eup %2428  ;;  %1555 = vmatpush.msrb.mxu3 %v134_v40  ;;  %v2190_v49 = vrot.slane %v2427_v44, 4  ;;  %1536 = vmatpush.msrb.mxu2 %v61_v43  ;;  %v136_v40 = vld [vmem:[%s4683_s0 + $0x3c8] sm:$0xff]  ;;  %v501_v43 = vld [vmem:[%s4683_s0 + $0xf30] sm:$0xff]  ;;  %v502_v44 = vld [vmem:[%s4683_s0 + $0xf38] sm:$0xff] }
  0xd3   :  { %v2431_v50 = vpop.eup %2430  ;;  %1514 = vmatpush.msrb.mxu1 %v204_v42  ;;  %1493 = vmatpush.msrb.mxu0 %v275_v45  ;;  %v135_v45 = vld [vmem:[%s4683_s0 + $0x3c0] sm:$0xff] }
  0xd4   :  { %1556 = vmatpush.msrb.mxu3 %v62_v46  ;;  %v2226_v55 = vsel %vm2221_vm1, %v2431_v50, %v2189_v47  ;;  %v2227_v56 = vsel %vm2221_vm1, %v2429_v48, %v2190_v49  ;;  %2376 = vmatmul.msk.f32.vlgmr.msra.gmra.mxu2 %vm597_vm0, %v3551_v54  ;;  %v64_v46 = vld [vmem:[%s4683_s0 + $0x188] sm:$0xff]  ;;  %v429_v47 = vld [vmem:[%s4683_s0 + $0xcf0] sm:$0xff]  ;;  %v430_v49 = vld [vmem:[%s4683_s0 + $0xcf8] sm:$0xff] }
  0xd5   :  { %2377 = vmatmul.msk.f32.vlgmr.msra.gmra.mxu3 %vm597_vm0, %v3551_v54  ;;  %2298 = vst [vmem:[%s4686_s3 + $0x20] sm:$0x77] %v2226_v55  ;;  %1609 = vmatpush.msra.mxu2 %v569_v51  ;;  %v572_v48 = vld [vmem:[%s4683_s0 + $0x1168] sm:$0xff]  ;;  %v63_v50 = vld [vmem:[%s4683_s0 + $0x180] sm:$0xff]  ;;  %v357_v51 = vld [vmem:[%s4683_s0 + $0xab0] sm:$0xff] }
  0xd6   :  { %1629 = vmatpush.msra.mxu3 %v570_v59  ;;  %2299 = vst [vmem:[%s4686_s3 + $0x28] sm:$0x77] %v2227_v56  ;;  %1494 = vmatpush.msrb.mxu0 %v203_v52  ;;  %v500_v52 = vld [vmem:[%s4683_s0 + $0xf28] sm:$0xff] }
  0xd7   :  { %1515 = vmatpush.msrb.mxu1 %v132_v53  ;;  %1610 = vmatpush.msra.mxu2 %v497_v58  ;;  %v571_v58 = vld [vmem:[%s4683_s0 + $0x1160] sm:$0xff] }
  0xd8   :  { %1630 = vmatpush.msra.mxu3 %v498_v60  ;;  %1495 = vmatpush.msrb.mxu0 %v131_v61  ;;  %v358_v60 = vld [vmem:[%s4683_s0 + $0xab8] sm:$0xff] }
  0xd9   :  { %1516 = vmatpush.msrb.mxu1 %v60_v62  ;;  %v878_v4 = vpop.f32.mrf.mxu1  ;;  %1611 = vmatpush.msra.mxu2 %v425_v63  ;;  %v898_v8 = vpop.f32.mrf.mxu2  ;;  %v428_v63 = vld [vmem:[%s4683_s0 + $0xce8] sm:$0xff] }
  0xda   :  { %2375 = vmatmul.msk.f32.vlgmr.msra.gmra.mxu1 %vm597_vm0, %v3551_v54  ;;  %v879_v6 = vadd.f32 %v878_v4, %v3561_v57  ;;  %v918_v7 = vpop.f32.mrf.mxu3  ;;  %1631 = vmatpush.msra.mxu3 %v426_v1  ;;  %v899_v12 = vadd.f32 %v898_v8, %v3561_v57  ;;  %v214_v8 = vld [vmem:[%s4683_s0 + $0x638] sm:$0xff] }
  0xdb   :  { %1589 = vmatpush.msra.mxu1 %v568_v0  ;;  %v919_v11 = vadd.f32 %v918_v7, %v3561_v57  ;;  %1496 = vmatpush.msrb.mxu0 %v59_v2  ;;  %v858_v15 = vpop.f32.mrf.mxu0  ;;  %v285_v0 = vld [vmem:[%s4683_s0 + $0x870] sm:$0xff]  ;;  %v499_v2 = vld [vmem:[%s4683_s0 + $0xf20] sm:$0xff] }
  0xdc   :  { %1612 = vmatpush.msra.mxu2 %v353_v3  ;;  %2432 = vtanh.f32 %v879_v6  ;;  %2374 = vmatmul.msk.f32.vlgmr.msra.gmra.mxu0 %vm597_vm0, %v3551_v54  ;;  %v859_v18 = vadd.f32 %v858_v15, %v3561_v57  ;;  %v286_v3 = vld [vmem:[%s4683_s0 + $0x878] sm:$0xff]  ;;  %v213_v6 = vld [vmem:[%s4683_s0 + $0x630] sm:$0xff]  ;;  %v427_v7 = vld [vmem:[%s4683_s0 + $0xce0] sm:$0xff] }
  0xdd   :  { %1590 = vmatpush.msra.mxu1 %v496_v5  ;;  %2434 = vtanh.f32 %v919_v11  ;;  %1569 = vmatpush.msra.mxu0 %v567_v9  ;;  %v356_v5 = vld [vmem:[%s4683_s0 + $0xaa8] sm:$0xff]  ;;  %v355_v11 = vld [vmem:[%s4683_s0 + $0xaa0] sm:$0xff]  ;;  %v69_v15 = vld [vmem:[%s4683_s0 + $0x1b0] sm:$0xff] }
  0xde   :  { %1632 = vmatpush.msra.mxu3 %v354_v10  ;;  %2436 = vtanh.f32 %v899_v12  ;;  %1613 = vmatpush.msra.mxu2 %v281_v14  ;;  %v284_v9 = vld [vmem:[%s4683_s0 + $0x868] sm:$0xff]  ;;  %v141_v10 = vld [vmem:[%s4683_s0 + $0x3f0] sm:$0xff]  ;;  %v142_v12 = vld [vmem:[%s4683_s0 + $0x3f8] sm:$0xff] }
  0xdf   :  { %1591 = vmatpush.msra.mxu1 %v424_v13  ;;  %2438 = vtanh.f32 %v859_v18  ;;  %1570 = vmatpush.msra.mxu0 %v495_v16  ;;  %v212_v14 = vld [vmem:[%s4683_s0 + $0x628] sm:$0xff]  ;;  %v70_v18 = vld [vmem:[%s4683_s0 + $0x1b8] sm:$0xff] }
  0xe0   :  { %1633 = vmatpush.msra.mxu3 %v282_v17  ;;  %1614 = vmatpush.msra.mxu2 %v209_v20  ;;  %v283_v17 = vld [vmem:[%s4683_s0 + $0x860] sm:$0xff] }
  0xe1   :  { %1592 = vmatpush.msra.mxu1 %v352_v19  ;;  %1571 = vmatpush.msra.mxu0 %v423_v21 }
  0xe2   :  { %v2433_v27 = vpop.eup %2432  ;;  %1634 = vmatpush.msra.mxu3 %v210_v22  ;;  %1615 = vmatpush.msra.mxu2 %v137_v24  ;;  %v578_v24 = vld [vmem:[%s4683_s0 + $0x1198] sm:$0xff] }
  0xe3   :  { %v2435_v30 = vpop.eup %2434  ;;  %1593 = vmatpush.msra.mxu1 %v280_v23  ;;  %v2191_v33 = vrot.slane %v2433_v27, 4  ;;  %1572 = vmatpush.msra.mxu0 %v351_v25  ;;  %v577_v23 = vld [vmem:[%s4683_s0 + $0x1190] sm:$0xff]  ;;  %v211_v25 = vld [vmem:[%s4683_s0 + $0x620] sm:$0xff] }
  0xe4   :  { %v2437_v34 = vpop.eup %2436  ;;  %1635 = vmatpush.msra.mxu3 %v138_v26  ;;  %v2192_v35 = vrot.slane %v2435_v30, 4  ;;  %1616 = vmatpush.msra.mxu2 %v65_v29  ;;  %v140_v26 = vld [vmem:[%s4683_s0 + $0x3e8] sm:$0xff]  ;;  %v505_v29 = vld [vmem:[%s4683_s0 + $0xf50] sm:$0xff]  ;;  %v506_v30 = vld [vmem:[%s4683_s0 + $0xf58] sm:$0xff] }
  0xe5   :  { %v2439_v36 = vpop.eup %2438  ;;  %1594 = vmatpush.msra.mxu1 %v208_v28  ;;  %1573 = vmatpush.msra.mxu0 %v279_v31  ;;  %v139_v31 = vld [vmem:[%s4683_s0 + $0x3e0] sm:$0xff] }
  0xe6   :  { %1636 = vmatpush.msra.mxu3 %v66_v32  ;;  %v2228_v41 = vsel %vm2221_vm1, %v2439_v36, %v2191_v33  ;;  %v2229_v42 = vsel %vm2221_vm1, %v2437_v34, %v2192_v35  ;;  %2380 = vmatmul.msk.f32.vlgmr.msrb.gmra.mxu2 %vm597_vm0, %v3551_v54  ;;  %v68_v32 = vld [vmem:[%s4683_s0 + $0x1a8] sm:$0xff]  ;;  %v433_v33 = vld [vmem:[%s4683_s0 + $0xd10] sm:$0xff]  ;;  %v434_v35 = vld [vmem:[%s4683_s0 + $0xd18] sm:$0xff] }
  0xe7   :  { %2381 = vmatmul.msk.f32.vlgmr.msrb.gmra.mxu3 %vm597_vm0, %v3551_v54  ;;  %2300 = vst [vmem:[%s4686_s3 + $0x30] sm:$0x77] %v2228_v41  ;;  %1689 = vmatpush.msrb.mxu2 %v573_v37  ;;  %v576_v34 = vld [vmem:[%s4683_s0 + $0x1188] sm:$0xff]  ;;  %v67_v36 = vld [vmem:[%s4683_s0 + $0x1a0] sm:$0xff]  ;;  %v361_v37 = vld [vmem:[%s4683_s0 + $0xad0] sm:$0xff] }
  0xe8   :  { %1709 = vmatpush.msrb.mxu3 %v574_v38  ;;  %2301 = vst [vmem:[%s4686_s3 + $0x38] sm:$0x77] %v2229_v42  ;;  %1574 = vmatpush.msra.mxu0 %v207_v39  ;;  %v504_v39 = vld [vmem:[%s4683_s0 + $0xf48] sm:$0xff] }
  0xe9   :  { %1595 = vmatpush.msra.mxu1 %v136_v40  ;;  %1690 = vmatpush.msrb.mxu2 %v501_v43  ;;  %v575_v43 = vld [vmem:[%s4683_s0 + $0x1180] sm:$0xff] }
  0xea   :  { %1710 = vmatpush.msrb.mxu3 %v502_v44  ;;  %1575 = vmatpush.msra.mxu0 %v135_v45  ;;  %v362_v44 = vld [vmem:[%s4683_s0 + $0xad8] sm:$0xff] }
  0xeb   :  { %1596 = vmatpush.msra.mxu1 %v64_v46  ;;  %v958_v59 = vpop.f32.mrf.mxu1  ;;  %1691 = vmatpush.msrb.mxu2 %v429_v47  ;;  %v978_v56 = vpop.f32.mrf.mxu2  ;;  %v432_v47 = vld [vmem:[%s4683_s0 + $0xd08] sm:$0xff] }
  0xec   :  { %2379 = vmatmul.msk.f32.vlgmr.msrb.gmra.mxu1 %vm597_vm0, %v3551_v54  ;;  %v959_v53 = vadd.f32 %v958_v59, %v3561_v57  ;;  %v998_v55 = vpop.f32.mrf.mxu3  ;;  %1711 = vmatpush.msrb.mxu3 %v430_v49  ;;  %v979_v62 = vadd.f32 %v978_v56, %v3561_v57  ;;  %v218_v56 = vld [vmem:[%s4683_s0 + $0x658] sm:$0xff] }
  0xed   :  { %1669 = vmatpush.msrb.mxu1 %v572_v48  ;;  %v999_v61 = vadd.f32 %v998_v55, %v3561_v57  ;;  %1576 = vmatpush.msra.mxu0 %v63_v50  ;;  %v938_v1 = vpop.f32.mrf.mxu0  ;;  %v289_v48 = vld [vmem:[%s4683_s0 + $0x890] sm:$0xff]  ;;  %v503_v50 = vld [vmem:[%s4683_s0 + $0xf40] sm:$0xff] }
  0xee   :  { %1692 = vmatpush.msrb.mxu2 %v357_v51  ;;  %2440 = vtanh.f32 %v959_v53  ;;  %2378 = vmatmul.msk.f32.vlgmr.msrb.gmra.mxu0 %vm597_vm0, %v3551_v54  ;;  %v939_v4 = vadd.f32 %v938_v1, %v3561_v57  ;;  %v290_v51 = vld [vmem:[%s4683_s0 + $0x898] sm:$0xff]  ;;  %v217_v53 = vld [vmem:[%s4683_s0 + $0x650] sm:$0xff]  ;;  %v431_v55 = vld [vmem:[%s4683_s0 + $0xd00] sm:$0xff] }
  0xef   :  { %1670 = vmatpush.msrb.mxu1 %v500_v52  ;;  %2442 = vtanh.f32 %v999_v61  ;;  %1649 = vmatpush.msrb.mxu0 %v571_v58  ;;  %v360_v52 = vld [vmem:[%s4683_s0 + $0xac8] sm:$0xff]  ;;  %v359_v61 = vld [vmem:[%s4683_s0 + $0xac0] sm:$0xff]  ;;  %v73_v1 = vld [vmem:[%s4683_s0 + $0x1d0] sm:$0xff] }
  0xf0   :  { %1712 = vmatpush.msrb.mxu3 %v358_v60  ;;  %2444 = vtanh.f32 %v979_v62  ;;  %1693 = vmatpush.msrb.mxu2 %v285_v0  ;;  %v288_v58 = vld [vmem:[%s4683_s0 + $0x888] sm:$0xff]  ;;  %v145_v60 = vld [vmem:[%s4683_s0 + $0x410] sm:$0xff]  ;;  %v146_v62 = vld [vmem:[%s4683_s0 + $0x418] sm:$0xff] }
  0xf1   :  { %1671 = vmatpush.msrb.mxu1 %v428_v63  ;;  %2446 = vtanh.f32 %v939_v4  ;;  %1650 = vmatpush.msrb.mxu0 %v499_v2  ;;  %v216_v0 = vld [vmem:[%s4683_s0 + $0x648] sm:$0xff]  ;;  %v74_v4 = vld [vmem:[%s4683_s0 + $0x1d8] sm:$0xff] }
  0xf2   :  { %1713 = vmatpush.msrb.mxu3 %v286_v3  ;;  %1694 = vmatpush.msrb.mxu2 %v213_v6  ;;  %v287_v3 = vld [vmem:[%s4683_s0 + $0x880] sm:$0xff] }
  0xf3   :  { %1672 = vmatpush.msrb.mxu1 %v356_v5  ;;  %1651 = vmatpush.msrb.mxu0 %v427_v7 }
  0xf4   :  { %v2441_v13 = vpop.eup %2440  ;;  %1714 = vmatpush.msrb.mxu3 %v214_v8  ;;  %1695 = vmatpush.msrb.mxu2 %v141_v10  ;;  %v582_v10 = vld [vmem:[%s4683_s0 + $0x11b8] sm:$0xff] }
  0xf5   :  { %v2443_v16 = vpop.eup %2442  ;;  %1673 = vmatpush.msrb.mxu1 %v284_v9  ;;  %v2193_v19 = vrot.slane %v2441_v13, 4  ;;  %1652 = vmatpush.msrb.mxu0 %v355_v11  ;;  %v581_v9 = vld [vmem:[%s4683_s0 + $0x11b0] sm:$0xff]  ;;  %v215_v11 = vld [vmem:[%s4683_s0 + $0x640] sm:$0xff] }
  0xf6   :  { %v2445_v20 = vpop.eup %2444  ;;  %1715 = vmatpush.msrb.mxu3 %v142_v12  ;;  %v2194_v21 = vrot.slane %v2443_v16, 4  ;;  %1696 = vmatpush.msrb.mxu2 %v69_v15  ;;  %v144_v12 = vld [vmem:[%s4683_s0 + $0x408] sm:$0xff]  ;;  %v509_v15 = vld [vmem:[%s4683_s0 + $0xf70] sm:$0xff]  ;;  %v510_v16 = vld [vmem:[%s4683_s0 + $0xf78] sm:$0xff] }
  0xf7   :  { %v2447_v22 = vpop.eup %2446  ;;  %1674 = vmatpush.msrb.mxu1 %v212_v14  ;;  %1653 = vmatpush.msrb.mxu0 %v283_v17  ;;  %v143_v17 = vld [vmem:[%s4683_s0 + $0x400] sm:$0xff] }
  0xf8   :  { %1716 = vmatpush.msrb.mxu3 %v70_v18  ;;  %v2230_v27 = vsel %vm2221_vm1, %v2447_v22, %v2193_v19  ;;  %v2231_v28 = vsel %vm2221_vm1, %v2445_v20, %v2194_v21  ;;  %2384 = vmatmul.msk.f32.vlgmr.msra.gmra.mxu2 %vm597_vm0, %v3551_v54  ;;  %v437_v18 = vld [vmem:[%s4683_s0 + $0xd30] sm:$0xff]  ;;  %v580_v19 = vld [vmem:[%s4683_s0 + $0x11a8] sm:$0xff]  ;;  %v438_v20 = vld [vmem:[%s4683_s0 + $0xd38] sm:$0xff] }
  0xf9   :  { %2385 = vmatmul.msk.f32.vlgmr.msra.gmra.mxu3 %vm597_vm0, %v3551_v54  ;;  %2302 = vst [vmem:[%s4686_s3 + $0x40] sm:$0x77] %v2230_v27  ;;  %1769 = vmatpush.msra.mxu2 %v577_v23  ;;  %v71_v21 = vld [vmem:[%s4683_s0 + $0x1c0] sm:$0xff]  ;;  %v365_v22 = vld [vmem:[%s4683_s0 + $0xaf0] sm:$0xff] }
  0xfa   :  { %1789 = vmatpush.msra.mxu3 %v578_v24  ;;  %2303 = vst [vmem:[%s4686_s3 + $0x48] sm:$0x77] %v2231_v28  ;;  %1654 = vmatpush.msrb.mxu0 %v211_v25  ;;  %v4237_v24 = vld [vmem:[%s4684_s1] sm:$0x7]  ;;  %v508_v25 = vld [vmem:[%s4683_s0 + $0xf68] sm:$0xff] }
  0xfb   :  { %1675 = vmatpush.msrb.mxu1 %v140_v26  ;;  %1770 = vmatpush.msra.mxu2 %v505_v29  ;;  %v579_v29 = vld [vmem:[%s4683_s0 + $0x11a0] sm:$0xff] }
  0xfc   :  { %1790 = vmatpush.msra.mxu3 %v506_v30  ;;  %1655 = vmatpush.msrb.mxu0 %v139_v31  ;;  %v366_v30 = vld [vmem:[%s4683_s0 + $0xaf8] sm:$0xff] }
  0xfd   :  { %1676 = vmatpush.msrb.mxu1 %v68_v32  ;;  %v1038_v38 = vpop.f32.mrf.mxu1  ;;  %1771 = vmatpush.msra.mxu2 %v433_v33  ;;  %v1058_v42 = vpop.f32.mrf.mxu2  ;;  %v436_v33 = vld [vmem:[%s4683_s0 + $0xd28] sm:$0xff] }
  0xfe   :  { %2383 = vmatmul.msk.f32.vlgmr.msra.gmra.mxu1 %vm597_vm0, %v3551_v54  ;;  %v1039_v40 = vadd.f32 %v1038_v38, %v3561_v57  ;;  %v1078_v41 = vpop.f32.mrf.mxu3  ;;  %1791 = vmatpush.msra.mxu3 %v434_v35  ;;  %v1059_v46 = vadd.f32 %v1058_v42, %v3561_v57  ;;  %v222_v42 = vld [vmem:[%s4683_s0 + $0x678] sm:$0xff] }
  0xff   :  { %1749 = vmatpush.msra.mxu1 %v576_v34  ;;  %v1079_v45 = vadd.f32 %v1078_v41, %v3561_v57  ;;  %1656 = vmatpush.msrb.mxu0 %v67_v36  ;;  %v1018_v49 = vpop.f32.mrf.mxu0  ;;  %v293_v34 = vld [vmem:[%s4683_s0 + $0x8b0] sm:$0xff]  ;;  %v507_v36 = vld [vmem:[%s4683_s0 + $0xf60] sm:$0xff] }
 0x100   :  { %1772 = vmatpush.msra.mxu2 %v361_v37  ;;  %2448 = vtanh.f32 %v1039_v40  ;;  %2382 = vmatmul.msk.f32.vlgmr.msra.gmra.mxu0 %vm597_vm0, %v3551_v54  ;;  %v1019_v59 = vadd.f32 %v1018_v49, %v3561_v57  ;;  %v294_v37 = vld [vmem:[%s4683_s0 + $0x8b8] sm:$0xff]  ;;  %v221_v40 = vld [vmem:[%s4683_s0 + $0x670] sm:$0xff]  ;;  %v435_v41 = vld [vmem:[%s4683_s0 + $0xd20] sm:$0xff] }
 0x101   :  { %1750 = vmatpush.msra.mxu1 %v504_v39  ;;  %2450 = vtanh.f32 %v1079_v45  ;;  %1729 = vmatpush.msra.mxu0 %v575_v43  ;;  %v364_v39 = vld [vmem:[%s4683_s0 + $0xae8] sm:$0xff]  ;;  %v363_v45 = vld [vmem:[%s4683_s0 + $0xae0] sm:$0xff]  ;;  %v77_v49 = vld [vmem:[%s4683_s0 + $0x1f0] sm:$0xff] }
 0x102   :  { %1792 = vmatpush.msra.mxu3 %v362_v44  ;;  %2452 = vtanh.f32 %v1059_v46  ;;  %1773 = vmatpush.msra.mxu2 %v289_v48  ;;  %v292_v43 = vld [vmem:[%s4683_s0 + $0x8a8] sm:$0xff]  ;;  %v149_v44 = vld [vmem:[%s4683_s0 + $0x430] sm:$0xff]  ;;  %v150_v46 = vld [vmem:[%s4683_s0 + $0x438] sm:$0xff] }
 0x103   :  { %1751 = vmatpush.msra.mxu1 %v432_v47  ;;  %2454 = vtanh.f32 %v1019_v59  ;;  %1730 = vmatpush.msra.mxu0 %v503_v50  ;;  %v220_v48 = vld [vmem:[%s4683_s0 + $0x668] sm:$0xff]  ;;  %v78_v59 = vld [vmem:[%s4683_s0 + $0x1f8] sm:$0xff] }
 0x104   :  { %1793 = vmatpush.msra.mxu3 %v290_v51  ;;  %1774 = vmatpush.msra.mxu2 %v217_v53  ;;  %v291_v51 = vld [vmem:[%s4683_s0 + $0x8a0] sm:$0xff] }
 0x105   :  { %1752 = vmatpush.msra.mxu1 %v360_v52  ;;  %1731 = vmatpush.msra.mxu0 %v431_v55 }
 0x106   :  { %v2449_v63 = vpop.eup %2448  ;;  %1794 = vmatpush.msra.mxu3 %v218_v56  ;;  %1775 = vmatpush.msra.mxu2 %v145_v60  ;;  %v586_v60 = vld [vmem:[%s4683_s0 + $0x11d8] sm:$0xff] }
 0x107   :  { %v2451_v2 = vpop.eup %2450  ;;  %1753 = vmatpush.msra.mxu1 %v288_v58  ;;  %v2195_v5 = vrot.slane %v2449_v63, 4  ;;  %1732 = vmatpush.msra.mxu0 %v359_v61  ;;  %v585_v58 = vld [vmem:[%s4683_s0 + $0x11d0] sm:$0xff]  ;;  %v219_v61 = vld [vmem:[%s4683_s0 + $0x660] sm:$0xff] }
 0x108   :  { %v2453_v6 = vpop.eup %2452  ;;  %1795 = vmatpush.msra.mxu3 %v146_v62  ;;  %v2196_v7 = vrot.slane %v2451_v2, 4  ;;  %1776 = vmatpush.msra.mxu2 %v73_v1  ;;  %v148_v62 = vld [vmem:[%s4683_s0 + $0x428] sm:$0xff]  ;;  %v513_v1 = vld [vmem:[%s4683_s0 + $0xf90] sm:$0xff]  ;;  %v514_v2 = vld [vmem:[%s4683_s0 + $0xf98] sm:$0xff] }
 0x109   :  { %v2455_v8 = vpop.eup %2454  ;;  %1754 = vmatpush.msra.mxu1 %v216_v0  ;;  %1733 = vmatpush.msra.mxu0 %v287_v3  ;;  %v147_v3 = vld [vmem:[%s4683_s0 + $0x420] sm:$0xff] }
 0x10a   :  { %1796 = vmatpush.msra.mxu3 %v74_v4  ;;  %v2232_v13 = vsel %vm2221_vm1, %v2455_v8, %v2195_v5  ;;  %v2233_v14 = vsel %vm2221_vm1, %v2453_v6, %v2196_v7  ;;  %2388 = vmatmul.msk.f32.vlgmr.msrb.gmra.mxu2 %vm597_vm0, %v3551_v54  ;;  %v76_v4 = vld [vmem:[%s4683_s0 + $0x1e8] sm:$0xff]  ;;  %v441_v5 = vld [vmem:[%s4683_s0 + $0xd50] sm:$0xff]  ;;  %v442_v7 = vld [vmem:[%s4683_s0 + $0xd58] sm:$0xff] }
 0x10b   :  { %2389 = vmatmul.msk.f32.vlgmr.msrb.gmra.mxu3 %vm597_vm0, %v3551_v54  ;;  %2304 = vst [vmem:[%s4686_s3 + $0x50] sm:$0x77] %v2232_v13  ;;  %1849 = vmatpush.msrb.mxu2 %v581_v9  ;;  %v72_v54 = vld [vmem:[%s4683_s0 + $0x1c8] sm:$0xff]  ;;  %v75_v8 = vld [vmem:[%s4683_s0 + $0x1e0] sm:$0xff]  ;;  %v369_v9 = vld [vmem:[%s4683_s0 + $0xb10] sm:$0xff] }
 0x10c   :  { %1869 = vmatpush.msrb.mxu3 %v582_v10  ;;  %2305 = vst [vmem:[%s4686_s3 + $0x58] sm:$0x77] %v2233_v14  ;;  %1734 = vmatpush.msra.mxu0 %v215_v11  ;;  %v584_v6 = vld [vmem:[%s4683_s0 + $0x11c8] sm:$0xff] }
 0x10d   :  { %1755 = vmatpush.msra.mxu1 %v144_v12  ;;  %1850 = vmatpush.msrb.mxu2 %v509_v15  ;;  %v512_v11 = vld [vmem:[%s4683_s0 + $0xf88] sm:$0xff]  ;;  %v583_v15 = vld [vmem:[%s4683_s0 + $0x11c0] sm:$0xff] }
 0x10e   :  { %1870 = vmatpush.msrb.mxu3 %v510_v16  ;;  %1735 = vmatpush.msra.mxu0 %v143_v17  ;;  %v370_v16 = vld [vmem:[%s4683_s0 + $0xb18] sm:$0xff] }
 0x10f   :  { %1756 = vmatpush.msra.mxu1 %v72_v54  ;;  %v1118_v23 = vpop.f32.mrf.mxu1  ;;  %1851 = vmatpush.msrb.mxu2 %v437_v18  ;;  %v1138_v28 = vpop.f32.mrf.mxu2  ;;  %v440_v18 = vld [vmem:[%s4683_s0 + $0xd48] sm:$0xff] }
 0x110   :  { %2387 = vmatmul.msk.f32.vlgmr.msrb.gmra.mxu1 %vm597_vm0, %v4237_v24  ;;  %v1119_v26 = vadd.f32 %v1118_v23, %v3561_v57  ;;  %v1158_v27 = vpop.f32.mrf.mxu3  ;;  %1871 = vmatpush.msrb.mxu3 %v438_v20  ;;  %v1139_v32 = vadd.f32 %v1138_v28, %v3561_v57  ;;  %v226_v28 = vld [vmem:[%s4683_s0 + $0x698] sm:$0xff] }
 0x111   :  { %1829 = vmatpush.msrb.mxu1 %v580_v19  ;;  %v1159_v31 = vadd.f32 %v1158_v27, %v3561_v57  ;;  %1736 = vmatpush.msra.mxu0 %v71_v21  ;;  %v1098_v35 = vpop.f32.mrf.mxu0  ;;  %v297_v19 = vld [vmem:[%s4683_s0 + $0x8d0] sm:$0xff]  ;;  %v511_v21 = vld [vmem:[%s4683_s0 + $0xf80] sm:$0xff] }
 0x112   :  { %1852 = vmatpush.msrb.mxu2 %v365_v22  ;;  %2456 = vtanh.f32 %v1119_v26  ;;  %2386 = vmatmul.msk.f32.vlgmr.msrb.gmra.mxu0 %vm597_vm0, %v4237_v24  ;;  %v1099_v38 = vadd.f32 %v1098_v35, %v3561_v57  ;;  %v298_v22 = vld [vmem:[%s4683_s0 + $0x8d8] sm:$0xff]  ;;  %v225_v26 = vld [vmem:[%s4683_s0 + $0x690] sm:$0xff]  ;;  %v439_v27 = vld [vmem:[%s4683_s0 + $0xd40] sm:$0xff] }
 0x113   :  { %1830 = vmatpush.msrb.mxu1 %v508_v25  ;;  %2458 = vtanh.f32 %v1159_v31  ;;  %1809 = vmatpush.msrb.mxu0 %v579_v29  ;;  %v368_v25 = vld [vmem:[%s4683_s0 + $0xb08] sm:$0xff]  ;;  %v367_v31 = vld [vmem:[%s4683_s0 + $0xb00] sm:$0xff] }
 0x114   :  { %1872 = vmatpush.msrb.mxu3 %v366_v30  ;;  %2460 = vtanh.f32 %v1139_v32  ;;  %1853 = vmatpush.msrb.mxu2 %v293_v34  ;;  %v296_v29 = vld [vmem:[%s4683_s0 + $0x8c8] sm:$0xff]  ;;  %v153_v30 = vld [vmem:[%s4683_s0 + $0x450] sm:$0xff]  ;;  %v154_v32 = vld [vmem:[%s4683_s0 + $0x458] sm:$0xff] }
 0x115   :  { %1831 = vmatpush.msrb.mxu1 %v436_v33  ;;  %2462 = vtanh.f32 %v1099_v38  ;;  %1810 = vmatpush.msrb.mxu0 %v507_v36  ;;  %v295_v35 = vld [vmem:[%s4683_s0 + $0x8c0] sm:$0xff]  ;;  %v224_v36 = vld [vmem:[%s4683_s0 + $0x688] sm:$0xff] }
 0x116   :  { %1873 = vmatpush.msrb.mxu3 %v294_v37  ;;  %1854 = vmatpush.msrb.mxu2 %v221_v40  ;;  %v82_v40 = vld [vmem:[%s4683_s0 + $0x218] sm:$0xff] }
 0x117   :  { %1832 = vmatpush.msrb.mxu1 %v364_v39  ;;  %1811 = vmatpush.msrb.mxu0 %v435_v41  ;;  %v81_v39 = vld [vmem:[%s4683_s0 + $0x210] sm:$0xff] }
 0x118   :  { %v2457_v47 = vpop.eup %2456  ;;  %1874 = vmatpush.msrb.mxu3 %v222_v42  ;;  %1855 = vmatpush.msrb.mxu2 %v149_v44  ;;  %v590_v44 = vld [vmem:[%s4683_s0 + $0x11f8] sm:$0xff] }
 0x119   :  { %v2459_v50 = vpop.eup %2458  ;;  %1833 = vmatpush.msrb.mxu1 %v292_v43  ;;  %v2197_v52 = vrot.slane %v2457_v47, 4  ;;  %1812 = vmatpush.msrb.mxu0 %v363_v45  ;;  %v589_v43 = vld [vmem:[%s4683_s0 + $0x11f0] sm:$0xff]  ;;  %v223_v45 = vld [vmem:[%s4683_s0 + $0x680] sm:$0xff] }
 0x11a   :  { %v2461_v53 = vpop.eup %2460  ;;  %1875 = vmatpush.msrb.mxu3 %v150_v46  ;;  %v2198_v55 = vrot.slane %v2459_v50, 4  ;;  %1856 = vmatpush.msrb.mxu2 %v77_v49  ;;  %v152_v46 = vld [vmem:[%s4683_s0 + $0x448] sm:$0xff]  ;;  %v517_v49 = vld [vmem:[%s4683_s0 + $0xfb0] sm:$0xff]  ;;  %v518_v50 = vld [vmem:[%s4683_s0 + $0xfb8] sm:$0xff] }
 0x11b   :  { %v2463_v56 = vpop.eup %2462  ;;  %1834 = vmatpush.msrb.mxu1 %v220_v48  ;;  %1813 = vmatpush.msrb.mxu0 %v291_v51  ;;  %v151_v51 = vld [vmem:[%s4683_s0 + $0x440] sm:$0xff] }
 0x11c   :  { %1876 = vmatpush.msrb.mxu3 %v78_v59  ;;  %v2234_v63 = vsel %vm2221_vm1, %v2463_v56, %v2197_v52  ;;  %v2235_v0 = vsel %vm2221_vm1, %v2461_v53, %v2198_v55  ;;  %2392 = vmatmul.msk.f32.vlgmr.msra.gmra.mxu2 %vm597_vm0, %v4237_v24  ;;  %v80_v59 = vld [vmem:[%s4683_s0 + $0x208] sm:$0xff]  ;;  %v445_v52 = vld [vmem:[%s4683_s0 + $0xd70] sm:$0xff]  ;;  %v446_v55 = vld [vmem:[%s4683_s0 + $0xd78] sm:$0xff] }
 0x11d   :  { %2393 = vmatmul.msk.f32.vlgmr.msra.gmra.mxu3 %vm597_vm0, %v4237_v24  ;;  %2306 = vst [vmem:[%s4686_s3 + $0x60] sm:$0x77] %v2234_v63  ;;  %1929 = vmatpush.msra.mxu2 %v585_v58  ;;  %v588_v53 = vld [vmem:[%s4683_s0 + $0x11e8] sm:$0xff]  ;;  %v373_v56 = vld [vmem:[%s4683_s0 + $0xb30] sm:$0xff] }
 0x11e   :  { %1949 = vmatpush.msra.mxu3 %v586_v60  ;;  %2307 = vst [vmem:[%s4686_s3 + $0x68] sm:$0x77] %v2235_v0  ;;  %1814 = vmatpush.msrb.mxu0 %v219_v61  ;;  %v79_v60 = vld [vmem:[%s4683_s0 + $0x200] sm:$0xff]  ;;  %v516_v61 = vld [vmem:[%s4683_s0 + $0xfa8] sm:$0xff] }
 0x11f   :  { %1835 = vmatpush.msrb.mxu1 %v148_v62  ;;  %1930 = vmatpush.msra.mxu2 %v513_v1  ;;  %v587_v1 = vld [vmem:[%s4683_s0 + $0x11e0] sm:$0xff] }
 0x120   :  { %1950 = vmatpush.msra.mxu3 %v514_v2  ;;  %1815 = vmatpush.msrb.mxu0 %v147_v3  ;;  %v374_v2 = vld [vmem:[%s4683_s0 + $0xb38] sm:$0xff] }
 0x121   :  { %1836 = vmatpush.msrb.mxu1 %v76_v4  ;;  %v1198_v10 = vpop.f32.mrf.mxu1  ;;  %1931 = vmatpush.msra.mxu2 %v441_v5  ;;  %v1218_v14 = vpop.f32.mrf.mxu2 }
 0x122   :  { %2391 = vmatmul.msk.f32.vlgmr.msra.gmra.mxu1 %vm597_vm0, %v4237_v24  ;;  %v1199_v12 = vadd.f32 %v1198_v10, %v3561_v57  ;;  %v1238_v13 = vpop.f32.mrf.mxu3  ;;  %1951 = vmatpush.msra.mxu3 %v442_v7  ;;  %v1219_v54 = vadd.f32 %v1218_v14, %v3561_v57  ;;  %v444_v7 = vld [vmem:[%s4683_s0 + $0xd68] sm:$0xff]  ;;  %v302_v10 = vld [vmem:[%s4683_s0 + $0x8f8] sm:$0xff] }
 0x123   :  { %1909 = vmatpush.msra.mxu1 %v584_v6  ;;  %v1239_v17 = vadd.f32 %v1238_v13, %v3561_v57  ;;  %1816 = vmatpush.msrb.mxu0 %v75_v8  ;;  %v1178_v20 = vpop.f32.mrf.mxu0  ;;  %v515_v6 = vld [vmem:[%s4683_s0 + $0xfa0] sm:$0xff]  ;;  %v229_v13 = vld [vmem:[%s4683_s0 + $0x6b0] sm:$0xff]  ;;  %v230_v14 = vld [vmem:[%s4683_s0 + $0x6b8] sm:$0xff] }
 0x124   :  { %1932 = vmatpush.msra.mxu2 %v369_v9  ;;  %2464 = vtanh.f32 %v1199_v12  ;;  %2390 = vmatmul.msk.f32.vlgmr.msra.gmra.mxu0 %vm597_vm0, %v4237_v24  ;;  %v1179_v23 = vadd.f32 %v1178_v20, %v3561_v57  ;;  %v301_v9 = vld [vmem:[%s4683_s0 + $0x8f0] sm:$0xff]  ;;  %v372_v12 = vld [vmem:[%s4683_s0 + $0xb28] sm:$0xff] }
 0x125   :  { %1910 = vmatpush.msra.mxu1 %v512_v11  ;;  %2466 = vtanh.f32 %v1239_v17  ;;  %1889 = vmatpush.msra.mxu0 %v583_v15  ;;  %v443_v11 = vld [vmem:[%s4683_s0 + $0xd60] sm:$0xff]  ;;  %v300_v17 = vld [vmem:[%s4683_s0 + $0x8e8] sm:$0xff] }
 0x126   :  { %1952 = vmatpush.msra.mxu3 %v370_v16  ;;  %2468 = vtanh.f32 %v1219_v54  ;;  %1933 = vmatpush.msra.mxu2 %v297_v19  ;;  %v371_v15 = vld [vmem:[%s4683_s0 + $0xb20] sm:$0xff]  ;;  %v157_v54 = vld [vmem:[%s4683_s0 + $0x470] sm:$0xff]  ;;  %v158_v19 = vld [vmem:[%s4683_s0 + $0x478] sm:$0xff] }
 0x127   :  { %1911 = vmatpush.msra.mxu1 %v440_v18  ;;  %2470 = vtanh.f32 %v1179_v23  ;;  %1890 = vmatpush.msra.mxu0 %v511_v21  ;;  %v228_v23 = vld [vmem:[%s4683_s0 + $0x6a8] sm:$0xff] }
 0x128   :  { %1953 = vmatpush.msra.mxu3 %v298_v22  ;;  %1934 = vmatpush.msra.mxu2 %v225_v26  ;;  %v299_v22 = vld [vmem:[%s4683_s0 + $0x8e0] sm:$0xff] }
 0x129   :  { %1912 = vmatpush.msra.mxu1 %v368_v25  ;;  %1891 = vmatpush.msra.mxu0 %v439_v27  ;;  %v85_v27 = vld [vmem:[%s4683_s0 + $0x230] sm:$0xff] }
 0x12a   :  { %v2465_v33 = vpop.eup %2464  ;;  %1954 = vmatpush.msra.mxu3 %v226_v28  ;;  %1935 = vmatpush.msra.mxu2 %v153_v30  ;;  %v86_v28 = vld [vmem:[%s4683_s0 + $0x238] sm:$0xff] }
 0x12b   :  { %v2467_v34 = vpop.eup %2466  ;;  %1913 = vmatpush.msra.mxu1 %v296_v29  ;;  %v2199_v37 = vrot.slane %v2465_v33, 4  ;;  %1892 = vmatpush.msra.mxu0 %v367_v31  ;;  %v227_v31 = vld [vmem:[%s4683_s0 + $0x6a0] sm:$0xff] }
 0x12c   :  { %v2469_v38 = vpop.eup %2468  ;;  %1955 = vmatpush.msra.mxu3 %v154_v32  ;;  %v2200_v41 = vrot.slane %v2467_v34, 4  ;;  %2396 = vmatmul.msk.f32.vlgmr.msrb.gmra.mxu2 %vm597_vm0, %v4237_v24  ;;  %v156_v32 = vld [vmem:[%s4683_s0 + $0x468] sm:$0xff]  ;;  %v155_v33 = vld [vmem:[%s4683_s0 + $0x460] sm:$0xff] }
 0x12d   :  { %v2471_v42 = vpop.eup %2470  ;;  %2397 = vmatmul.msk.f32.vlgmr.msrb.gmra.mxu3 %vm597_vm0, %v4237_v24  ;;  %1893 = vmatpush.msra.mxu0 %v295_v35  ;;  %v84_v34 = vld [vmem:[%s4683_s0 + $0x228] sm:$0xff]  ;;  %v83_v35 = vld [vmem:[%s4683_s0 + $0x220] sm:$0xff] }
 0x12e   :  { %1914 = vmatpush.msra.mxu1 %v224_v36  ;;  %v2236_v47 = vsel %vm2221_vm1, %v2471_v42, %v2199_v37  ;;  %v2237_v48 = vsel %vm2221_vm1, %v2469_v38, %v2200_v41  ;;  %1936 = vmatpush.msra.mxu2 %v81_v39 }
 0x12f   :  { %1956 = vmatpush.msra.mxu3 %v82_v40  ;;  %2308 = vst [vmem:[%s4686_s3 + $0x70] sm:$0x77] %v2236_v47  ;;  %1894 = vmatpush.msra.mxu0 %v223_v45 }
 0x130   :  { %2009 = vmatpush.msrb.mxu2 %v589_v43  ;;  %2309 = vst [vmem:[%s4686_s3 + $0x78] sm:$0x77] %v2237_v48  ;;  %1915 = vmatpush.msra.mxu1 %v152_v46 }
 0x131   :  { %2029 = vmatpush.msrb.mxu3 %v590_v44  ;;  %2395 = vmatmul.msk.f32.vlgmr.msrb.gmra.mxu1 %vm597_vm0, %v4237_v24 }
 0x132   :  { %2010 = vmatpush.msrb.mxu2 %v517_v49  ;;  %1895 = vmatpush.msra.mxu0 %v151_v51 }
 0x133   :  { %2030 = vmatpush.msrb.mxu3 %v518_v50  ;;  %v1278_v58 = vpop.f32.mrf.mxu1  ;;  %1916 = vmatpush.msra.mxu1 %v80_v59  ;;  %v1298_v0 = vpop.f32.mrf.mxu2 }
 0x134   :  { %2011 = vmatpush.msrb.mxu2 %v445_v52  ;;  %v1279_v62 = vadd.f32 %v1278_v58, %v3561_v57  ;;  %v1318_v63 = vpop.f32.mrf.mxu3  ;;  %v1299_v4 = vadd.f32 %v1298_v0, %v3561_v57  ;;  %2394 = vmatmul.msk.f32.vlgmr.msrb.gmra.mxu0 %vm597_vm0, %v4237_v24 }
 0x135   :  { %1989 = vmatpush.msrb.mxu1 %v588_v53  ;;  %2031 = vmatpush.msrb.mxu3 %v446_v55  ;;  %v1319_v3 = vadd.f32 %v1318_v63, %v3561_v57  ;;  %v1258_v5 = vpop.f32.mrf.mxu0 }
 0x136   :  { %2012 = vmatpush.msrb.mxu2 %v373_v56  ;;  %2472 = vtanh.f32 %v1279_v62  ;;  %1896 = vmatpush.msra.mxu0 %v79_v60  ;;  %v1259_v8 = vadd.f32 %v1258_v5, %v3561_v57 }
 0x137   :  { %1990 = vmatpush.msrb.mxu1 %v516_v61  ;;  %2474 = vtanh.f32 %v1319_v3  ;;  %2032 = vmatpush.msrb.mxu3 %v374_v2 }
 0x138   :  { %1969 = vmatpush.msrb.mxu0 %v587_v1  ;;  %2476 = vtanh.f32 %v1299_v4  ;;  %2400 = vmatmul.msk.f32.vlgmr.msra.gmra.mxu2 %vm597_vm0, %v4237_v24 }
 0x139   :  { %2401 = vmatmul.msk.f32.vlgmr.msra.gmra.mxu3 %vm597_vm0, %v4237_v24  ;;  %2478 = vtanh.f32 %v1259_v8  ;;  %1991 = vmatpush.msrb.mxu1 %v444_v7 }
 0x13a   :  { %1970 = vmatpush.msrb.mxu0 %v515_v6  ;;  %2013 = vmatpush.msrb.mxu2 %v301_v9 }
 0x13b   :  { %2033 = vmatpush.msrb.mxu3 %v302_v10  ;;  %1992 = vmatpush.msrb.mxu1 %v372_v12 }
 0x13c   :  { %v2473_v16 = vpop.eup %2472  ;;  %1971 = vmatpush.msrb.mxu0 %v443_v11  ;;  %2014 = vmatpush.msrb.mxu2 %v229_v13 }
 0x13d   :  { %v2475_v18 = vpop.eup %2474  ;;  %2034 = vmatpush.msrb.mxu3 %v230_v14  ;;  %v2201_v20 = vrot.slane %v2473_v16, 4  ;;  %2399 = vmatmul.msk.f32.vlgmr.msra.gmra.mxu1 %vm597_vm0, %v4237_v24 }
 0x13e   :  { %v2477_v21 = vpop.eup %2476  ;;  %1972 = vmatpush.msrb.mxu0 %v371_v15  ;;  %v2202_v25 = vrot.slane %v2475_v18, 4  ;;  %1993 = vmatpush.msrb.mxu1 %v300_v17 }
 0x13f   :  { %v2479_v26 = vpop.eup %2478  ;;  %2015 = vmatpush.msrb.mxu2 %v157_v54  ;;  %2035 = vmatpush.msrb.mxu3 %v158_v19 }
 0x140   :  { %2398 = vmatmul.msk.f32.vlgmr.msra.gmra.mxu0 %vm597_vm0, %v4237_v24  ;;  %v2238_v29 = vsel %vm2221_vm1, %v2479_v26, %v2201_v20  ;;  %v2239_v30 = vsel %vm2221_vm1, %v2477_v21, %v2202_v25  ;;  %1994 = vmatpush.msrb.mxu1 %v228_v23 }
 0x141   :  { %1973 = vmatpush.msrb.mxu0 %v299_v22  ;;  %2310 = vst [vmem:[%s4686_s3 + $0x80] sm:$0x77] %v2238_v29  ;;  %2016 = vmatpush.msrb.mxu2 %v85_v27 }
 0x142   :  { %2036 = vmatpush.msrb.mxu3 %v86_v28  ;;  %2311 = vst [vmem:[%s4686_s3 + $0x88] sm:$0x77] %v2239_v30  ;;  %2404 = vmatmul.msk.f32.vlgmr.msrb.gmra.mxu2 %vm597_vm0, %v4237_v24 }
 0x143   :  { %2405 = vmatmul.msk.f32.vlgmr.msrb.gmra.mxu3 %vm597_vm0, %v4237_v24  ;;  %1974 = vmatpush.msrb.mxu0 %v227_v31 }
 0x144   :  { %1995 = vmatpush.msrb.mxu1 %v156_v32 }
 0x145   :  { %v1358_v36 = vpop.f32.mrf.mxu1  ;;  %1975 = vmatpush.msrb.mxu0 %v155_v33  ;;  %v1378_v39 = vpop.f32.mrf.mxu2 }
 0x146   :  { %1996 = vmatpush.msrb.mxu1 %v84_v34  ;;  %v1359_v37 = vadd.f32 %v1358_v36, %v3561_v57  ;;  %v1398_v38 = vpop.f32.mrf.mxu3  ;;  %v1379_v41 = vadd.f32 %v1378_v39, %v3561_v57 }
 0x147   :  { %2403 = vmatmul.msk.f32.vlgmr.msrb.gmra.mxu1 %vm597_vm0, %v4237_v24  ;;  %v1399_v40 = vadd.f32 %v1398_v38, %v3561_v57  ;;  %1976 = vmatpush.msrb.mxu0 %v83_v35  ;;  %v1338_v42 = vpop.f32.mrf.mxu0 }
 0x148   :  { %2480 = vtanh.f32 %v1359_v37  ;;  %2402 = vmatmul.msk.f32.vlgmr.msrb.gmra.mxu0 %vm597_vm0, %v4237_v24  ;;  %v1339_v43 = vadd.f32 %v1338_v42, %v3561_v57 }
 0x149   :  { %2482 = vtanh.f32 %v1399_v40 }
 0x14a   :  { %2484 = vtanh.f32 %v1379_v41 }
 0x14b   :  { %2486 = vtanh.f32 %v1339_v43 }
 0x14e   :  { %v2481_v44 = vpop.eup %2480 }
 0x14f   :  { %v2483_v45 = vpop.eup %2482  ;;  %v2203_v46 = vrot.slane %v2481_v44, 4 }
 0x150   :  { %v2485_v47 = vpop.eup %2484  ;;  %v2204_v48 = vrot.slane %v2483_v45, 4 }
 0x151   :  { %v2487_v49 = vpop.eup %2486 }
 0x152   :  { %v2240_v50 = vsel %vm2221_vm1, %v2487_v49, %v2203_v46  ;;  %v2241_v51 = vsel %vm2221_vm1, %v2485_v47, %v2204_v48 }
 0x153   :  { %2312 = vst [vmem:[%s4686_s3 + $0x90] sm:$0x77] %v2240_v50 }
 0x154   :  { %2313 = vst [vmem:[%s4686_s3 + $0x98] sm:$0x77] %v2241_v51 }
 0x157   :  { %v1438_v24 = vpop.f32.mrf.mxu1  ;;  %v1458_v53 = vpop.f32.mrf.mxu2 }
 0x158   :  { %v1439_v59 = vadd.f32 %v1438_v24, %v3561_v57  ;;  %v1478_v52 = vpop.f32.mrf.mxu3  ;;  %v1459_v56 = vadd.f32 %v1458_v53, %v3561_v57 }
 0x159   :  { %v1479_v55 = vadd.f32 %v1478_v52, %v3561_v57  ;;  %v1418_v58 = vpop.f32.mrf.mxu0 }
 0x15a   :  { %2488 = vtanh.f32 %v1439_v59  ;;  %v1419_v60 = vadd.f32 %v1418_v58, %v3561_v57 }
 0x15b   :  { %2490 = vtanh.f32 %v1479_v55 }
 0x15c   :  { %2492 = vtanh.f32 %v1459_v56 }
 0x15d   :  { %2494 = vtanh.f32 %v1419_v60 }
 0x160   :  { %v2489_v61 = vpop.eup %2488 }
 0x161   :  { %v2491_v62 = vpop.eup %2490  ;;  %v2205_v63 = vrot.slane %v2489_v61, 4 }
 0x162   :  { %v2493_v0 = vpop.eup %2492  ;;  %v2206_v1 = vrot.slane %v2491_v62, 4 }
 0x163   :  { %v2495_v2 = vpop.eup %2494 }
 0x164   :  { %v2242_v3 = vsel %vm2221_vm1, %v2495_v2, %v2205_v63  ;;  %v2243_v4 = vsel %vm2221_vm1, %v2493_v0, %v2206_v1 }
 0x165   :  { %2314 = vst [vmem:[%s4686_s3 + $0xa0] sm:$0x77] %v2242_v3 }
 0x166   :  { %2315 = vst [vmem:[%s4686_s3 + $0xa8] sm:$0x77] %v2243_v4 }
 0x169   :  { %v1518_v5 = vpop.f32.mrf.mxu1  ;;  %v1538_v8 = vpop.f32.mrf.mxu2 }
 0x16a   :  { %v1519_v6 = vadd.f32 %v1518_v5, %v3561_v57  ;;  %v1558_v7 = vpop.f32.mrf.mxu3  ;;  %v1539_v10 = vadd.f32 %v1538_v8, %v3561_v57 }
 0x16b   :  { %v1559_v9 = vadd.f32 %v1558_v7, %v3561_v57  ;;  %v1498_v11 = vpop.f32.mrf.mxu0 }
 0x16c   :  { %2496 = vtanh.f32 %v1519_v6  ;;  %v1499_v12 = vadd.f32 %v1498_v11, %v3561_v57 }
 0x16d   :  { %2498 = vtanh.f32 %v1559_v9 }
 0x16e   :  { %2500 = vtanh.f32 %v1539_v10 }
 0x16f   :  { %2502 = vtanh.f32 %v1499_v12 }
 0x172   :  { %v2497_v13 = vpop.eup %2496 }
 0x173   :  { %v2499_v14 = vpop.eup %2498  ;;  %v2207_v15 = vrot.slane %v2497_v13, 4 }
 0x174   :  { %v2501_v16 = vpop.eup %2500  ;;  %v2208_v17 = vrot.slane %v2499_v14, 4 }
 0x175   :  { %v2503_v54 = vpop.eup %2502 }
 0x176   :  { %v2244_v18 = vsel %vm2221_vm1, %v2503_v54, %v2207_v15  ;;  %v2245_v19 = vsel %vm2221_vm1, %v2501_v16, %v2208_v17 }
 0x177   :  { %2316 = vst [vmem:[%s4686_s3 + $0xb0] sm:$0x77] %v2244_v18 }
 0x178   :  { %2317 = vst [vmem:[%s4686_s3 + $0xb8] sm:$0x77] %v2245_v19 }
 0x17b   :  { %v1598_v20 = vpop.f32.mrf.mxu1  ;;  %v1618_v23 = vpop.f32.mrf.mxu2 }
 0x17c   :  { %v1599_v21 = vadd.f32 %v1598_v20, %v3561_v57  ;;  %v1638_v22 = vpop.f32.mrf.mxu3  ;;  %v1619_v26 = vadd.f32 %v1618_v23, %v3561_v57 }
 0x17d   :  { %v1639_v25 = vadd.f32 %v1638_v22, %v3561_v57  ;;  %v1578_v27 = vpop.f32.mrf.mxu0 }
 0x17e   :  { %2504 = vtanh.f32 %v1599_v21  ;;  %v1579_v28 = vadd.f32 %v1578_v27, %v3561_v57 }
 0x17f   :  { %2506 = vtanh.f32 %v1639_v25 }
 0x180   :  { %2508 = vtanh.f32 %v1619_v26 }
 0x181   :  { %2510 = vtanh.f32 %v1579_v28 }
 0x184   :  { %v2505_v29 = vpop.eup %2504 }
 0x185   :  { %v2507_v30 = vpop.eup %2506  ;;  %v2209_v31 = vrot.slane %v2505_v29, 4 }
 0x186   :  { %v2509_v32 = vpop.eup %2508  ;;  %v2210_v33 = vrot.slane %v2507_v30, 4 }
 0x187   :  { %v2511_v34 = vpop.eup %2510 }
 0x188   :  { %v2246_v35 = vsel %vm2221_vm1, %v2511_v34, %v2209_v31  ;;  %v2247_v36 = vsel %vm2221_vm1, %v2509_v32, %v2210_v33 }
 0x189   :  { %2318 = vst [vmem:[%s4686_s3 + $0xc0] sm:$0x77] %v2246_v35 }
 0x18a   :  { %2319 = vst [vmem:[%s4686_s3 + $0xc8] sm:$0x77] %v2247_v36 }
 0x18d   :  { %v1678_v37 = vpop.f32.mrf.mxu1  ;;  %v1698_v40 = vpop.f32.mrf.mxu2 }
 0x18e   :  { %v1679_v38 = vadd.f32 %v1678_v37, %v3561_v57  ;;  %v1718_v39 = vpop.f32.mrf.mxu3  ;;  %v1699_v42 = vadd.f32 %v1698_v40, %v3561_v57 }
 0x18f   :  { %v1719_v41 = vadd.f32 %v1718_v39, %v3561_v57  ;;  %v1658_v43 = vpop.f32.mrf.mxu0 }
 0x190   :  { %2512 = vtanh.f32 %v1679_v38  ;;  %v1659_v44 = vadd.f32 %v1658_v43, %v3561_v57 }
 0x191   :  { %2514 = vtanh.f32 %v1719_v41 }
 0x192   :  { %2516 = vtanh.f32 %v1699_v42 }
 0x193   :  { %2518 = vtanh.f32 %v1659_v44 }
 0x196   :  { %v2513_v45 = vpop.eup %2512 }
 0x197   :  { %v2515_v46 = vpop.eup %2514  ;;  %v2211_v47 = vrot.slane %v2513_v45, 4 }
 0x198   :  { %v2517_v48 = vpop.eup %2516  ;;  %v2212_v49 = vrot.slane %v2515_v46, 4 }
 0x199   :  { %v2519_v50 = vpop.eup %2518 }
 0x19a   :  { %v2248_v51 = vsel %vm2221_vm1, %v2519_v50, %v2211_v47  ;;  %v2249_v24 = vsel %vm2221_vm1, %v2517_v48, %v2212_v49 }
 0x19b   :  { %2320 = vst [vmem:[%s4686_s3 + $0xd0] sm:$0x77] %v2248_v51 }
 0x19c   :  { %2321 = vst [vmem:[%s4686_s3 + $0xd8] sm:$0x77] %v2249_v24 }
 0x19f   :  { %v1758_v59 = vpop.f32.mrf.mxu1  ;;  %v1778_v55 = vpop.f32.mrf.mxu2 }
 0x1a0   :  { %v1759_v52 = vadd.f32 %v1758_v59, %v3561_v57  ;;  %v1798_v53 = vpop.f32.mrf.mxu3  ;;  %v1779_v58 = vadd.f32 %v1778_v55, %v3561_v57 }
 0x1a1   :  { %v1799_v56 = vadd.f32 %v1798_v53, %v3561_v57  ;;  %v1738_v60 = vpop.f32.mrf.mxu0 }
 0x1a2   :  { %2520 = vtanh.f32 %v1759_v52  ;;  %v1739_v61 = vadd.f32 %v1738_v60, %v3561_v57 }
 0x1a3   :  { %2522 = vtanh.f32 %v1799_v56 }
 0x1a4   :  { %2524 = vtanh.f32 %v1779_v58 }
 0x1a5   :  { %2526 = vtanh.f32 %v1739_v61 }
 0x1a8   :  { %v2521_v62 = vpop.eup %2520 }
 0x1a9   :  { %v2523_v63 = vpop.eup %2522  ;;  %v2213_v0 = vrot.slane %v2521_v62, 4 }
 0x1aa   :  { %v2525_v1 = vpop.eup %2524  ;;  %v2214_v2 = vrot.slane %v2523_v63, 4 }
 0x1ab   :  { %v2527_v3 = vpop.eup %2526 }
 0x1ac   :  { %v2250_v4 = vsel %vm2221_vm1, %v2527_v3, %v2213_v0  ;;  %v2251_v5 = vsel %vm2221_vm1, %v2525_v1, %v2214_v2 }
 0x1ad   :  { %2322 = vst [vmem:[%s4686_s3 + $0xe0] sm:$0x77] %v2250_v4 }
 0x1ae   :  { %2323 = vst [vmem:[%s4686_s3 + $0xe8] sm:$0x77] %v2251_v5  ;;  %v1838_v6 = vpop.f32.mrf.mxu1 }
 0x1af   :  { %v1858_v7 = vpop.f32.mrf.mxu2  ;;  %v1839_v8 = vadd.f32 %v1838_v6, %v3561_v57 }
 0x1b0   :  { %v1859_v9 = vadd.f32 %v1858_v7, %v3561_v57  ;;  %v1878_v10 = vpop.f32.mrf.mxu3 }
 0x1b1   :  { %v1879_v11 = vadd.f32 %v1878_v10, %v3561_v57  ;;  %2528 = vtanh.f32 %v1839_v8  ;;  %v1818_v12 = vpop.f32.mrf.mxu0 }
 0x1b2   :  { %v1819_v13 = vadd.f32 %v1818_v12, %v3561_v57  ;;  %2530 = vtanh.f32 %v1859_v9 }
 0x1b3   :  { %2532 = vtanh.f32 %v1879_v11 }
 0x1b4   :  { %2534 = vtanh.f32 %v1819_v13 }
 0x1b7   :  { %v2529_v14 = vpop.eup %2528 }
 0x1b8   :  { %v2531_v15 = vpop.eup %2530  ;;  %v2215_v16 = vrot.slane %v2529_v14, 4 }
 0x1b9   :  { %v2533_v17 = vpop.eup %2532 }
 0x1ba   :  { %v1918_v54 = vpop.f32.mrf.mxu1  ;;  %v2535_v18 = vpop.eup %2534  ;;  %v2216_v19 = vrot.slane %v2533_v17, 4 }
 0x1bb   :  { %v1919_v20 = vadd.f32 %v1918_v54, %v3561_v57  ;;  %v1938_v21 = vpop.f32.mrf.mxu2  ;;  %v2252_v23 = vsel %vm2221_vm1, %v2535_v18, %v2215_v16 }
 0x1bc   :  { %v1958_v22 = vpop.f32.mrf.mxu3  ;;  %v1939_v26 = vadd.f32 %v1938_v21, %v3561_v57  ;;  %2324 = vst [vmem:[%s4686_s3 + $0xf0] sm:$0x77] %v2252_v23  ;;  %v2253_v28 = vsel %vm2221_vm1, %v2531_v15, %v2216_v19 }
 0x1bd   :  { %v1898_v25 = vpop.f32.mrf.mxu0  ;;  %v1959_v27 = vadd.f32 %v1958_v22, %v3561_v57  ;;  %2536 = vtanh.f32 %v1919_v20  ;;  %2325 = vst [vmem:[%s4686_s3 + $0xf8] sm:$0x77] %v2253_v28 }
 0x1be   :  { %v1899_v29 = vadd.f32 %v1898_v25, %v3561_v57  ;;  %2538 = vtanh.f32 %v1939_v26 }
 0x1c0   :  { %2540 = vtanh.f32 %v1899_v29 }
 0x1c1   :  { %2542 = vtanh.f32 %v1959_v27 }
 0x1c3   :  { %v2537_v30 = vpop.eup %2536 }
 0x1c4   :  { %v1998_v31 = vpop.f32.mrf.mxu1  ;;  %v2539_v32 = vpop.eup %2538  ;;  %v2217_v33 = vrot.slane %v2537_v30, 4 }
 0x1c5   :  { %v1999_v34 = vadd.f32 %v1998_v31, %v3561_v57  ;;  %v1978_v36 = vpop.f32.mrf.mxu0  ;;  %v2018_v37 = vpop.f32.mrf.mxu2 }
 0x1c6   :  { %v2541_v35 = vpop.eup %2540  ;;  %v1979_v40 = vadd.f32 %v1978_v36, %v3561_v57  ;;  %v2038_v41 = vpop.f32.mrf.mxu3  ;;  %v2019_v44 = vadd.f32 %v2018_v37, %v3561_v57 }
 0x1c7   :  { %v2543_v38 = vpop.eup %2542  ;;  %v2254_v39 = vsel %vm2221_vm1, %v2541_v35, %v2217_v33  ;;  %2544 = vtanh.f32 %v1999_v34  ;;  %v2039_v43 = vadd.f32 %v2038_v41, %v3561_v57 }
 0x1c8   :  { %2326 = vst [vmem:[%s4686_s3 + $0x100] sm:$0x77] %v2254_v39  ;;  %v2218_v42 = vrot.slane %v2543_v38, 4  ;;  %2546 = vtanh.f32 %v1979_v40 }
 0x1c9   :  { %2548 = vtanh.f32 %v2039_v43 }
 0x1ca   :  { %v2255_v45 = vsel %vm2221_vm1, %v2539_v32, %v2218_v42  ;;  %2550 = vtanh.f32 %v2019_v44 }
 0x1cb   :  { %2327 = vst [vmem:[%s4686_s3 + $0x108] sm:$0x77] %v2255_v45 }
 0x1cd   :  { %v2545_v46 = vpop.eup %2544 }
 0x1ce   :  { %v2219_v47 = vrot.slane %v2545_v46, 4  ;;  %v2547_v48 = vpop.eup %2546 }
 0x1cf   :  { %v2549_v50 = vpop.eup %2548 }
 0x1d0   :  { %v2256_v49 = vsel %vm2221_vm1, %v2547_v48, %v2219_v47  ;;  %v2220_v51 = vrot.slane %v2549_v50, 4  ;;  %v2551_v57 = vpop.eup %2550 }
 0x1d1   :  { %2328 = vst [vmem:[%s4686_s3 + $0x110] sm:$0x77] %v2256_v49 }
 0x1d2   :  { %v2257_v24 = vsel %vm2221_vm1, %v2551_v57, %v2220_v51 }
 0x1d3   :  { %2329 = vst [vmem:[%s4686_s3 + $0x118] sm:$0x77] %v2257_v24 }

// kernel: generator_forward.9
= control target key start
LH: loop header
LB: loop body
LE: loop exit
PB: predicated region body
PF: predicated region fallthrough
CT: control target
= control target key end

     0   :  { %s1038_s12 = smov 0   ;;  %s1252_s0 = inlined_call_operand.vmem [shape: bf16[6,72,64], index: 0, kind: input, shape index: {}]   ;;  %s1253_s1 = inlined_call_operand.vmem [shape: bf16[218,72], index: 1, kind: input, shape index: {}]   ;;  %s1254_s2 = inlined_call_operand.vmem [shape: bf16[64,256], index: 2, kind: input, shape index: {}]   ;;  %s1255_s3 = inlined_call_operand.vmem [shape: f32[6,218,256], index: 3, kind: output, shape index: {}]  }
   0x1 LB: > { %s806_s13 = sadd.s32 4294967295, %s1016_s12   ;;  %p810_p0 = scmp.ge.s32.totalorder %s1016_s12, 1  ;;  %s1016_s12 = sphi %s1038_s12, %s13_s12  }
   0x2   : > { %p137_p1 = scmp.lt.s32.totalorder %s1016_s12, 7 }
   0x4   : > { %p138_p2 = pnand %p810_p0, %p137_p1 }
   0x5   : > { %p161_p3 = scmp.lt.s32.totalorder (!%p138_p2), %s806_s13, 5 }
   0x6   : > { %141 = sbr.rel (%p138_p2) target bundleno = 477 (0x1dd), region = 32 }
   0xb   : > { %s1257_s13 = smov (!%p161_p3, %s806_s13), 5  ;;  %vm349_vm0 = vcmask 1043456   ;;  %v961_v8 = vld [vmem:[%s1253_s1] sm:$0xff]  ;;  %v972_v9 = vld [vmem:[%s1253_s1 + $0x58] sm:$0xff]  ;;  %vm306_vm1 = vcmask 588800   ;;  %v962_v10 = vld [vmem:[%s1253_s1 + $0x8] sm:$0xff] }
   0xc   : > { %s1000_s14 = smul.u32 36, %s1257_s13  ;;  %v973_v11 = vld [vmem:[%s1253_s1 + $0x60] sm:$0xff]  ;;  %v867_v12 = vld [vmem:[%s1253_s1 + $0x68] sm:$0xf]  ;;  %v974_v13 = vld [vmem:[%s1253_s1 + $0x68] sm:$0x10] }
   0xd   : > { %v963_v14 = vld [vmem:[%s1253_s1 + $0x10] sm:$0xff]  ;;  %v868_v15 = vor.u32 %v974_v13, %v867_v12  ;;  %v964_v16 = vld [vmem:[%s1253_s1 + $0x18] sm:$0xff]  ;;  %v965_v17 = vld [vmem:[%s1253_s1 + $0x20] sm:$0xff]  ;;  %vm494_vm2 = vcmask 523264   ;;  %s1001_s30 = smul.u32 448, %s1257_s13 }
   0xe   : > { %s165_s17 = scalar_lea.vmem %s1252_s0, %s1000_s14  ;;  %v966_v18 = vld [vmem:[%s1253_s1 + $0x28] sm:$0xff]  ;;  %v925_v19 = vld [vmem:[%s1254_s2 + $0x30] sm:$0xf]  ;;  %v986_v20 = vld [vmem:[%s1254_s2 + $0x34] sm:$0xf0] }
   0xf   : > { %v208_v0 = vld [vmem:[%s165_s17 + $0x20] sm:$0xf]  ;;  %v978_v4 = vld [vmem:[%s165_s17 + $0x18] sm:$0xff]  ;;  %v977_v5 = vld [vmem:[%s165_s17 + $0x10] sm:$0xff]  ;;  %v926_v22 = vor.u32 %v986_v20, %v925_v19  ;;  %s1185_s6 = scalar_lea.vmem %s1255_s3, %s1001_s30 }
  0x10   : > { %v296_v1 = vunpack.c.l.b16 %v208_v0  ;;  %v976_v6 = vld [vmem:[%s165_s17 + $0x8] sm:$0xff]  ;;  %v975_v7 = vld [vmem:[%s165_s17] sm:$0xff]  ;;  %v985_v21 = vld [vmem:[%s1254_s2 + $0x34] sm:$0xf] }
  0x11   : > { %v927_v23 = vld [vmem:[%s1254_s2 + $0x38] sm:$0xf0]  ;;  %541 = vmatpush.bf16.msra.mxu1 %v926_v22  ;;  %v917_v25 = vld [vmem:[%s1254_s2 + $0x20] sm:$0xf]  ;;  %v984_v26 = vld [vmem:[%s1254_s2 + $0x24] sm:$0xf0] }
  0x12   : > { %v301_v2 = vpack.c.b16 %v296_v1, %v296_v1  ;;  %v930_v24 = vor.u32 %v985_v21, %v927_v23  ;;  %v983_v27 = vld [vmem:[%s1254_s2 + $0x24] sm:$0xf]  ;;  %v918_v28 = vor.u32 %v984_v26, %v917_v25  ;;  %v919_v29 = vld [vmem:[%s1254_s2 + $0x28] sm:$0xf0]  ;;  %v967_v30 = vld [vmem:[%s1253_s1 + $0x30] sm:$0xff] }
  0x13   : > { %v922_v31 = vor.u32 %v983_v27, %v919_v29  ;;  %v909_v32 = vld [vmem:[%s1254_s2 + $0x10] sm:$0xf]  ;;  %v982_v33 = vld [vmem:[%s1254_s2 + $0x14] sm:$0xf0]  ;;  %v981_v34 = vld [vmem:[%s1254_s2 + $0x14] sm:$0xf] }
  0x14   : > { %v351_v3 = vsel %vm349_vm0, %v301_v2, 0  ;;  %620 = vmatpush.bf16.msra.mxu2 %v930_v24  ;;  %v910_v35 = vor.u32 %v982_v33, %v909_v32  ;;  %v911_v36 = vld [vmem:[%s1254_s2 + $0x18] sm:$0xf0]  ;;  %v901_v38 = vld [vmem:[%s1254_s2] sm:$0xf]  ;;  %v970_v51 = vld [vmem:[%s1253_s1 + $0x48] sm:$0xff] }
  0x15   : > { %356 = vmatpush.bf16.msra.mxu0 %v351_v3  ;;  %987 = vmatpush.bf16.msra.mxu3 %v351_v3  ;;  %v914_v37 = vor.u32 %v981_v34, %v911_v36  ;;  %v980_v39 = vld [vmem:[%s1254_s2 + $0x4] sm:$0xf0]  ;;  %v979_v40 = vld [vmem:[%s1254_s2 + $0x4] sm:$0xf]  ;;  %v903_v42 = vld [vmem:[%s1254_s2 + $0x8] sm:$0xf0] }
  0x16   : > { %542 = vmatpush.bf16.msra.mxu1 %v918_v28  ;;  %v902_v41 = vor.u32 %v980_v39, %v901_v38  ;;  %v906_v43 = vor.u32 %v979_v40, %v903_v42  ;;  %v968_v44 = vld [vmem:[%s1253_s1 + $0x38] sm:$0xff]  ;;  %v969_v45 = vld [vmem:[%s1253_s1 + $0x40] sm:$0xff]  ;;  %v971_v58 = vld [vmem:[%s1253_s1 + $0x50] sm:$0xff] }
  0x18   : > { %621 = vmatpush.bf16.msra.mxu2 %v922_v31 }
  0x19   : > { %357 = vmatpush.bf16.msra.mxu0 %v978_v4  ;;  %988 = vmatpush.bf16.msra.mxu3 %v978_v4 }
  0x1a   : > { %543 = vmatpush.bf16.msra.mxu1 %v910_v35 }
  0x1c   : > { %622 = vmatpush.bf16.msra.mxu2 %v914_v37 }
  0x1d   : > { %358 = vmatpush.bf16.msra.mxu0 %v977_v5  ;;  %989 = vmatpush.bf16.msra.mxu3 %v977_v5 }
  0x1e   : > { %544 = vmatpush.bf16.msra.mxu1 %v902_v41 }
  0x20   : > { %623 = vmatpush.bf16.msra.mxu2 %v906_v43 }
  0x21   : > { %359 = vmatpush.bf16.msra.mxu0 %v976_v6  ;;  %990 = vmatpush.bf16.msra.mxu3 %v976_v6 }
  0x25   : > { %360 = vmatpush.bf16.msra.mxu0 %v975_v7  ;;  %991 = vmatpush.bf16.msra.mxu3 %v975_v7 }
  0x28   : > { %885 = vmatmul.msk.bf16.vlgmr.msra.gmra.mxu0 %vm306_vm1, %v961_v8  ;;  %896 = vmatmul.msk.bf16.vlgmr.msra.gmra.mxu3 %vm306_vm1, %v972_v9 }
  0x29   : > { %992 = vmatpush.bf16.msrb.mxu3 %v926_v22 }
  0x2d   : > { %993 = vmatpush.bf16.msrb.mxu3 %v918_v28 }
  0x31   : > { %994 = vmatpush.bf16.msrb.mxu3 %v910_v35 }
  0x35   : > { %995 = vmatpush.bf16.msrb.mxu3 %v902_v41 }
  0x38   : > { %886 = vmatmul.msk.bf16.gmra.mxu0 %vm306_vm1, %v962_v10  ;;  %897 = vmatmul.msk.bf16.gmra.mxu3 %vm306_vm1, %v973_v11 }
  0x39   : > { %996 = vmatpush.bf16.msra.mxu3 %v930_v24 }
  0x3d   : > { %997 = vmatpush.bf16.msra.mxu3 %v922_v31 }
  0x41   : > { %998 = vmatpush.bf16.msra.mxu3 %v914_v37 }
  0x45   : > { %999 = vmatpush.bf16.msra.mxu3 %v906_v43 }
  0x48   : > { %887 = vmatmul.msk.bf16.gmra.mxu0 %vm306_vm1, %v963_v14  ;;  %898 = vmatmul.msk.bf16.gmra.mxu3 %vm306_vm1, %v868_v15 }
  0x58   : > { %888 = vmatmul.msk.bf16.gmra.mxu0 %vm306_vm1, %v964_v16 }
  0x68   : > { %889 = vmatmul.msk.bf16.gmra.mxu0 %vm306_vm1, %v965_v17 }
  0x78   : > { %890 = vmatmul.msk.bf16.gmra.mxu0 %vm306_vm1, %v966_v18 }
  0x88   : > { %891 = vmatmul.msk.bf16.gmra.mxu0 %vm306_vm1, %v967_v30 }
  0x98   : > { %892 = vmatmul.msk.bf16.gmra.mxu0 %vm306_vm1, %v968_v44 }
  0xa5   : > { %v362_v46 = vpop.f32.mrf.mxu0 }
  0xa8   : > { %893 = vmatmul.msk.bf16.gmra.mxu0 %vm306_vm1, %v969_v45 }
  0xab   : > { %v417_v47 = vpop.f32.mrf.mxu3 }
  0xad   : > { %v364_v48 = vpop.f32.mrf.mxu0 }
  0xae   : > { %v432_v49 = vpack.c.bf16 %v364_v48, %v362_v46 }
  0xb0   : > { %931 = vmatmul.msk.bf16.vlgmr.msra.gmra.mxu1 %vm494_vm2, %v432_v49  ;;  %945 = vmatmul.msk.bf16.vlgmr.msra.gmra.mxu2 %vm494_vm2, %v432_v49 }
  0xb3   : > { %v419_v50 = vpop.f32.mrf.mxu3 }
  0xb4   : > { %v443_v52 = vpack.c.bf16 %v419_v50, %v417_v47 }
  0xb5   : > { %v367_v53 = vpop.f32.mrf.mxu0 }
  0xb6   : > { %942 = vmatmul.msk.bf16.vlgmr.msrb.gmra.mxu3 %vm494_vm2, %v443_v52 }
  0xb8   : > { %894 = vmatmul.msk.bf16.gmra.mxu0 %vm306_vm1, %v970_v51 }
  0xbb   : > { %v422_v54 = vpop.f32.mrf.mxu3 }
  0xbd   : > { %v369_v55 = vpop.f32.mrf.mxu0 }
  0xbe   : > { %v433_v56 = vpack.c.bf16 %v369_v55, %v367_v53 }
  0xc0   : > { %932 = vmatmul.msk.bf16.gmra.mxu1 %vm494_vm2, %v433_v56  ;;  %946 = vmatmul.msk.bf16.gmra.mxu2 %vm494_vm2, %v433_v56 }
  0xc3   : > { %v424_v57 = vpop.f32.mrf.mxu3 }
  0xc4   : > { %v444_v59 = vpack.c.bf16 %v424_v57, %v422_v54 }
  0xc5   : > { %v372_v60 = vpop.f32.mrf.mxu0 }
  0xc6   : > { %943 = vmatmul.msk.bf16.gmra.mxu3 %vm494_vm2, %v444_v59 }
  0xc8   : > { %895 = vmatmul.msk.bf16.gmra.mxu0 %vm306_vm1, %v971_v58 }
  0xcb   : > { %v427_v61 = vpop.f32.mrf.mxu3 }
  0xcd   : > { %v374_v62 = vpop.f32.mrf.mxu0 }
  0xce   : > { %v434_v63 = vpack.c.bf16 %v374_v62, %v372_v60 }
  0xd0   : > { %933 = vmatmul.msk.bf16.gmra.mxu1 %vm494_vm2, %v434_v63  ;;  %947 = vmatmul.msk.bf16.gmra.mxu2 %vm494_vm2, %v434_v63 }
  0xd3   : > { %v429_v0 = vpop.f32.mrf.mxu3 }
  0xd4   : > { %v445_v1 = vpack.c.bf16 %v429_v0, %v427_v61 }
  0xd5   : > { %v377_v2 = vpop.f32.mrf.mxu0 }
  0xd6   : > { %944 = vmatmul.msk.bf16.gmra.mxu3 %vm494_vm2, %v445_v1 }
  0xdd   : > { %v379_v3 = vpop.f32.mrf.mxu0 }
  0xde   : > { %v435_v4 = vpack.c.bf16 %v379_v3, %v377_v2 }
  0xe0   : > { %934 = vmatmul.msk.bf16.gmra.mxu1 %vm494_vm2, %v435_v4  ;;  %948 = vmatmul.msk.bf16.gmra.mxu2 %vm494_vm2, %v435_v4 }
  0xe5   : > { %v382_v5 = vpop.f32.mrf.mxu0 }
  0xe6   : > { %956 = vmatmul.msk.bf16.vlgmr.msra.gmra.mxu3 %vm494_vm2, %v443_v52 }
  0xed   : > { %v384_v6 = vpop.f32.mrf.mxu0 }
  0xee   : > { %v436_v7 = vpack.c.bf16 %v384_v6, %v382_v5 }
  0xf0   : > { %935 = vmatmul.msk.bf16.gmra.mxu1 %vm494_vm2, %v436_v7  ;;  %949 = vmatmul.msk.bf16.gmra.mxu2 %vm494_vm2, %v436_v7 }
  0xf5   : > { %v387_v8 = vpop.f32.mrf.mxu0 }
  0xf6   : > { %957 = vmatmul.msk.bf16.gmra.mxu3 %vm494_vm2, %v444_v59 }
  0xfd   : > { %v389_v9 = vpop.f32.mrf.mxu0 }
  0xfe   : > { %v437_v10 = vpack.c.bf16 %v389_v9, %v387_v8 }
 0x100   : > { %936 = vmatmul.msk.bf16.gmra.mxu1 %vm494_vm2, %v437_v10  ;;  %950 = vmatmul.msk.bf16.gmra.mxu2 %vm494_vm2, %v437_v10 }
 0x105   : > { %v392_v11 = vpop.f32.mrf.mxu0 }
 0x106   : > { %958 = vmatmul.msk.bf16.gmra.mxu3 %vm494_vm2, %v445_v1 }
 0x10d   : > { %v394_v12 = vpop.f32.mrf.mxu0 }
 0x10e   : > { %v438_v13 = vpack.c.bf16 %v394_v12, %v392_v11 }
 0x110   : > { %937 = vmatmul.msk.bf16.gmra.mxu1 %vm494_vm2, %v438_v13  ;;  %951 = vmatmul.msk.bf16.gmra.mxu2 %vm494_vm2, %v438_v13 }
 0x115   : > { %v397_v14 = vpop.f32.mrf.mxu0 }
 0x11d   : > { %v399_v15 = vpop.f32.mrf.mxu0 }
 0x11e   : > { %v439_v16 = vpack.c.bf16 %v399_v15, %v397_v14 }
 0x120   : > { %938 = vmatmul.msk.bf16.gmra.mxu1 %vm494_vm2, %v439_v16  ;;  %952 = vmatmul.msk.bf16.gmra.mxu2 %vm494_vm2, %v439_v16 }
 0x125   : > { %v402_v17 = vpop.f32.mrf.mxu0 }
 0x12d   : > { %v404_v18 = vpop.f32.mrf.mxu0  ;;  %v546_v19 = vpop.f32.mrf.mxu1 }
 0x12e   : > { %v440_v20 = vpack.c.bf16 %v404_v18, %v402_v17  ;;  %695 = vst [vmem:[%s1185_s6] sm:$0xff] %v546_v19 }
 0x130   : > { %939 = vmatmul.msk.bf16.gmra.mxu1 %vm494_vm2, %v440_v20  ;;  %953 = vmatmul.msk.bf16.gmra.mxu2 %vm494_vm2, %v440_v20 }
 0x133   : > { %v625_v21 = vpop.f32.mrf.mxu2 }
 0x134   : > { %696 = vst [vmem:[%s1185_s6 + $0x8] sm:$0xff] %v625_v21 }
 0x135   : > { %v407_v22 = vpop.f32.mrf.mxu0  ;;  %v548_v23 = vpop.f32.mrf.mxu1 }
 0x136   : > { %697 = vst [vmem:[%s1185_s6 + $0x10] sm:$0xff] %v548_v23 }
 0x139   : > { %v601_v24 = vpop.f32.mrf.mxu3 }
 0x13a   : > { %739 = vst [vmem:[%s1185_s6 + $0x160] sm:$0xff] %v601_v24 }
 0x13b   : > { %v627_v25 = vpop.f32.mrf.mxu2 }
 0x13c   : > { %698 = vst [vmem:[%s1185_s6 + $0x18] sm:$0xff] %v627_v25 }
 0x13d   : > { %v409_v26 = vpop.f32.mrf.mxu0  ;;  %v551_v27 = vpop.f32.mrf.mxu1 }
 0x13e   : > { %v441_v28 = vpack.c.bf16 %v409_v26, %v407_v22  ;;  %699 = vst [vmem:[%s1185_s6 + $0x20] sm:$0xff] %v551_v27 }
 0x140   : > { %940 = vmatmul.msk.bf16.gmra.mxu1 %vm494_vm2, %v441_v28  ;;  %954 = vmatmul.msk.bf16.gmra.mxu2 %vm494_vm2, %v441_v28 }
 0x141   : > { %v603_v29 = vpop.f32.mrf.mxu3 }
 0x142   : > { %741 = vst [vmem:[%s1185_s6 + $0x170] sm:$0xff] %v603_v29 }
 0x143   : > { %v630_v30 = vpop.f32.mrf.mxu2 }
 0x144   : > { %700 = vst [vmem:[%s1185_s6 + $0x28] sm:$0xff] %v630_v30 }
 0x145   : > { %v412_v31 = vpop.f32.mrf.mxu0  ;;  %v553_v32 = vpop.f32.mrf.mxu1 }
 0x146   : > { %701 = vst [vmem:[%s1185_s6 + $0x30] sm:$0xff] %v553_v32 }
 0x149   : > { %v606_v33 = vpop.f32.mrf.mxu3 }
 0x14a   : > { %743 = vst [vmem:[%s1185_s6 + $0x180] sm:$0xff] %v606_v33 }
 0x14b   : > { %v632_v34 = vpop.f32.mrf.mxu2 }
 0x14c   : > { %702 = vst [vmem:[%s1185_s6 + $0x38] sm:$0xff] %v632_v34 }
 0x14d   : > { %v414_v35 = vpop.f32.mrf.mxu0  ;;  %v556_v36 = vpop.f32.mrf.mxu1 }
 0x14e   : > { %v442_v37 = vpack.c.bf16 %v414_v35, %v412_v31  ;;  %703 = vst [vmem:[%s1185_s6 + $0x40] sm:$0xff] %v556_v36 }
 0x150   : > { %941 = vmatmul.msk.bf16.gmra.mxu1 %vm494_vm2, %v442_v37  ;;  %955 = vmatmul.msk.bf16.gmra.mxu2 %vm494_vm2, %v442_v37 }
 0x151   : > { %v608_v38 = vpop.f32.mrf.mxu3 }
 0x152   : > { %745 = vst [vmem:[%s1185_s6 + $0x190] sm:$0xff] %v608_v38 }
 0x153   : > { %v635_v39 = vpop.f32.mrf.mxu2 }
 0x154   : > { %704 = vst [vmem:[%s1185_s6 + $0x48] sm:$0xff] %v635_v39 }
 0x155   : > { %v558_v40 = vpop.f32.mrf.mxu1 }
 0x156   : > { %705 = vst [vmem:[%s1185_s6 + $0x50] sm:$0xff] %v558_v40 }
 0x159   : > { %v611_v41 = vpop.f32.mrf.mxu3 }
 0x15a   : > { %747 = vst [vmem:[%s1185_s6 + $0x1a0] sm:$0xff] %v611_v41 }
 0x15b   : > { %v637_v42 = vpop.f32.mrf.mxu2 }
 0x15c   : > { %706 = vst [vmem:[%s1185_s6 + $0x58] sm:$0xff] %v637_v42 }
 0x15d   : > { %v561_v43 = vpop.f32.mrf.mxu1 }
 0x15e   : > { %707 = vst [vmem:[%s1185_s6 + $0x60] sm:$0xff] %v561_v43 }
 0x161   : > { %v613_v44 = vpop.f32.mrf.mxu3 }
 0x162   : > { %749 = vst [vmem:[%s1185_s6 + $0x1b0] sm:$0x3] %v613_v44 }
 0x163   : > { %v640_v45 = vpop.f32.mrf.mxu2 }
 0x164   : > { %708 = vst [vmem:[%s1185_s6 + $0x68] sm:$0xff] %v640_v45 }
 0x165   : > { %v563_v46 = vpop.f32.mrf.mxu1 }
 0x166   : > { %709 = vst [vmem:[%s1185_s6 + $0x70] sm:$0xff] %v563_v46 }
 0x169   : > { %v680_v47 = vpop.f32.mrf.mxu3 }
 0x16a   : > { %740 = vst [vmem:[%s1185_s6 + $0x168] sm:$0xff] %v680_v47 }
 0x16b   : > { %v642_v48 = vpop.f32.mrf.mxu2 }
 0x16c   : > { %710 = vst [vmem:[%s1185_s6 + $0x78] sm:$0xff] %v642_v48 }
 0x16d   : > { %v566_v49 = vpop.f32.mrf.mxu1 }
 0x16e   : > { %711 = vst [vmem:[%s1185_s6 + $0x80] sm:$0xff] %v566_v49 }
 0x171   : > { %v682_v50 = vpop.f32.mrf.mxu3 }
 0x172   : > { %742 = vst [vmem:[%s1185_s6 + $0x178] sm:$0xff] %v682_v50 }
 0x173   : > { %v645_v51 = vpop.f32.mrf.mxu2 }
 0x174   : > { %712 = vst [vmem:[%s1185_s6 + $0x88] sm:$0xff] %v645_v51 }
 0x175   : > { %v568_v52 = vpop.f32.mrf.mxu1 }
 0x176   : > { %713 = vst [vmem:[%s1185_s6 + $0x90] sm:$0xff] %v568_v52 }
 0x179   : > { %v685_v53 = vpop.f32.mrf.mxu3 }
 0x17a   : > { %744 = vst [vmem:[%s1185_s6 + $0x188] sm:$0xff] %v685_v53 }
 0x17b   : > { %v647_v54 = vpop.f32.mrf.mxu2 }
 0x17c   : > { %714 = vst [vmem:[%s1185_s6 + $0x98] sm:$0xff] %v647_v54 }
 0x17d   : > { %v571_v55 = vpop.f32.mrf.mxu1 }
 0x17e   : > { %715 = vst [vmem:[%s1185_s6 + $0xa0] sm:$0xff] %v571_v55 }
 0x181   : > { %v687_v56 = vpop.f32.mrf.mxu3 }
 0x182   : > { %746 = vst [vmem:[%s1185_s6 + $0x198] sm:$0xff] %v687_v56 }
 0x183   : > { %v650_v57 = vpop.f32.mrf.mxu2 }
 0x184   : > { %716 = vst [vmem:[%s1185_s6 + $0xa8] sm:$0xff] %v650_v57 }
 0x185   : > { %v573_v58 = vpop.f32.mrf.mxu1 }
 0x186   : > { %717 = vst [vmem:[%s1185_s6 + $0xb0] sm:$0xff] %v573_v58 }
 0x189   : > { %v690_v59 = vpop.f32.mrf.mxu3 }
 0x18a   : > { %748 = vst [vmem:[%s1185_s6 + $0x1a8] sm:$0xff] %v690_v59 }
 0x18b   : > { %v652_v60 = vpop.f32.mrf.mxu2 }
 0x18c   : > { %718 = vst [vmem:[%s1185_s6 + $0xb8] sm:$0xff] %v652_v60 }
 0x18d   : > { %v576_v61 = vpop.f32.mrf.mxu1 }
 0x18e   : > { %719 = vst [vmem:[%s1185_s6 + $0xc0] sm:$0xff] %v576_v61 }
 0x191   : > { %v692_v62 = vpop.f32.mrf.mxu3 }
 0x192   : > { %750 = vst [vmem:[%s1185_s6 + $0x1b8] sm:$0x3] %v692_v62 }
 0x193   : > { %v655_v63 = vpop.f32.mrf.mxu2 }
 0x194   : > { %720 = vst [vmem:[%s1185_s6 + $0xc8] sm:$0xff] %v655_v63 }
 0x195   : > { %v578_v0 = vpop.f32.mrf.mxu1 }
 0x196   : > { %721 = vst [vmem:[%s1185_s6 + $0xd0] sm:$0xff] %v578_v0 }
 0x19b   : > { %v657_v1 = vpop.f32.mrf.mxu2 }
 0x19c   : > { %722 = vst [vmem:[%s1185_s6 + $0xd8] sm:$0xff] %v657_v1 }
 0x19d   : > { %v581_v2 = vpop.f32.mrf.mxu1 }
 0x19e   : > { %723 = vst [vmem:[%s1185_s6 + $0xe0] sm:$0xff] %v581_v2 }
 0x1a3   : > { %v660_v3 = vpop.f32.mrf.mxu2 }
 0x1a4   : > { %724 = vst [vmem:[%s1185_s6 + $0xe8] sm:$0xff] %v660_v3 }
 0x1a5   : > { %v583_v4 = vpop.f32.mrf.mxu1 }
 0x1a6   : > { %725 = vst [vmem:[%s1185_s6 + $0xf0] sm:$0xff] %v583_v4 }
 0x1ab   : > { %v662_v5 = vpop.f32.mrf.mxu2 }
 0x1ac   : > { %726 = vst [vmem:[%s1185_s6 + $0xf8] sm:$0xff] %v662_v5 }
 0x1ad   : > { %v586_v6 = vpop.f32.mrf.mxu1 }
 0x1ae   : > { %727 = vst [vmem:[%s1185_s6 + $0x100] sm:$0xff] %v586_v6 }
 0x1b3   : > { %v665_v7 = vpop.f32.mrf.mxu2 }
 0x1b4   : > { %728 = vst [vmem:[%s1185_s6 + $0x108] sm:$0xff] %v665_v7 }
 0x1b5   : > { %v588_v8 = vpop.f32.mrf.mxu1 }
 0x1b6   : > { %729 = vst [vmem:[%s1185_s6 + $0x110] sm:$0xff] %v588_v8 }
 0x1bb   : > { %v667_v9 = vpop.f32.mrf.mxu2 }
 0x1bc   : > { %730 = vst [vmem:[%s1185_s6 + $0x118] sm:$0xff] %v667_v9 }
 0x1bd   : > { %v591_v10 = vpop.f32.mrf.mxu1 }
 0x1be   : > { %731 = vst [vmem:[%s1185_s6 + $0x120] sm:$0xff] %v591_v10 }
 0x1c3   : > { %v670_v11 = vpop.f32.mrf.mxu2 }
 0x1c4   : > { %732 = vst [vmem:[%s1185_s6 + $0x128] sm:$0xff] %v670_v11 }
 0x1c5   : > { %v593_v12 = vpop.f32.mrf.mxu1 }
 0x1c6   : > { %733 = vst [vmem:[%s1185_s6 + $0x130] sm:$0xff] %v593_v12 }
 0x1cb   : > { %v672_v13 = vpop.f32.mrf.mxu2 }
 0x1cc   : > { %734 = vst [vmem:[%s1185_s6 + $0x138] sm:$0xff] %v672_v13 }
 0x1cd   : > { %v596_v14 = vpop.f32.mrf.mxu1 }
 0x1ce   : > { %735 = vst [vmem:[%s1185_s6 + $0x140] sm:$0xff] %v596_v14 }
 0x1d3   : > { %v675_v15 = vpop.f32.mrf.mxu2 }
 0x1d4   : > { %736 = vst [vmem:[%s1185_s6 + $0x148] sm:$0xff] %v675_v15 }
 0x1d5   : > { %v598_v16 = vpop.f32.mrf.mxu1 }
 0x1d6   : > { %737 = vst [vmem:[%s1185_s6 + $0x150] sm:$0xff] %v598_v16 }
 0x1db   : > { %v677_v17 = vpop.f32.mrf.mxu2 }
 0x1dc   : > { %738 = vst [vmem:[%s1185_s6 + $0x158] sm:$0xff] %v677_v17 }
 0x1dd PF: > { %s13_s12 = sadd.s32 1, %s1016_s12  }
 0x1de   : > { %p10_p4 = scmp.ge.s32.totalorder %s13_s12, 8  }
 0x1e0   :  { %12 = sbr.rel (!%p10_p4) target bundleno = 1 (0x1), region = 62 }

</bundles_post_ra>
